<compile_context>
chip_gen: v6e
topology: v6e:2x2x1
jax: 0.10.0
libtpu: 0.0.40
codegen_flags: <defaults>
</compile_context>

<pallas_src>
import math
import numpy as np
import jax
import jax.numpy as jnp
from jax.experimental import pallas as pl
from jax.experimental.pallas import tpu as pltpu

EPS = 0.8      # eps of every BatchNorm1d in the module
SLOPE = 0.2    # LeakyReLU negative slope
L0 = 100       # fc1 output length == per-batch stream length throughout the conv stack
C = 32         # conv channel count


# ---------------------------------------------------------------------------
# The single fused kernel.
#   Activation slabs are (rows, B*L0) f32, lane index = 100*b + l.
#   rows = n_streams * channels; stream s of channel c sits at row s*C + c.
# ---------------------------------------------------------------------------
def generator_kernel(x_ref, w1_ref, bn1_ref, wc1_ref, cbn1_ref,
                     w2t_ref, cbn2_ref, w3t_ref, cbn3_ref,
                     w4t_ref, cbn4_ref, w5p_ref, bn2_ref, mask_ref, o_ref):
    B = x_ref.shape[0]
    N = B * L0                       # lane extent of every conv-stack slab

    keep_prev = mask_ref[0:1, :]     # 0.0 at per-batch l == 0       (left conv padding)
    keep_next = mask_ref[1:2, :]     # 0.0 at per-batch l == L0 - 1  (right conv padding)

    def leaky(v):                    # LeakyReLU(0.2): mul + max, no compare/select
        return jnp.maximum(v, SLOPE * v)

    def shift_prev(z):               # z[., l-1] within each batch, zero at l == 0
        s = jnp.concatenate(
            [jnp.zeros((z.shape[0], 1), jnp.float32), z[:, :N - 1]], axis=1)
        return s * keep_prev

    def shift_next(z):               # z[., l+1] within each batch, zero at l == L0-1
        s = jnp.concatenate(
            [z[:, 1:], jnp.zeros((z.shape[0], 1), jnp.float32)], axis=1)
        return s * keep_next

    def bn_streams(y, gcol, bcol, n_streams):
        # Training-mode BatchNorm fused to one scale/shift, per-channel statistics pooled
        # across the n_streams de-interleaved position blocks (== stats over (B, L_out)).
        c = y.shape[0] // n_streams
        rm = jnp.mean(y, axis=1, keepdims=True)          # per-row mean over B*L0 lanes
        rq = jnp.mean(y * y, axis=1, keepdims=True)
        m, q = rm[0:c], rq[0:c]
        for s in range(1, n_streams):
            m = m + rm[s * c:(s + 1) * c]
            q = q + rq[s * c:(s + 1) * c]
        inv = 1.0 / n_streams
        m, q = m * inv, q * inv
        var = q - m * m                                  # biased batch variance
        scale = gcol * jax.lax.rsqrt(var + EPS)
        shift = bcol - m * scale
        if n_streams > 1:
            scale = jnp.concatenate([scale] * n_streams, axis=0)
            shift = jnp.concatenate([shift] * n_streams, axis=0)
        return leaky(y * scale + shift)

    def bn_features(y, grow, brow):                      # BN over the batch axis (axis 0)
        m = jnp.mean(y, axis=0, keepdims=True)
        q = jnp.mean(y * y, axis=0, keepdims=True)
        var = q - m * m
        scale = grow * jax.lax.rsqrt(var + EPS)
        return leaky(y * scale + (brow - m * scale))

    # ---- fc1 + BN + LReLU: lane-dense (B,50)@(50,100); Linear bias folded away by BN ----
    h1 = bn_features(
        jnp.dot(x_ref[...], w1_ref[...], preferred_element_type=jnp.float32),
        bn1_ref[0:1, :], bn1_ref[1:2, :])                                   # (B, 100)

    # ---- conv1 (Cin=1, k=3, pad=1): outer products of shifted fc1 rows with tap columns --
    zc = jnp.zeros((B, 1), jnp.float32)
    hp = jnp.concatenate([zc, h1[:, :L0 - 1]], axis=1)                      # h[l-1]
    hn = jnp.concatenate([h1[:, 1:], zc], axis=1)                           # h[l+1]
    t0, t1, t2 = wc1_ref[:, 0:1], wc1_ref[:, 1:2], wc1_ref[:, 2:3]          # (32, 1) taps
    blocks = [t0 * hp[b:b + 1, :] + t1 * h1[b:b + 1, :] + t2 * hn[b:b + 1, :]
              for b in range(B)]                                            # (32, 100) each
    y1 = jnp.concatenate(blocks, axis=1)                                    # (32, N)
    z1 = bn_streams(y1, cbn1_ref[:, 0:1], cbn1_ref[:, 1:2], 1)

    # ---- conv2 on x2-upsample(z1): upsample folded into weights, output = [even; odd] ----
    x2 = jnp.concatenate([shift_prev(z1), z1, shift_next(z1)], axis=0)      # (96, N)
    y2 = jnp.dot(w2t_ref[...], x2, preferred_element_type=jnp.float32)      # (64, N)
    z2 = bn_streams(y2, cbn2_ref[:, 0:1], cbn2_ref[:, 1:2], 2)
    e2, o2 = z2[0:C, :], z2[C:2 * C, :]

    # ---- conv3 on x2-upsample(z2): 4 position streams, K = 128 exactly -------------------
    x3 = jnp.concatenate([shift_prev(o2), e2, o2, shift_next(e2)], axis=0)  # (128, N)
    y3 = jnp.dot(w3t_ref[...], x3, preferred_element_type=jnp.float32)      # (128, N)
    z3 = bn_streams(y3, cbn3_ref[:, 0:1], cbn3_ref[:, 1:2], 4)
    z3_0, z3_1 = z3[0:C, :], z3[C:2 * C, :]
    z3_2, z3_3 = z3[2 * C:3 * C, :], z3[3 * C:4 * C, :]

    # ---- conv4 (32 -> 1) on x2-upsample(z3): 8 position streams of 1 channel -------------
    x4 = jnp.concatenate(
        [shift_prev(z3_3), z3_0, z3_1, z3_2, z3_3, shift_next(z3_0)], axis=0)   # (192, N)
    y4 = jnp.dot(w4t_ref[...], x4, preferred_element_type=jnp.float32)      # (8, N)
    h4 = bn_streams(y4, cbn4_ref[:, 0:1], cbn4_ref[:, 1:2], 8)              # (8, N)

    # ---- squeeze + fc2 + BN + LReLU: ONE MXU matmul, K = 800 (row-permuted weights) ------
    rows = []
    for b in range(B):
        rows.append(jnp.concatenate(
            [h4[j:j + 1, b * L0:(b + 1) * L0] for j in range(8)], axis=1))  # (1, 800)
    hrow = jnp.concatenate(rows, axis=0)                                    # (B, 800)
    y5 = jnp.dot(hrow, w5p_ref[...], preferred_element_type=jnp.float32)    # (B, 100)
    o_ref[...] = bn_features(y5, bn2_ref[0:1, :], bn2_ref[1:2, :])


# ---------------------------------------------------------------------------
# Host-side parameter packing (tiny, runs once under jit).
#   * Conv biases / Linear biases are dropped: exactly cancelled by training-mode BN.
#   * Upsample folding: conv_{i+1}(nearest_x2(z)) at output position 2l / 2l+1 only needs
#     z[l-1], z[l], z[l+1] with tap sums (w1+w2), (w0+w1) -- these sums are baked into the
#     packed (rows=out-streams*Cout, cols=in-blocks*Cin) weight matrices below.
#   * fc2 rows are permuted to (stream j, l) order so the kernel needs no interleave.
# ---------------------------------------------------------------------------
def _pack_params(p, B):
    z32 = jnp.zeros((C, C), jnp.float32)

    W0, W1, W2 = p['c2_w'][0], p['c2_w'][1], p['c2_w'][2]          # (cin, cout)
    w2t = jnp.concatenate([
        jnp.concatenate([W0.T, (W1 + W2).T, z32], axis=1),         # even output positions
        jnp.concatenate([z32, (W0 + W1).T, W2.T], axis=1),         # odd output positions
    ], axis=0)                                                     # (64, 96)

    V0, V1, V2 = p['c3_w'][0], p['c3_w'][1], p['c3_w'][2]
    w3t = jnp.concatenate([
        jnp.concatenate([V0.T, (V1 + V2).T, z32, z32], axis=1),    # positions 4l+0
        jnp.concatenate([z32, (V0 + V1).T, V2.T, z32], axis=1),    # 4l+1
        jnp.concatenate([z32, V0.T, (V1 + V2).T, z32], axis=1),    # 4l+2
        jnp.concatenate([z32, z32, (V0 + V1).T, V2.T], axis=1),    # 4l+3
    ], axis=0)                                                     # (128, 128)

    u0, u1, u2 = p['c4_w'][0][:, 0], p['c4_w'][1][:, 0], p['c4_w'][2][:, 0]   # (32,)
    A, Bv, Cv, D = u0, u1 + u2, u0 + u1, u2
    zv = jnp.zeros((C,), jnp.float32)

    def _row(blks):                                                # 6 x (32,) -> (1, 192)
        return jnp.concatenate(blks, axis=0)[None, :]

    # column blocks of x4: [prev(z3_3) | z3_0 | z3_1 | z3_2 | z3_3 | next(z3_0)]
    w4t = jnp.concatenate([
        _row([A,  Bv, zv, zv, zv, zv]),    # position 8l+0
        _row([zv, Cv, D,  zv, zv, zv]),    # 8l+1
        _row([zv, A,  Bv, zv, zv, zv]),    # 8l+2
        _row([zv, zv, Cv, D,  zv, zv]),    # 8l+3
        _row([zv, zv, A,  Bv, zv, zv]),    # 8l+4
        _row([zv, zv, zv, Cv, D,  zv]),    # 8l+5
        _row([zv, zv, zv, A,  Bv, zv]),    # 8l+6
        _row([zv, zv, zv, zv, Cv, D]),     # 8l+7
    ], axis=0)                                                     # (8, 192)

    # fc2 weight rows reordered from position index 8l+j to (j-major, l) order.
    w5p = p['fc2_w'].reshape(L0, 8, L0).transpose(1, 0, 2).reshape(8 * L0, L0)   # (800, 100)

    pos = np.arange(B * L0) % L0
    masks = jnp.asarray(np.stack([(pos != 0).astype(np.float32),
                                  (pos != L0 - 1).astype(np.float32)], axis=0))  # (2, B*L0)

    return [
        p['fc1_w'],                                                          # (50, 100)
        jnp.concatenate([p['bn1_g'], p['bn1_b']], axis=0),                   # (2, 100)
        p['c1_w'][:, 0, :].T,                                                # (32, 3)
        jnp.concatenate([p['cbn1_g'].T, p['cbn1_b'].T], axis=1),             # (32, 2)
        w2t,
        jnp.concatenate([p['cbn2_g'].T, p['cbn2_b'].T], axis=1),             # (32, 2)
        w3t,
        jnp.concatenate([p['cbn3_g'].T, p['cbn3_b'].T], axis=1),             # (32, 2)
        w4t,
        jnp.concatenate([p['cbn4_g'], p['cbn4_b']], axis=1),                 # (1, 2)
        w5p,
        jnp.concatenate([p['bn2_g'], p['bn2_b']], axis=0),                   # (2, 100)
        masks,
    ]


def _full_spec(shape):
    nd = len(shape)
    return pl.BlockSpec(shape, lambda i, _nd=nd: (0,) * _nd)


def generator_forward(x, p):
    B = x.shape[0]
    operands = [x] + _pack_params(p, B)
    return pl.pallas_call(
        generator_kernel,
        out_shape=jax.ShapeDtypeStruct((B, L0), jnp.float32),
        grid=(1,),
        in_specs=[_full_spec(a.shape) for a in operands],
        out_specs=_full_spec((B, L0)),
        compiler_params=pltpu.CompilerParams(dimension_semantics=("arbitrary",)),
        # TODO(synk): for large B, tile the grid over batch ('parallel') so v7x's second
        # TensorCore is used and per-step VMEM stays bounded; at B=2 a single step is best.
    )(*operands)


# ---------------------------------------------------------------------------
# Deterministic parameter init (mimics torch fan-in uniform; BN affine defaults).
# ---------------------------------------------------------------------------
def init_params(key):
    def u(k, shape, fan_in):
        bound = 1.0 / math.sqrt(fan_in)
        return jax.random.uniform(k, shape, jnp.float32, -bound, bound)

    ks = jax.random.split(key, 12)
    p = {}
    p['fc1_w'] = u(ks[0], (50, 100), 50)            # Linear(50, 100), stored (in, out)
    p['fc1_b'] = u(ks[1], (1, 100), 50)
    p['bn1_g'] = jnp.ones((1, 100), jnp.float32)
    p['bn1_b'] = jnp.zeros((1, 100), jnp.float32)

    p['c1_w'] = u(ks[2], (3, 1, 32), 1 * 3)         # Conv1d(1, 32, 3), stored (k, cin, cout)
    p['c1_b'] = u(ks[3], (1, 32), 1 * 3)
    p['cbn1_g'] = jnp.ones((1, 32), jnp.float32)
    p['cbn1_b'] = jnp.zeros((1, 32), jnp.float32)

    p['c2_w'] = u(ks[4], (3, 32, 32), 32 * 3)       # Conv1d(32, 32, 3)
    p['c2_b'] = u(ks[5], (1, 32), 32 * 3)
    p['cbn2_g'] = jnp.ones((1, 32), jnp.float32)
    p['cbn2_b'] = jnp.zeros((1, 32), jnp.float32)

    p['c3_w'] = u(ks[6], (3, 32, 32), 32 * 3)       # Conv1d(32, 32, 3)
    p['c3_b'] = u(ks[7], (1, 32), 32 * 3)
    p['cbn3_g'] = jnp.ones((1, 32), jnp.float32)
    p['cbn3_b'] = jnp.zeros((1, 32), jnp.float32)

    p['c4_w'] = u(ks[8], (3, 32, 1), 32 * 3)        # Conv1d(32, 1, 3)
    p['c4_b'] = u(ks[9], (1, 1), 32 * 3)
    p['cbn4_g'] = jnp.ones((1, 1), jnp.float32)
    p['cbn4_b'] = jnp.zeros((1, 1), jnp.float32)

    p['fc2_w'] = u(ks[10], (800, 100), 800)         # Linear(800, 100)
    p['fc2_b'] = u(ks[11], (1, 100), 800)
    p['bn2_g'] = jnp.ones((1, 100), jnp.float32)
    p['bn2_b'] = jnp.zeros((1, 100), jnp.float32)
    return p


# ---------------------------------------------------------------------------
# Pure-JAX reference (full PyTorch semantics, incl. the BN-cancelled biases).
# ---------------------------------------------------------------------------
def reference_forward(x, p):
    def lrelu(y):
        return jnp.where(y >= 0, y, SLOPE * y)

    def bn(y, g, b, axes):
        m = jnp.mean(y, axis=axes, keepdims=True)
        v = jnp.mean((y - m) ** 2, axis=axes, keepdims=True)
        return g * (y - m) / jnp.sqrt(v + EPS) + b

    def conv(h, w, b):                               # h (B,L,Cin), w (3,Cin,Cout)
        B, L, _ = h.shape
        hp = jnp.pad(h, ((0, 0), (1, 1), (0, 0)))
        return (jnp.einsum('blc,cd->bld', hp[:, 0:L], w[0])
                + jnp.einsum('blc,cd->bld', hp[:, 1:L + 1], w[1])
                + jnp.einsum('blc,cd->bld', hp[:, 2:L + 2], w[2]) + b)

    h = lrelu(bn(x @ p['fc1_w'] + p['fc1_b'], p['bn1_g'], p['bn1_b'], (0,)))
    h = h[:, :, None]
    h = lrelu(bn(conv(h, p['c1_w'], p['c1_b']), p['cbn1_g'], p['cbn1_b'], (0, 1)))
    h = jnp.repeat(h, 2, axis=1)
    h = lrelu(bn(conv(h, p['c2_w'], p['c2_b']), p['cbn2_g'], p['cbn2_b'], (0, 1)))
    h = jnp.repeat(h, 2, axis=1)
    h = lrelu(bn(conv(h, p['c3_w'], p['c3_b']), p['cbn3_g'], p['cbn3_b'], (0, 1)))
    h = jnp.repeat(h, 2, axis=1)
    h = lrelu(bn(conv(h, p['c4_w'], p['c4_b']), p['cbn4_g'], p['cbn4_b'], (0, 1)))
    h = h[:, :, 0]
    h = lrelu(bn(h @ p['fc2_w'] + p['fc2_b'], p['bn2_g'], p['bn2_b'], (0,)))
    return h


if __name__ == "__main__":
    key = jax.random.PRNGKey(0)
    pkey, xkey = jax.random.split(key)
    params = init_params(pkey)

    B = 2
    x = jax.random.normal(xkey, (B, 50), jnp.float32)   # Generator input is (B, 50)

    out = jax.block_until_ready(jax.jit(generator_forward)(x, params))
    assert out.shape == (B, 100), out.shape

    ref = reference_forward(x, params)
    np.testing.assert_allclose(np.asarray(out), np.asarray(ref), atol=2e-2, rtol=2e-2)

    print("KERNEL_OK")
</pallas_src>

<mosaic_0001>
module attributes {stable_mosaic.version = 11 : i64} {
  func.func @generator_kernel(%arg0: i32, %arg1: memref<2x50xf32, #tpu.memory_space<vmem>>, %arg2: memref<50x100xf32, #tpu.memory_space<vmem>>, %arg3: memref<2x100xf32, #tpu.memory_space<vmem>>, %arg4: memref<32x3xf32, #tpu.memory_space<vmem>>, %arg5: memref<32x2xf32, #tpu.memory_space<vmem>>, %arg6: memref<64x96xf32, #tpu.memory_space<vmem>>, %arg7: memref<32x2xf32, #tpu.memory_space<vmem>>, %arg8: memref<128x128xf32, #tpu.memory_space<vmem>>, %arg9: memref<32x2xf32, #tpu.memory_space<vmem>>, %arg10: memref<8x192xf32, #tpu.memory_space<vmem>>, %arg11: memref<1x2xf32, #tpu.memory_space<vmem>>, %arg12: memref<800x100xf32, #tpu.memory_space<vmem>>, %arg13: memref<2x100xf32, #tpu.memory_space<vmem>>, %arg14: memref<2x200xf32, #tpu.memory_space<vmem>>, %arg15: memref<2x100xf32, #tpu.memory_space<vmem>>) attributes {dimension_semantics = [#tpu.dimension_semantics<arbitrary>], iteration_bounds = array<i64: 1>, scalar_prefetch = 0 : i64, scratch_operands = 0 : i64, tpu.core_type = #tpu.core_type<tc>, window_params = [{pipeline_mode = #tpu.pipeline_mode<synchronous>, transform_indices = @transform_0, window_bounds = array<i64: 2, 50>}, {pipeline_mode = #tpu.pipeline_mode<synchronous>, transform_indices = @transform_1, window_bounds = array<i64: 50, 100>}, {pipeline_mode = #tpu.pipeline_mode<synchronous>, transform_indices = @transform_2, window_bounds = array<i64: 2, 100>}, {pipeline_mode = #tpu.pipeline_mode<synchronous>, transform_indices = @transform_3, window_bounds = array<i64: 32, 3>}, {pipeline_mode = #tpu.pipeline_mode<synchronous>, transform_indices = @transform_4, window_bounds = array<i64: 32, 2>}, {pipeline_mode = #tpu.pipeline_mode<synchronous>, transform_indices = @transform_5, window_bounds = array<i64: 64, 96>}, {pipeline_mode = #tpu.pipeline_mode<synchronous>, transform_indices = @transform_6, window_bounds = array<i64: 32, 2>}, {pipeline_mode = #tpu.pipeline_mode<synchronous>, transform_indices = @transform_7, window_bounds = array<i64: 128, 128>}, {pipeline_mode = #tpu.pipeline_mode<synchronous>, transform_indices = @transform_8, window_bounds = array<i64: 32, 2>}, {pipeline_mode = #tpu.pipeline_mode<synchronous>, transform_indices = @transform_9, window_bounds = array<i64: 8, 192>}, {pipeline_mode = #tpu.pipeline_mode<synchronous>, transform_indices = @transform_10, window_bounds = array<i64: 1, 2>}, {pipeline_mode = #tpu.pipeline_mode<synchronous>, transform_indices = @transform_11, window_bounds = array<i64: 800, 100>}, {pipeline_mode = #tpu.pipeline_mode<synchronous>, transform_indices = @transform_12, window_bounds = array<i64: 2, 100>}, {pipeline_mode = #tpu.pipeline_mode<synchronous>, transform_indices = @transform_13, window_bounds = array<i64: 2, 200>}, {pipeline_mode = #tpu.pipeline_mode<synchronous>, transform_indices = @transform_14, window_bounds = array<i64: 2, 100>}]} {
    %c0 = arith.constant 0 : index
    %c0_0 = arith.constant 0 : index
    %0 = vector.load %arg14[%c0, %c0_0] : memref<2x200xf32, #tpu.memory_space<vmem>>, vector<1x200xf32>
    %c1 = arith.constant 1 : index
    %c0_1 = arith.constant 0 : index
    %1 = vector.load %arg14[%c1, %c0_1] : memref<2x200xf32, #tpu.memory_space<vmem>>, vector<1x200xf32>
    %c0_2 = arith.constant 0 : index
    %c0_3 = arith.constant 0 : index
    %2 = vector.load %arg1[%c0_2, %c0_3] : memref<2x50xf32, #tpu.memory_space<vmem>>, vector<2x50xf32>
    %c0_4 = arith.constant 0 : index
    %c0_5 = arith.constant 0 : index
    %3 = vector.load %arg2[%c0_4, %c0_5] : memref<50x100xf32, #tpu.memory_space<vmem>>, vector<50x100xf32>
    %cst = arith.constant dense<0.000000e+00> : vector<2x100xf32>
    %4 = tpu.matmul %2, %3, %cst {dimension_numbers = #tpu.dot_dimension_numbers<[1], [0], [0], [1], [0, 0, 1, 1], [], []>} : vector<2x50xf32>, vector<50x100xf32>, vector<2x100xf32> -> vector<2x100xf32>
    %c0_6 = arith.constant 0 : index
    %c0_7 = arith.constant 0 : index
    %5 = vector.load %arg3[%c0_6, %c0_7] : memref<2x100xf32, #tpu.memory_space<vmem>>, vector<1x100xf32>
    %c1_8 = arith.constant 1 : index
    %c0_9 = arith.constant 0 : index
    %6 = vector.load %arg3[%c1_8, %c0_9] : memref<2x100xf32, #tpu.memory_space<vmem>>, vector<1x100xf32>
    %cst_10 = arith.constant dense<0.000000e+00> : vector<100xf32>
    %7 = vector.multi_reduction <add>, %4, %cst_10 [0] : vector<2x100xf32> to vector<100xf32>
    %8 = vector.shape_cast %7 : vector<100xf32> to vector<1x100xf32>
    %cst_11 = arith.constant 2.000000e+00 : f32
    %9 = vector.broadcast %cst_11 : f32 to vector<1x100xf32>
    %10 = arith.divf %8, %9 : vector<1x100xf32>
    %11 = arith.mulf %4, %4 : vector<2x100xf32>
    %cst_12 = arith.constant dense<0.000000e+00> : vector<100xf32>
    %12 = vector.multi_reduction <add>, %11, %cst_12 [0] : vector<2x100xf32> to vector<100xf32>
    %13 = vector.shape_cast %12 : vector<100xf32> to vector<1x100xf32>
    %cst_13 = arith.constant 2.000000e+00 : f32
    %14 = vector.broadcast %cst_13 : f32 to vector<1x100xf32>
    %15 = arith.divf %13, %14 : vector<1x100xf32>
    %16 = arith.mulf %10, %10 : vector<1x100xf32>
    %17 = arith.subf %15, %16 : vector<1x100xf32>
    %cst_14 = arith.constant 8.000000e-01 : f32
    %18 = vector.broadcast %cst_14 : f32 to vector<1x100xf32>
    %19 = arith.addf %17, %18 : vector<1x100xf32>
    %20 = math.rsqrt %19 : vector<1x100xf32>
    %21 = arith.mulf %5, %20 : vector<1x100xf32>
    %22 = vector.broadcast %21 : vector<1x100xf32> to vector<2x100xf32>
    %23 = arith.mulf %4, %22 : vector<2x100xf32>
    %24 = arith.mulf %10, %21 : vector<1x100xf32>
    %25 = arith.subf %6, %24 : vector<1x100xf32>
    %26 = vector.broadcast %25 : vector<1x100xf32> to vector<2x100xf32>
    %27 = arith.addf %23, %26 : vector<2x100xf32>
    %cst_15 = arith.constant 2.000000e-01 : f32
    %28 = vector.broadcast %cst_15 : f32 to vector<2x100xf32>
    %29 = arith.mulf %28, %27 : vector<2x100xf32>
    %30 = arith.maximumf %27, %29 : vector<2x100xf32>
    %cst_16 = arith.constant 0.000000e+00 : f32
    %31 = vector.broadcast %cst_16 : f32 to vector<2x1xf32>
    %32 = vector.extract_strided_slice %30 {offsets = [0, 0], sizes = [2, 99], strides = [1, 1]} : vector<2x100xf32> to vector<2x99xf32>
    %33 = tpu.concatenate %31, %32 in 1 : vector<2x1xf32>, vector<2x99xf32> -> vector<2x100xf32>
    %34 = vector.extract_strided_slice %30 {offsets = [0, 1], sizes = [2, 99], strides = [1, 1]} : vector<2x100xf32> to vector<2x99xf32>
    %35 = tpu.concatenate %34, %31 in 1 : vector<2x99xf32>, vector<2x1xf32> -> vector<2x100xf32>
    %c0_17 = arith.constant 0 : index
    %c0_18 = arith.constant 0 : index
    %36 = vector.load %arg4[%c0_17, %c0_18] : memref<32x3xf32, #tpu.memory_space<vmem>>, vector<32x1xf32>
    %c0_19 = arith.constant 0 : index
    %c1_20 = arith.constant 1 : index
    %37 = vector.load %arg4[%c0_19, %c1_20] : memref<32x3xf32, #tpu.memory_space<vmem>>, vector<32x1xf32>
    %c0_21 = arith.constant 0 : index
    %c2 = arith.constant 2 : index
    %38 = vector.load %arg4[%c0_21, %c2] : memref<32x3xf32, #tpu.memory_space<vmem>>, vector<32x1xf32>
    %39 = vector.extract_strided_slice %33 {offsets = [0, 0], sizes = [1, 100], strides = [1, 1]} : vector<2x100xf32> to vector<1x100xf32>
    %40 = vector.broadcast %36 : vector<32x1xf32> to vector<32x100xf32>
    %41 = vector.broadcast %39 : vector<1x100xf32> to vector<32x100xf32>
    %42 = arith.mulf %40, %41 : vector<32x100xf32>
    %43 = vector.extract_strided_slice %30 {offsets = [0, 0], sizes = [1, 100], strides = [1, 1]} : vector<2x100xf32> to vector<1x100xf32>
    %44 = vector.broadcast %37 : vector<32x1xf32> to vector<32x100xf32>
    %45 = vector.broadcast %43 : vector<1x100xf32> to vector<32x100xf32>
    %46 = arith.mulf %44, %45 : vector<32x100xf32>
    %47 = arith.addf %42, %46 : vector<32x100xf32>
    %48 = vector.extract_strided_slice %35 {offsets = [0, 0], sizes = [1, 100], strides = [1, 1]} : vector<2x100xf32> to vector<1x100xf32>
    %49 = vector.broadcast %38 : vector<32x1xf32> to vector<32x100xf32>
    %50 = vector.broadcast %48 : vector<1x100xf32> to vector<32x100xf32>
    %51 = arith.mulf %49, %50 : vector<32x100xf32>
    %52 = arith.addf %47, %51 : vector<32x100xf32>
    %53 = vector.extract_strided_slice %33 {offsets = [1, 0], sizes = [1, 100], strides = [1, 1]} : vector<2x100xf32> to vector<1x100xf32>
    %54 = vector.broadcast %36 : vector<32x1xf32> to vector<32x100xf32>
    %55 = vector.broadcast %53 : vector<1x100xf32> to vector<32x100xf32>
    %56 = arith.mulf %54, %55 : vector<32x100xf32>
    %57 = vector.extract_strided_slice %30 {offsets = [1, 0], sizes = [1, 100], strides = [1, 1]} : vector<2x100xf32> to vector<1x100xf32>
    %58 = vector.broadcast %37 : vector<32x1xf32> to vector<32x100xf32>
    %59 = vector.broadcast %57 : vector<1x100xf32> to vector<32x100xf32>
    %60 = arith.mulf %58, %59 : vector<32x100xf32>
    %61 = arith.addf %56, %60 : vector<32x100xf32>
    %62 = vector.extract_strided_slice %35 {offsets = [1, 0], sizes = [1, 100], strides = [1, 1]} : vector<2x100xf32> to vector<1x100xf32>
    %63 = vector.broadcast %38 : vector<32x1xf32> to vector<32x100xf32>
    %64 = vector.broadcast %62 : vector<1x100xf32> to vector<32x100xf32>
    %65 = arith.mulf %63, %64 : vector<32x100xf32>
    %66 = arith.addf %61, %65 : vector<32x100xf32>
    %67 = tpu.concatenate %52, %66 in 1 : vector<32x100xf32>, vector<32x100xf32> -> vector<32x200xf32>
    %c0_22 = arith.constant 0 : index
    %c0_23 = arith.constant 0 : index
    %68 = vector.load %arg5[%c0_22, %c0_23] : memref<32x2xf32, #tpu.memory_space<vmem>>, vector<32x1xf32>
    %c0_24 = arith.constant 0 : index
    %c1_25 = arith.constant 1 : index
    %69 = vector.load %arg5[%c0_24, %c1_25] : memref<32x2xf32, #tpu.memory_space<vmem>>, vector<32x1xf32>
    %cst_26 = arith.constant dense<0.000000e+00> : vector<32xf32>
    %70 = vector.multi_reduction <add>, %67, %cst_26 [1] : vector<32x200xf32> to vector<32xf32>
    %71 = vector.shape_cast %70 : vector<32xf32> to vector<32x1xf32>
    %cst_27 = arith.constant 2.000000e+02 : f32
    %72 = vector.broadcast %cst_27 : f32 to vector<32x1xf32>
    %73 = arith.divf %71, %72 : vector<32x1xf32>
    %74 = arith.mulf %67, %67 : vector<32x200xf32>
    %cst_28 = arith.constant dense<0.000000e+00> : vector<32xf32>
    %75 = vector.multi_reduction <add>, %74, %cst_28 [1] : vector<32x200xf32> to vector<32xf32>
    %76 = vector.shape_cast %75 : vector<32xf32> to vector<32x1xf32>
    %cst_29 = arith.constant 2.000000e+02 : f32
    %77 = vector.broadcast %cst_29 : f32 to vector<32x1xf32>
    %78 = arith.divf %76, %77 : vector<32x1xf32>
    %cst_30 = arith.constant 1.000000e+00 : f32
    %79 = vector.broadcast %cst_30 : f32 to vector<32x1xf32>
    %80 = arith.mulf %73, %79 : vector<32x1xf32>
    %cst_31 = arith.constant 1.000000e+00 : f32
    %81 = vector.broadcast %cst_31 : f32 to vector<32x1xf32>
    %82 = arith.mulf %78, %81 : vector<32x1xf32>
    %83 = arith.mulf %80, %80 : vector<32x1xf32>
    %84 = arith.subf %82, %83 : vector<32x1xf32>
    %cst_32 = arith.constant 8.000000e-01 : f32
    %85 = vector.broadcast %cst_32 : f32 to vector<32x1xf32>
    %86 = arith.addf %84, %85 : vector<32x1xf32>
    %87 = math.rsqrt %86 : vector<32x1xf32>
    %88 = arith.mulf %68, %87 : vector<32x1xf32>
    %89 = arith.mulf %80, %88 : vector<32x1xf32>
    %90 = arith.subf %69, %89 : vector<32x1xf32>
    %91 = vector.broadcast %88 : vector<32x1xf32> to vector<32x200xf32>
    %92 = arith.mulf %67, %91 : vector<32x200xf32>
    %93 = vector.broadcast %90 : vector<32x1xf32> to vector<32x200xf32>
    %94 = arith.addf %92, %93 : vector<32x200xf32>
    %cst_33 = arith.constant 2.000000e-01 : f32
    %95 = vector.broadcast %cst_33 : f32 to vector<32x200xf32>
    %96 = arith.mulf %95, %94 : vector<32x200xf32>
    %97 = arith.maximumf %94, %96 : vector<32x200xf32>
    %cst_34 = arith.constant 0.000000e+00 : f32
    %98 = vector.broadcast %cst_34 : f32 to vector<32x1xf32>
    %99 = vector.extract_strided_slice %97 {offsets = [0, 0], sizes = [32, 199], strides = [1, 1]} : vector<32x200xf32> to vector<32x199xf32>
    %100 = tpu.concatenate %98, %99 in 1 : vector<32x1xf32>, vector<32x199xf32> -> vector<32x200xf32>
    %101 = vector.broadcast %0 : vector<1x200xf32> to vector<32x200xf32>
    %102 = arith.mulf %100, %101 : vector<32x200xf32>
    %103 = vector.extract_strided_slice %97 {offsets = [0, 1], sizes = [32, 199], strides = [1, 1]} : vector<32x200xf32> to vector<32x199xf32>
    %cst_35 = arith.constant 0.000000e+00 : f32
    %104 = vector.broadcast %cst_35 : f32 to vector<32x1xf32>
    %105 = tpu.concatenate %103, %104 in 1 : vector<32x199xf32>, vector<32x1xf32> -> vector<32x200xf32>
    %106 = vector.broadcast %1 : vector<1x200xf32> to vector<32x200xf32>
    %107 = arith.mulf %105, %106 : vector<32x200xf32>
    %108 = tpu.concatenate %102, %97, %107 in 0 : vector<32x200xf32>, vector<32x200xf32>, vector<32x200xf32> -> vector<96x200xf32>
    %c0_36 = arith.constant 0 : index
    %c0_37 = arith.constant 0 : index
    %109 = vector.load %arg6[%c0_36, %c0_37] : memref<64x96xf32, #tpu.memory_space<vmem>>, vector<64x96xf32>
    %cst_38 = arith.constant dense<0.000000e+00> : vector<64x200xf32>
    %110 = tpu.matmul %109, %108, %cst_38 {dimension_numbers = #tpu.dot_dimension_numbers<[1], [0], [0], [1], [0, 0, 1, 1], [], []>} : vector<64x96xf32>, vector<96x200xf32>, vector<64x200xf32> -> vector<64x200xf32>
    %c0_39 = arith.constant 0 : index
    %c0_40 = arith.constant 0 : index
    %111 = vector.load %arg7[%c0_39, %c0_40] : memref<32x2xf32, #tpu.memory_space<vmem>>, vector<32x1xf32>
    %c0_41 = arith.constant 0 : index
    %c1_42 = arith.constant 1 : index
    %112 = vector.load %arg7[%c0_41, %c1_42] : memref<32x2xf32, #tpu.memory_space<vmem>>, vector<32x1xf32>
    %cst_43 = arith.constant dense<0.000000e+00> : vector<64xf32>
    %113 = vector.multi_reduction <add>, %110, %cst_43 [1] : vector<64x200xf32> to vector<64xf32>
    %114 = vector.shape_cast %113 : vector<64xf32> to vector<64x1xf32>
    %cst_44 = arith.constant 2.000000e+02 : f32
    %115 = vector.broadcast %cst_44 : f32 to vector<64x1xf32>
    %116 = arith.divf %114, %115 : vector<64x1xf32>
    %117 = arith.mulf %110, %110 : vector<64x200xf32>
    %cst_45 = arith.constant dense<0.000000e+00> : vector<64xf32>
    %118 = vector.multi_reduction <add>, %117, %cst_45 [1] : vector<64x200xf32> to vector<64xf32>
    %119 = vector.shape_cast %118 : vector<64xf32> to vector<64x1xf32>
    %cst_46 = arith.constant 2.000000e+02 : f32
    %120 = vector.broadcast %cst_46 : f32 to vector<64x1xf32>
    %121 = arith.divf %119, %120 : vector<64x1xf32>
    %122 = vector.extract_strided_slice %116 {offsets = [0, 0], sizes = [32, 1], strides = [1, 1]} : vector<64x1xf32> to vector<32x1xf32>
    %123 = vector.extract_strided_slice %121 {offsets = [0, 0], sizes = [32, 1], strides = [1, 1]} : vector<64x1xf32> to vector<32x1xf32>
    %124 = vector.extract_strided_slice %116 {offsets = [32, 0], sizes = [32, 1], strides = [1, 1]} : vector<64x1xf32> to vector<32x1xf32>
    %125 = arith.addf %122, %124 : vector<32x1xf32>
    %126 = vector.extract_strided_slice %121 {offsets = [32, 0], sizes = [32, 1], strides = [1, 1]} : vector<64x1xf32> to vector<32x1xf32>
    %127 = arith.addf %123, %126 : vector<32x1xf32>
    %cst_47 = arith.constant 5.000000e-01 : f32
    %128 = vector.broadcast %cst_47 : f32 to vector<32x1xf32>
    %129 = arith.mulf %125, %128 : vector<32x1xf32>
    %cst_48 = arith.constant 5.000000e-01 : f32
    %130 = vector.broadcast %cst_48 : f32 to vector<32x1xf32>
    %131 = arith.mulf %127, %130 : vector<32x1xf32>
    %132 = arith.mulf %129, %129 : vector<32x1xf32>
    %133 = arith.subf %131, %132 : vector<32x1xf32>
    %cst_49 = arith.constant 8.000000e-01 : f32
    %134 = vector.broadcast %cst_49 : f32 to vector<32x1xf32>
    %135 = arith.addf %133, %134 : vector<32x1xf32>
    %136 = math.rsqrt %135 : vector<32x1xf32>
    %137 = arith.mulf %111, %136 : vector<32x1xf32>
    %138 = arith.mulf %129, %137 : vector<32x1xf32>
    %139 = arith.subf %112, %138 : vector<32x1xf32>
    %140 = tpu.concatenate %137, %137 in 0 : vector<32x1xf32>, vector<32x1xf32> -> vector<64x1xf32>
    %141 = tpu.concatenate %139, %139 in 0 : vector<32x1xf32>, vector<32x1xf32> -> vector<64x1xf32>
    %142 = vector.broadcast %140 : vector<64x1xf32> to vector<64x200xf32>
    %143 = arith.mulf %110, %142 : vector<64x200xf32>
    %144 = vector.broadcast %141 : vector<64x1xf32> to vector<64x200xf32>
    %145 = arith.addf %143, %144 : vector<64x200xf32>
    %cst_50 = arith.constant 2.000000e-01 : f32
    %146 = vector.broadcast %cst_50 : f32 to vector<64x200xf32>
    %147 = arith.mulf %146, %145 : vector<64x200xf32>
    %148 = arith.maximumf %145, %147 : vector<64x200xf32>
    %149 = vector.extract_strided_slice %148 {offsets = [0, 0], sizes = [32, 200], strides = [1, 1]} : vector<64x200xf32> to vector<32x200xf32>
    %150 = vector.extract_strided_slice %148 {offsets = [32, 0], sizes = [32, 200], strides = [1, 1]} : vector<64x200xf32> to vector<32x200xf32>
    %cst_51 = arith.constant 0.000000e+00 : f32
    %151 = vector.broadcast %cst_51 : f32 to vector<32x1xf32>
    %152 = vector.extract_strided_slice %150 {offsets = [0, 0], sizes = [32, 199], strides = [1, 1]} : vector<32x200xf32> to vector<32x199xf32>
    %153 = tpu.concatenate %151, %152 in 1 : vector<32x1xf32>, vector<32x199xf32> -> vector<32x200xf32>
    %154 = vector.broadcast %0 : vector<1x200xf32> to vector<32x200xf32>
    %155 = arith.mulf %153, %154 : vector<32x200xf32>
    %156 = vector.extract_strided_slice %149 {offsets = [0, 1], sizes = [32, 199], strides = [1, 1]} : vector<32x200xf32> to vector<32x199xf32>
    %cst_52 = arith.constant 0.000000e+00 : f32
    %157 = vector.broadcast %cst_52 : f32 to vector<32x1xf32>
    %158 = tpu.concatenate %156, %157 in 1 : vector<32x199xf32>, vector<32x1xf32> -> vector<32x200xf32>
    %159 = vector.broadcast %1 : vector<1x200xf32> to vector<32x200xf32>
    %160 = arith.mulf %158, %159 : vector<32x200xf32>
    %161 = tpu.concatenate %155, %149, %150, %160 in 0 : vector<32x200xf32>, vector<32x200xf32>, vector<32x200xf32>, vector<32x200xf32> -> vector<128x200xf32>
    %c0_53 = arith.constant 0 : index
    %c0_54 = arith.constant 0 : index
    %162 = vector.load %arg8[%c0_53, %c0_54] : memref<128x128xf32, #tpu.memory_space<vmem>>, vector<128x128xf32>
    %cst_55 = arith.constant dense<0.000000e+00> : vector<128x200xf32>
    %163 = tpu.matmul %162, %161, %cst_55 {dimension_numbers = #tpu.dot_dimension_numbers<[1], [0], [0], [1], [0, 0, 1, 1], [], []>} : vector<128x128xf32>, vector<128x200xf32>, vector<128x200xf32> -> vector<128x200xf32>
    %c0_56 = arith.constant 0 : index
    %c0_57 = arith.constant 0 : index
    %164 = vector.load %arg9[%c0_56, %c0_57] : memref<32x2xf32, #tpu.memory_space<vmem>>, vector<32x1xf32>
    %c0_58 = arith.constant 0 : index
    %c1_59 = arith.constant 1 : index
    %165 = vector.load %arg9[%c0_58, %c1_59] : memref<32x2xf32, #tpu.memory_space<vmem>>, vector<32x1xf32>
    %cst_60 = arith.constant dense<0.000000e+00> : vector<128xf32>
    %166 = vector.multi_reduction <add>, %163, %cst_60 [1] : vector<128x200xf32> to vector<128xf32>
    %167 = vector.shape_cast %166 : vector<128xf32> to vector<128x1xf32>
    %cst_61 = arith.constant 2.000000e+02 : f32
    %168 = vector.broadcast %cst_61 : f32 to vector<128x1xf32>
    %169 = arith.divf %167, %168 : vector<128x1xf32>
    %170 = arith.mulf %163, %163 : vector<128x200xf32>
    %cst_62 = arith.constant dense<0.000000e+00> : vector<128xf32>
    %171 = vector.multi_reduction <add>, %170, %cst_62 [1] : vector<128x200xf32> to vector<128xf32>
    %172 = vector.shape_cast %171 : vector<128xf32> to vector<128x1xf32>
    %cst_63 = arith.constant 2.000000e+02 : f32
    %173 = vector.broadcast %cst_63 : f32 to vector<128x1xf32>
    %174 = arith.divf %172, %173 : vector<128x1xf32>
    %175 = vector.extract_strided_slice %169 {offsets = [0, 0], sizes = [32, 1], strides = [1, 1]} : vector<128x1xf32> to vector<32x1xf32>
    %176 = vector.extract_strided_slice %174 {offsets = [0, 0], sizes = [32, 1], strides = [1, 1]} : vector<128x1xf32> to vector<32x1xf32>
    %177 = vector.extract_strided_slice %169 {offsets = [32, 0], sizes = [32, 1], strides = [1, 1]} : vector<128x1xf32> to vector<32x1xf32>
    %178 = arith.addf %175, %177 : vector<32x1xf32>
    %179 = vector.extract_strided_slice %174 {offsets = [32, 0], sizes = [32, 1], strides = [1, 1]} : vector<128x1xf32> to vector<32x1xf32>
    %180 = arith.addf %176, %179 : vector<32x1xf32>
    %181 = vector.extract_strided_slice %169 {offsets = [64, 0], sizes = [32, 1], strides = [1, 1]} : vector<128x1xf32> to vector<32x1xf32>
    %182 = arith.addf %178, %181 : vector<32x1xf32>
    %183 = vector.extract_strided_slice %174 {offsets = [64, 0], sizes = [32, 1], strides = [1, 1]} : vector<128x1xf32> to vector<32x1xf32>
    %184 = arith.addf %180, %183 : vector<32x1xf32>
    %185 = vector.extract_strided_slice %169 {offsets = [96, 0], sizes = [32, 1], strides = [1, 1]} : vector<128x1xf32> to vector<32x1xf32>
    %186 = arith.addf %182, %185 : vector<32x1xf32>
    %187 = vector.extract_strided_slice %174 {offsets = [96, 0], sizes = [32, 1], strides = [1, 1]} : vector<128x1xf32> to vector<32x1xf32>
    %188 = arith.addf %184, %187 : vector<32x1xf32>
    %cst_64 = arith.constant 2.500000e-01 : f32
    %189 = vector.broadcast %cst_64 : f32 to vector<32x1xf32>
    %190 = arith.mulf %186, %189 : vector<32x1xf32>
    %cst_65 = arith.constant 2.500000e-01 : f32
    %191 = vector.broadcast %cst_65 : f32 to vector<32x1xf32>
    %192 = arith.mulf %188, %191 : vector<32x1xf32>
    %193 = arith.mulf %190, %190 : vector<32x1xf32>
    %194 = arith.subf %192, %193 : vector<32x1xf32>
    %cst_66 = arith.constant 8.000000e-01 : f32
    %195 = vector.broadcast %cst_66 : f32 to vector<32x1xf32>
    %196 = arith.addf %194, %195 : vector<32x1xf32>
    %197 = math.rsqrt %196 : vector<32x1xf32>
    %198 = arith.mulf %164, %197 : vector<32x1xf32>
    %199 = arith.mulf %190, %198 : vector<32x1xf32>
    %200 = arith.subf %165, %199 : vector<32x1xf32>
    %201 = tpu.concatenate %198, %198, %198, %198 in 0 : vector<32x1xf32>, vector<32x1xf32>, vector<32x1xf32>, vector<32x1xf32> -> vector<128x1xf32>
    %202 = tpu.concatenate %200, %200, %200, %200 in 0 : vector<32x1xf32>, vector<32x1xf32>, vector<32x1xf32>, vector<32x1xf32> -> vector<128x1xf32>
    %203 = vector.broadcast %201 : vector<128x1xf32> to vector<128x200xf32>
    %204 = arith.mulf %163, %203 : vector<128x200xf32>
    %205 = vector.broadcast %202 : vector<128x1xf32> to vector<128x200xf32>
    %206 = arith.addf %204, %205 : vector<128x200xf32>
    %cst_67 = arith.constant 2.000000e-01 : f32
    %207 = vector.broadcast %cst_67 : f32 to vector<128x200xf32>
    %208 = arith.mulf %207, %206 : vector<128x200xf32>
    %209 = arith.maximumf %206, %208 : vector<128x200xf32>
    %210 = vector.extract_strided_slice %209 {offsets = [0, 0], sizes = [32, 200], strides = [1, 1]} : vector<128x200xf32> to vector<32x200xf32>
    %211 = vector.extract_strided_slice %209 {offsets = [32, 0], sizes = [32, 200], strides = [1, 1]} : vector<128x200xf32> to vector<32x200xf32>
    %212 = vector.extract_strided_slice %209 {offsets = [64, 0], sizes = [32, 200], strides = [1, 1]} : vector<128x200xf32> to vector<32x200xf32>
    %213 = vector.extract_strided_slice %209 {offsets = [96, 0], sizes = [32, 200], strides = [1, 1]} : vector<128x200xf32> to vector<32x200xf32>
    %cst_68 = arith.constant 0.000000e+00 : f32
    %214 = vector.broadcast %cst_68 : f32 to vector<32x1xf32>
    %215 = vector.extract_strided_slice %213 {offsets = [0, 0], sizes = [32, 199], strides = [1, 1]} : vector<32x200xf32> to vector<32x199xf32>
    %216 = tpu.concatenate %214, %215 in 1 : vector<32x1xf32>, vector<32x199xf32> -> vector<32x200xf32>
    %217 = vector.broadcast %0 : vector<1x200xf32> to vector<32x200xf32>
    %218 = arith.mulf %216, %217 : vector<32x200xf32>
    %219 = vector.extract_strided_slice %210 {offsets = [0, 1], sizes = [32, 199], strides = [1, 1]} : vector<32x200xf32> to vector<32x199xf32>
    %cst_69 = arith.constant 0.000000e+00 : f32
    %220 = vector.broadcast %cst_69 : f32 to vector<32x1xf32>
    %221 = tpu.concatenate %219, %220 in 1 : vector<32x199xf32>, vector<32x1xf32> -> vector<32x200xf32>
    %222 = vector.broadcast %1 : vector<1x200xf32> to vector<32x200xf32>
    %223 = arith.mulf %221, %222 : vector<32x200xf32>
    %224 = tpu.concatenate %218, %210, %211, %212, %213, %223 in 0 : vector<32x200xf32>, vector<32x200xf32>, vector<32x200xf32>, vector<32x200xf32>, vector<32x200xf32>, vector<32x200xf32> -> vector<192x200xf32>
    %c0_70 = arith.constant 0 : index
    %c0_71 = arith.constant 0 : index
    %225 = vector.load %arg10[%c0_70, %c0_71] : memref<8x192xf32, #tpu.memory_space<vmem>>, vector<8x192xf32>
    %cst_72 = arith.constant dense<0.000000e+00> : vector<8x200xf32>
    %226 = tpu.matmul %225, %224, %cst_72 {dimension_numbers = #tpu.dot_dimension_numbers<[1], [0], [0], [1], [0, 0, 1, 1], [], []>} : vector<8x192xf32>, vector<192x200xf32>, vector<8x200xf32> -> vector<8x200xf32>
    %c0_73 = arith.constant 0 : index
    %c0_74 = arith.constant 0 : index
    %227 = vector.load %arg11[%c0_73, %c0_74] : memref<1x2xf32, #tpu.memory_space<vmem>>, vector<1x1xf32>
    %c0_75 = arith.constant 0 : index
    %c1_76 = arith.constant 1 : index
    %228 = vector.load %arg11[%c0_75, %c1_76] : memref<1x2xf32, #tpu.memory_space<vmem>>, vector<1x1xf32>
    %cst_77 = arith.constant dense<0.000000e+00> : vector<8xf32>
    %229 = vector.multi_reduction <add>, %226, %cst_77 [1] : vector<8x200xf32> to vector<8xf32>
    %230 = vector.shape_cast %229 : vector<8xf32> to vector<8x1xf32>
    %cst_78 = arith.constant 2.000000e+02 : f32
    %231 = vector.broadcast %cst_78 : f32 to vector<8x1xf32>
    %232 = arith.divf %230, %231 : vector<8x1xf32>
    %233 = arith.mulf %226, %226 : vector<8x200xf32>
    %cst_79 = arith.constant dense<0.000000e+00> : vector<8xf32>
    %234 = vector.multi_reduction <add>, %233, %cst_79 [1] : vector<8x200xf32> to vector<8xf32>
    %235 = vector.shape_cast %234 : vector<8xf32> to vector<8x1xf32>
    %cst_80 = arith.constant 2.000000e+02 : f32
    %236 = vector.broadcast %cst_80 : f32 to vector<8x1xf32>
    %237 = arith.divf %235, %236 : vector<8x1xf32>
    %238 = vector.extract_strided_slice %232 {offsets = [0, 0], sizes = [1, 1], strides = [1, 1]} : vector<8x1xf32> to vector<1x1xf32>
    %239 = vector.extract_strided_slice %237 {offsets = [0, 0], sizes = [1, 1], strides = [1, 1]} : vector<8x1xf32> to vector<1x1xf32>
    %240 = vector.extract_strided_slice %232 {offsets = [1, 0], sizes = [1, 1], strides = [1, 1]} : vector<8x1xf32> to vector<1x1xf32>
    %241 = arith.addf %238, %240 : vector<1x1xf32>
    %242 = vector.extract_strided_slice %237 {offsets = [1, 0], sizes = [1, 1], strides = [1, 1]} : vector<8x1xf32> to vector<1x1xf32>
    %243 = arith.addf %239, %242 : vector<1x1xf32>
    %244 = vector.extract_strided_slice %232 {offsets = [2, 0], sizes = [1, 1], strides = [1, 1]} : vector<8x1xf32> to vector<1x1xf32>
    %245 = arith.addf %241, %244 : vector<1x1xf32>
    %246 = vector.extract_strided_slice %237 {offsets = [2, 0], sizes = [1, 1], strides = [1, 1]} : vector<8x1xf32> to vector<1x1xf32>
    %247 = arith.addf %243, %246 : vector<1x1xf32>
    %248 = vector.extract_strided_slice %232 {offsets = [3, 0], sizes = [1, 1], strides = [1, 1]} : vector<8x1xf32> to vector<1x1xf32>
    %249 = arith.addf %245, %248 : vector<1x1xf32>
    %250 = vector.extract_strided_slice %237 {offsets = [3, 0], sizes = [1, 1], strides = [1, 1]} : vector<8x1xf32> to vector<1x1xf32>
    %251 = arith.addf %247, %250 : vector<1x1xf32>
    %252 = vector.extract_strided_slice %232 {offsets = [4, 0], sizes = [1, 1], strides = [1, 1]} : vector<8x1xf32> to vector<1x1xf32>
    %253 = arith.addf %249, %252 : vector<1x1xf32>
    %254 = vector.extract_strided_slice %237 {offsets = [4, 0], sizes = [1, 1], strides = [1, 1]} : vector<8x1xf32> to vector<1x1xf32>
    %255 = arith.addf %251, %254 : vector<1x1xf32>
    %256 = vector.extract_strided_slice %232 {offsets = [5, 0], sizes = [1, 1], strides = [1, 1]} : vector<8x1xf32> to vector<1x1xf32>
    %257 = arith.addf %253, %256 : vector<1x1xf32>
    %258 = vector.extract_strided_slice %237 {offsets = [5, 0], sizes = [1, 1], strides = [1, 1]} : vector<8x1xf32> to vector<1x1xf32>
    %259 = arith.addf %255, %258 : vector<1x1xf32>
    %260 = vector.extract_strided_slice %232 {offsets = [6, 0], sizes = [1, 1], strides = [1, 1]} : vector<8x1xf32> to vector<1x1xf32>
    %261 = arith.addf %257, %260 : vector<1x1xf32>
    %262 = vector.extract_strided_slice %237 {offsets = [6, 0], sizes = [1, 1], strides = [1, 1]} : vector<8x1xf32> to vector<1x1xf32>
    %263 = arith.addf %259, %262 : vector<1x1xf32>
    %264 = vector.extract_strided_slice %232 {offsets = [7, 0], sizes = [1, 1], strides = [1, 1]} : vector<8x1xf32> to vector<1x1xf32>
    %265 = arith.addf %261, %264 : vector<1x1xf32>
    %266 = vector.extract_strided_slice %237 {offsets = [7, 0], sizes = [1, 1], strides = [1, 1]} : vector<8x1xf32> to vector<1x1xf32>
    %267 = arith.addf %263, %266 : vector<1x1xf32>
    %cst_81 = arith.constant 1.250000e-01 : f32
    %268 = vector.broadcast %cst_81 : f32 to vector<1x1xf32>
    %269 = arith.mulf %265, %268 : vector<1x1xf32>
    %cst_82 = arith.constant 1.250000e-01 : f32
    %270 = vector.broadcast %cst_82 : f32 to vector<1x1xf32>
    %271 = arith.mulf %267, %270 : vector<1x1xf32>
    %272 = arith.mulf %269, %269 : vector<1x1xf32>
    %273 = arith.subf %271, %272 : vector<1x1xf32>
    %cst_83 = arith.constant 8.000000e-01 : f32
    %274 = vector.broadcast %cst_83 : f32 to vector<1x1xf32>
    %275 = arith.addf %273, %274 : vector<1x1xf32>
    %276 = math.rsqrt %275 : vector<1x1xf32>
    %277 = arith.mulf %227, %276 : vector<1x1xf32>
    %278 = arith.mulf %269, %277 : vector<1x1xf32>
    %279 = arith.subf %228, %278 : vector<1x1xf32>
    %280 = tpu.concatenate %277, %277, %277, %277, %277, %277, %277, %277 in 0 : vector<1x1xf32>, vector<1x1xf32>, vector<1x1xf32>, vector<1x1xf32>, vector<1x1xf32>, vector<1x1xf32>, vector<1x1xf32>, vector<1x1xf32> -> vector<8x1xf32>
    %281 = tpu.concatenate %279, %279, %279, %279, %279, %279, %279, %279 in 0 : vector<1x1xf32>, vector<1x1xf32>, vector<1x1xf32>, vector<1x1xf32>, vector<1x1xf32>, vector<1x1xf32>, vector<1x1xf32>, vector<1x1xf32> -> vector<8x1xf32>
    %282 = vector.broadcast %280 : vector<8x1xf32> to vector<8x200xf32>
    %283 = arith.mulf %226, %282 : vector<8x200xf32>
    %284 = vector.broadcast %281 : vector<8x1xf32> to vector<8x200xf32>
    %285 = arith.addf %283, %284 : vector<8x200xf32>
    %cst_84 = arith.constant 2.000000e-01 : f32
    %286 = vector.broadcast %cst_84 : f32 to vector<8x200xf32>
    %287 = arith.mulf %286, %285 : vector<8x200xf32>
    %288 = arith.maximumf %285, %287 : vector<8x200xf32>
    %289 = vector.extract_strided_slice %288 {offsets = [0, 0], sizes = [1, 100], strides = [1, 1]} : vector<8x200xf32> to vector<1x100xf32>
    %290 = vector.extract_strided_slice %288 {offsets = [1, 0], sizes = [1, 100], strides = [1, 1]} : vector<8x200xf32> to vector<1x100xf32>
    %291 = vector.extract_strided_slice %288 {offsets = [2, 0], sizes = [1, 100], strides = [1, 1]} : vector<8x200xf32> to vector<1x100xf32>
    %292 = vector.extract_strided_slice %288 {offsets = [3, 0], sizes = [1, 100], strides = [1, 1]} : vector<8x200xf32> to vector<1x100xf32>
    %293 = vector.extract_strided_slice %288 {offsets = [4, 0], sizes = [1, 100], strides = [1, 1]} : vector<8x200xf32> to vector<1x100xf32>
    %294 = vector.extract_strided_slice %288 {offsets = [5, 0], sizes = [1, 100], strides = [1, 1]} : vector<8x200xf32> to vector<1x100xf32>
    %295 = vector.extract_strided_slice %288 {offsets = [6, 0], sizes = [1, 100], strides = [1, 1]} : vector<8x200xf32> to vector<1x100xf32>
    %296 = vector.extract_strided_slice %288 {offsets = [7, 0], sizes = [1, 100], strides = [1, 1]} : vector<8x200xf32> to vector<1x100xf32>
    %297 = tpu.concatenate %289, %290, %291, %292, %293, %294, %295, %296 in 1 : vector<1x100xf32>, vector<1x100xf32>, vector<1x100xf32>, vector<1x100xf32>, vector<1x100xf32>, vector<1x100xf32>, vector<1x100xf32>, vector<1x100xf32> -> vector<1x800xf32>
    %298 = vector.extract_strided_slice %288 {offsets = [0, 100], sizes = [1, 100], strides = [1, 1]} : vector<8x200xf32> to vector<1x100xf32>
    %299 = vector.extract_strided_slice %288 {offsets = [1, 100], sizes = [1, 100], strides = [1, 1]} : vector<8x200xf32> to vector<1x100xf32>
    %300 = vector.extract_strided_slice %288 {offsets = [2, 100], sizes = [1, 100], strides = [1, 1]} : vector<8x200xf32> to vector<1x100xf32>
    %301 = vector.extract_strided_slice %288 {offsets = [3, 100], sizes = [1, 100], strides = [1, 1]} : vector<8x200xf32> to vector<1x100xf32>
    %302 = vector.extract_strided_slice %288 {offsets = [4, 100], sizes = [1, 100], strides = [1, 1]} : vector<8x200xf32> to vector<1x100xf32>
    %303 = vector.extract_strided_slice %288 {offsets = [5, 100], sizes = [1, 100], strides = [1, 1]} : vector<8x200xf32> to vector<1x100xf32>
    %304 = vector.extract_strided_slice %288 {offsets = [6, 100], sizes = [1, 100], strides = [1, 1]} : vector<8x200xf32> to vector<1x100xf32>
    %305 = vector.extract_strided_slice %288 {offsets = [7, 100], sizes = [1, 100], strides = [1, 1]} : vector<8x200xf32> to vector<1x100xf32>
    %306 = tpu.concatenate %298, %299, %300, %301, %302, %303, %304, %305 in 1 : vector<1x100xf32>, vector<1x100xf32>, vector<1x100xf32>, vector<1x100xf32>, vector<1x100xf32>, vector<1x100xf32>, vector<1x100xf32>, vector<1x100xf32> -> vector<1x800xf32>
    %307 = tpu.concatenate %297, %306 in 0 : vector<1x800xf32>, vector<1x800xf32> -> vector<2x800xf32>
    %c0_85 = arith.constant 0 : index
    %c0_86 = arith.constant 0 : index
    %308 = vector.load %arg12[%c0_85, %c0_86] : memref<800x100xf32, #tpu.memory_space<vmem>>, vector<800x100xf32>
    %cst_87 = arith.constant dense<0.000000e+00> : vector<2x100xf32>
    %309 = tpu.matmul %307, %308, %cst_87 {dimension_numbers = #tpu.dot_dimension_numbers<[1], [0], [0], [1], [0, 0, 1, 1], [], []>} : vector<2x800xf32>, vector<800x100xf32>, vector<2x100xf32> -> vector<2x100xf32>
    %c0_88 = arith.constant 0 : index
    %c0_89 = arith.constant 0 : index
    %310 = vector.load %arg13[%c0_88, %c0_89] : memref<2x100xf32, #tpu.memory_space<vmem>>, vector<1x100xf32>
    %c1_90 = arith.constant 1 : index
    %c0_91 = arith.constant 0 : index
    %311 = vector.load %arg13[%c1_90, %c0_91] : memref<2x100xf32, #tpu.memory_space<vmem>>, vector<1x100xf32>
    %cst_92 = arith.constant dense<0.000000e+00> : vector<100xf32>
    %312 = vector.multi_reduction <add>, %309, %cst_92 [0] : vector<2x100xf32> to vector<100xf32>
    %313 = vector.shape_cast %312 : vector<100xf32> to vector<1x100xf32>
    %cst_93 = arith.constant 2.000000e+00 : f32
    %314 = vector.broadcast %cst_93 : f32 to vector<1x100xf32>
    %315 = arith.divf %313, %314 : vector<1x100xf32>
    %316 = arith.mulf %309, %309 : vector<2x100xf32>
    %cst_94 = arith.constant dense<0.000000e+00> : vector<100xf32>
    %317 = vector.multi_reduction <add>, %316, %cst_94 [0] : vector<2x100xf32> to vector<100xf32>
    %318 = vector.shape_cast %317 : vector<100xf32> to vector<1x100xf32>
    %cst_95 = arith.constant 2.000000e+00 : f32
    %319 = vector.broadcast %cst_95 : f32 to vector<1x100xf32>
    %320 = arith.divf %318, %319 : vector<1x100xf32>
    %321 = arith.mulf %315, %315 : vector<1x100xf32>
    %322 = arith.subf %320, %321 : vector<1x100xf32>
    %cst_96 = arith.constant 8.000000e-01 : f32
    %323 = vector.broadcast %cst_96 : f32 to vector<1x100xf32>
    %324 = arith.addf %322, %323 : vector<1x100xf32>
    %325 = math.rsqrt %324 : vector<1x100xf32>
    %326 = arith.mulf %310, %325 : vector<1x100xf32>
    %327 = vector.broadcast %326 : vector<1x100xf32> to vector<2x100xf32>
    %328 = arith.mulf %309, %327 : vector<2x100xf32>
    %329 = arith.mulf %315, %326 : vector<1x100xf32>
    %330 = arith.subf %311, %329 : vector<1x100xf32>
    %331 = vector.broadcast %330 : vector<1x100xf32> to vector<2x100xf32>
    %332 = arith.addf %328, %331 : vector<2x100xf32>
    %cst_97 = arith.constant 2.000000e-01 : f32
    %333 = vector.broadcast %cst_97 : f32 to vector<2x100xf32>
    %334 = arith.mulf %333, %332 : vector<2x100xf32>
    %335 = arith.maximumf %332, %334 : vector<2x100xf32>
    %c0_98 = arith.constant 0 : index
    %c0_99 = arith.constant 0 : index
    %336 = vector.load %arg15[%c0_98, %c0_99] : memref<2x100xf32, #tpu.memory_space<vmem>>, vector<2x100xf32>
    tpu.vector_store %arg15[%c0_98, %c0_99], %335 {strides = array<i32>} : memref<2x100xf32, #tpu.memory_space<vmem>>, vector<2x100xf32>,
    return
  }
  func.func @transform_0(%arg0: i32) -> (i32, i32) {
    %c0_i32 = arith.constant 0 : i32
    %c0_i32_0 = arith.constant 0 : i32
    %c0_i32_1 = arith.constant 0 : i32
    return %c0_i32, %c0_i32_0 : i32, i32
  }
  func.func @transform_1(%arg0: i32) -> (i32, i32) {
    %c0_i32 = arith.constant 0 : i32
    %c0_i32_0 = arith.constant 0 : i32
    %c0_i32_1 = arith.constant 0 : i32
    return %c0_i32, %c0_i32_0 : i32, i32
  }
  func.func @transform_2(%arg0: i32) -> (i32, i32) {
    %c0_i32 = arith.constant 0 : i32
    %c0_i32_0 = arith.constant 0 : i32
    %c0_i32_1 = arith.constant 0 : i32
    return %c0_i32, %c0_i32_0 : i32, i32
  }
  func.func @transform_3(%arg0: i32) -> (i32, i32) {
    %c0_i32 = arith.constant 0 : i32
    %c0_i32_0 = arith.constant 0 : i32
    %c0_i32_1 = arith.constant 0 : i32
    return %c0_i32, %c0_i32_0 : i32, i32
  }
  func.func @transform_4(%arg0: i32) -> (i32, i32) {
    %c0_i32 = arith.constant 0 : i32
    %c0_i32_0 = arith.constant 0 : i32
    %c0_i32_1 = arith.constant 0 : i32
    return %c0_i32, %c0_i32_0 : i32, i32
  }
  func.func @transform_5(%arg0: i32) -> (i32, i32) {
    %c0_i32 = arith.constant 0 : i32
    %c0_i32_0 = arith.constant 0 : i32
    %c0_i32_1 = arith.constant 0 : i32
    return %c0_i32, %c0_i32_0 : i32, i32
  }
  func.func @transform_6(%arg0: i32) -> (i32, i32) {
    %c0_i32 = arith.constant 0 : i32
    %c0_i32_0 = arith.constant 0 : i32
    %c0_i32_1 = arith.constant 0 : i32
    return %c0_i32, %c0_i32_0 : i32, i32
  }
  func.func @transform_7(%arg0: i32) -> (i32, i32) {
    %c0_i32 = arith.constant 0 : i32
    %c0_i32_0 = arith.constant 0 : i32
    %c0_i32_1 = arith.constant 0 : i32
    return %c0_i32, %c0_i32_0 : i32, i32
  }
  func.func @transform_8(%arg0: i32) -> (i32, i32) {
    %c0_i32 = arith.constant 0 : i32
    %c0_i32_0 = arith.constant 0 : i32
    %c0_i32_1 = arith.constant 0 : i32
    return %c0_i32, %c0_i32_0 : i32, i32
  }
  func.func @transform_9(%arg0: i32) -> (i32, i32) {
    %c0_i32 = arith.constant 0 : i32
    %c0_i32_0 = arith.constant 0 : i32
    %c0_i32_1 = arith.constant 0 : i32
    return %c0_i32, %c0_i32_0 : i32, i32
  }
  func.func @transform_10(%arg0: i32) -> (i32, i32) {
    %c0_i32 = arith.constant 0 : i32
    %c0_i32_0 = arith.constant 0 : i32
    %c0_i32_1 = arith.constant 0 : i32
    return %c0_i32, %c0_i32_0 : i32, i32
  }
  func.func @transform_11(%arg0: i32) -> (i32, i32) {
    %c0_i32 = arith.constant 0 : i32
    %c0_i32_0 = arith.constant 0 : i32
    %c0_i32_1 = arith.constant 0 : i32
    return %c0_i32, %c0_i32_0 : i32, i32
  }
  func.func @transform_12(%arg0: i32) -> (i32, i32) {
    %c0_i32 = arith.constant 0 : i32
    %c0_i32_0 = arith.constant 0 : i32
    %c0_i32_1 = arith.constant 0 : i32
    return %c0_i32, %c0_i32_0 : i32, i32
  }
  func.func @transform_13(%arg0: i32) -> (i32, i32) {
    %c0_i32 = arith.constant 0 : i32
    %c0_i32_0 = arith.constant 0 : i32
    %c0_i32_1 = arith.constant 0 : i32
    return %c0_i32, %c0_i32_0 : i32, i32
  }
  func.func @transform_14(%arg0: i32) -> (i32, i32) {
    %c0_i32 = arith.constant 0 : i32
    %c0_i32_0 = arith.constant 0 : i32
    %c0_i32_1 = arith.constant 0 : i32
    return %c0_i32, %c0_i32_0 : i32, i32
  }
}

</mosaic_0001>

<bundles_post_ra>
// kernel: generator_forward.1
= control target key start
LH: loop header
LB: loop body
LE: loop exit
PB: predicated region body
PF: predicated region fallthrough
CT: control target
= control target key end

     0   :  { %vm63_vm0 = vcmask 1041408   ;;  %v4450_v1 = vmov 0.0   ;;  %vm2897_vm1 = vmmov 0   ;;  %v4452_v5 = vmov 0   ;;  %s4435_s0 = inlined_call_operand.vmem [shape: f32[2,50], index: 0, kind: input, shape index: {}]   ;;  %s4436_s1 = inlined_call_operand.vmem [shape: f32[50,100], index: 1, kind: input, shape index: {}]   ;;  %s4437_s2 = inlined_call_operand.vmem [shape: f32[2,100], index: 2, kind: input, shape index: {}]   ;;  %s4438_s3 = inlined_call_operand.vmem [shape: f32[32,3], index: 3, kind: input, shape index: {}]   ;;  %s4439_s4 = inlined_call_operand.vmem [shape: f32[32,2], index: 4, kind: input, shape index: {}]   ;;  %s4440_s5 = inlined_call_operand.vmem [shape: f32[64,96], index: 5, kind: input, shape index: {}]   ;;  %s4441_s6 = inlined_call_operand.vmem [shape: f32[32,2], index: 6, kind: input, shape index: {}]   ;;  %s4442_s7 = inlined_call_operand.vmem [shape: f32[128,128], index: 7, kind: input, shape index: {}]   ;;  %s4443_s8 = inlined_call_operand.vmem [shape: f32[32,2], index: 8, kind: input, shape index: {}]   ;;  %s4444_s9 = inlined_call_operand.vmem [shape: f32[8,192], index: 9, kind: input, shape index: {}]   ;;  %s4445_s10 = inlined_call_operand.vmem [shape: f32[1,2], index: 10, kind: input, shape index: {}]   ;;  %s4446_s11 = inlined_call_operand.vmem [shape: f32[800,100], index: 11, kind: input, shape index: {}]   ;;  %s4447_s12 = inlined_call_operand.vmem [shape: f32[2,100], index: 12, kind: input, shape index: {}]   ;;  %s4448_s13 = inlined_call_operand.vmem [shape: f32[2,200], index: 13, kind: input, shape index: {}]   ;;  %s4449_s14 = inlined_call_operand.hbm [shape: f32[2,100], index: 14, kind: output, shape index: {}]  }
   0x1   :  { %v58_v0 = vld [vmem:[%s4436_s1 + $0x30] sm:$0x3]  ;;  %2741 = vmatprep.subr.mxu0 %v4450_v1  ;;  %v57_v2 = vld [vmem:[%s4436_s1 + $0x28] sm:$0xff]  ;;  %708 = vmatprep.mubr.f32.mxu1 %v4450_v1  ;;  %v191_v3 = vld [vmem:[%s4438_s3 + $0x18] sm:$0xff] }
   0x2   :  { %2742 = vmatpush3.msk.msra.mxu0 %vm63_vm0, %v58_v0  ;;  %2755 = vmatprep.mubr.msk.f32.mxu0 %vm2897_vm1, %v4450_v1  ;;  %v56_v4 = vld [vmem:[%s4436_s1 + $0x20] sm:$0xff]  ;;  %v190_v6 = vld [vmem:[%s4438_s3 + $0x10] sm:$0xff] }
   0x3   :  { %2743 = vmatprep.subr.mxu0 %v4450_v1  ;;  %2786 = vset.pattern.permute.xlu0 %v4452_v5 }
   0x4   :  { %2744 = vmatpush3.msra.mxu0 %v57_v2  ;;  %209 = vperm.xlu0 %2786, %v191_v3  }
   0x5   :  { %19 = vsyncpa [#allocation3], 0  ;;  %2745 = vmatprep.subr.mxu0 %v4450_v1  ;;  %v55_v7 = vld [vmem:[%s4436_s1 + $0x18] sm:$0xff]  ;;  %2787 = vset.pattern.permute.xlu1 %v4452_v5  ;;  %v54_v8 = vld [vmem:[%s4436_s1 + $0x10] sm:$0xff]  ;;  %v2899_v9 = vmov 2   ;;  %v4453_v11 = vmov 1   ;;  %v163_v38 = vlaneseq }
   0x6   :  { %2746 = vmatpush3.msra.mxu0 %v56_v4  ;;  %204 = vperm.xlu1 %2787, %v190_v6   ;;  %v53_v10 = vld [vmem:[%s4436_s1 + $0x8] sm:$0xff]  ;;  %v52_v12 = vld [vmem:[%s4436_s1] sm:$0xff]  ;;  %vm59_vm2 = vcmask 408576   ;;  %vm139_vm3 = vcmask 812032   ;;  %s2901_s22 = smov 1   ;;  %s2902_s23 = smov 127  }
   0x7   :  { %2747 = vmatprep.subr.mxu0 %v4450_v1  ;;  %v51_v13 = vld [vmem:[%s4435_s0] sm:$0x3]  ;;  %v189_v14 = vld [vmem:[%s4438_s3 + $0x8] sm:$0xff]  ;;  %v3045_v39 = vshrl.u32 %v163_v38, 7  ;;  %vm181_vm4 = vcmask 7168   ;;  %vm186_vm5 = vcmask 809984  }
   0x8   :  { %2748 = vmatpush3.msra.mxu0 %v55_v7  ;;  %2789 = vset.pattern.permute.xlu0 %v2899_v9  ;;  %v188_v15 = vld [vmem:[%s4438_s3] sm:$0xff]  ;;  %vm324_vm6 = vcmask 818176   ;;  %vm333_vm7 = vcmask 588800   ;;  %vm587_vm8 = vcmask 580608   ;;  %vm574_vm9 = vcmask 1039360   ;;  %s2906_s21 = smov 72  }
   0x9   :  { %2749 = vmatprep.subr.mxu0 %v4450_v1  ;;  %261 = vperm.xlu0 %2789, %v191_v3   ;;  %4478 = vst [vmem:[#allocation5_spill] sm:$0xff] %v3045_v39  ;;  %v137_v40 = vld [vmem:[%s4437_s2] sm:$0x1]  ;;  %v3051_v41 = vsub.s32 0, %v3045_v39  ;;  %v138_v44 = vld [vmem:[%s4437_s2 + $0x1] sm:$0x1] }
   0xa   :  { %2750 = vmatpush3.msra.mxu0 %v54_v8  ;;  %2788 = vset.pattern.permute.xlu1 %v4453_v11  ;;  %v3062_v62 = vsub.s32 1, %v3045_v39  ;;  %s2903_s2 = smov 100   ;;  %vm619_vm10 = vcmask 785408   ;;  %vm1832_vm11 = vcmask 523264   ;;  %vm1997_vm12 = vcmask 1040384   ;;  %s2907_s16 = smov 44  }
   0xb   :  { %2751 = vmatprep.subr.mxu0 %v4450_v1  ;;  %229 = vperm.xlu1 %2788, %v190_v6   ;;  %4479 = vst [vmem:[#allocation6_spill] sm:$0xff] %v3051_v41  ;;  %vm2000_vm13 = vcmask 1042432   ;;  %vm2002_vm14 = vcmask 1043456   ;;  %vm2004_vm15 = vcmask 1044480   ;;  %s2908_s0 = smov 16   ;;  %s2910_s3 = smov 116  }
   0xc   :  { %2752 = vmatpush3.msra.mxu0 %v53_v10 }
   0xd   :  { %2753 = vmatprep.subr.mxu0 %v4450_v1  ;;  %2790 = vset.pattern.permute.xlu0 %v4453_v11 }
   0xe   :  { %2754 = vmatpush3.msra.mxu0 %v52_v12  ;;  %233 = vperm.xlu0 %2790, %v191_v3  }
   0xf   :  { %2756 = vmatmul.mubr.msk.f32.vlgmr.msra.gmra.mxu0 %vm59_vm2, %v51_v13  ;;  %2791 = vset.pattern.permute.xlu1 %v4452_v5  ;;  %vm2006_vm2 = vcmask 1045504  }
  0x10   :  { %199 = vperm.xlu1 %2791, %v189_v14   ;;  %1197 = vmatprep.mubr.f32.mxu0 %v4450_v1 }
  0x12   :  { %225 = vperm.xlu0 %2790, %v189_v14  }
  0x14   :  { %2792 = vset.pattern.permute.xlu1 %v2899_v9 }
  0x15   :  { %257 = vperm.xlu1 %2792, %v190_v6  }
  0x16   :  { %221 = vperm.xlu0 %2790, %v188_v15  }
  0x19   :  { %2793 = vset.pattern.permute.xlu1 %v4452_v5 }
  0x1a   :  { %194 = vperm.xlu1 %2793, %v188_v15   ;;  %2795 = vset.pattern.permute.xlu0 %v2899_v9 }
  0x1b   :  { %249 = vperm.xlu0 %2795, %v188_v15  }
  0x1e   :  { %2794 = vset.pattern.permute.xlu1 %v2899_v9 }
  0x1f   :  { %2796 = vset.pattern.permute.xlu0 %v4452_v5 }
  0x7f   :  { %v210_v54 = vpop.permute.xlu0 %209 }
  0x81   :  { %v205_v53 = vpop.permute.xlu1 %204 }
  0x84   :  { %v262_v57 = vpop.permute.xlu0 %261 }
  0x86   :  { %v230_v55 = vpop.permute.xlu1 %229 }
  0x89   :  { %v234_v59 = vpop.permute.xlu0 %233 }
  0x8b   :  { %v200_v56 = vpop.permute.xlu1 %199 }
  0x8d   :  { %v226_v61 = vpop.permute.xlu0 %225 }
  0x90   :  { %v258_v58 = vpop.permute.xlu1 %257 }
  0x91   :  { %v222_v2 = vpop.permute.xlu0 %221 }
  0x95   :  { %v195_v60 = vpop.permute.xlu1 %194 }
  0xcf   :  { %v133_v16 = vpop.f32.mrf.mxu0 }
  0xd0   :  { %v140_v17 = vsel %vm139_vm3, %v133_v16, 0.0  ;;  %v149_v18 = vmul.f32 %v133_v16, %v133_v16 }
  0xd1   :  { %v141_v19 = vrot.slane %v140_v17, 4  ;;  %v2757_v20 = vpop.f32.mrf.mxu0 }
  0xd2   :  { %v150_v21 = vsel %vm139_vm3, %v149_v18, 0.0 }
  0xd3   :  { %v142_v22 = vadd.f32 %v141_v19, %v140_v17  ;;  %v151_v23 = vrot.slane %v150_v21, 4  ;;  %v250_v17 = vpop.permute.xlu0 %249 }
  0xd5   :  { %v143_v24 = vrot.slane %v142_v22, 2  ;;  %v152_v25 = vadd.f32 %v151_v23, %v150_v21 }
  0xd7   :  { %v144_v26 = vadd.f32 %v143_v24, %v142_v22  ;;  %v153_v27 = vrot.slane %v152_v25, 2 }
  0xd9   :  { %v145_v28 = vrot.slane %v144_v26, 1  ;;  %v154_v29 = vadd.f32 %v153_v27, %v152_v25 }
  0xdb   :  { %v146_v30 = vadd.f32 %v145_v28, %v144_v26  ;;  %v155_v31 = vrot.slane %v154_v29, 1 }
  0xdd   :  { %v148_v32 = vmul.f32 0.5, %v146_v30  ;;  %v156_v33 = vadd.f32 %v155_v31, %v154_v29 }
  0xdf   :  { %v157_v34 = vmul.f32 0.5, %v156_v33  ;;  %v158_v35 = vmul.f32 %v148_v32, %v148_v32 }
  0xe1   :  { %v159_v36 = vsub.f32 %v157_v34, %v158_v35 }
  0xe3   :  { %v160_v37 = vadd.f32 0.8, %v159_v36 }
  0xe5   :  { %2844 = vrsqrt.f32 %v160_v37 }
  0xf2   :  { %v2845_v42 = vpop.eup %2844 }
  0xf3   :  { %v162_v43 = vmul.f32 %v2845_v42, %v137_v40 }
  0xf5   :  { %v166_v45 = vrot.slane %v162_v43, %v3051_v41  ;;  %v168_v46 = vmul.f32 %v162_v43, %v148_v32 }
  0xf7   :  { %v169_v47 = vsub.f32 %v138_v44, %v168_v46  ;;  %v167_v48 = vmul.f32 %v166_v45, %v133_v16 }
  0xf9   :  { %v173_v49 = vrot.slane %v169_v47, %v3051_v41 }
  0xfb   :  { %v174_v50 = vadd.f32 %v173_v49, %v167_v48 }
  0xfd   :  { %v175_v51 = vmul.f32 0.2, %v174_v50 }
  0xff   :  { %v176_v52 = vmax.f32 %v174_v50, %v175_v51 }
 0x101   :  { %178 = vrot.lane.b32.xlu1 %v176_v52, %s2901_s22  ;;  %v239_v63 = vrot.slane %v176_v52, %v3051_v41  ;;  %v287_v4 = vrot.slane %v176_v52, %v3062_v62 }
 0x103   :  { %v241_v8 = vmul.f32 %v239_v63, %v226_v61  ;;  %v240_v9 = vmul.f32 %v239_v63, %v222_v2  ;;  %v291_v19 = vmul.f32 %v287_v4, %v234_v59  ;;  %v243_v23 = vmul.f32 %v239_v63, %v234_v59 }
 0x104   :  { %v242_v24 = vmul.f32 %v239_v63, %v230_v55  ;;  %v290_v33 = vmul.f32 %v287_v4, %v230_v55  ;;  %v288_v44 = vmul.f32 %v287_v4, %v222_v2  ;;  %v289_v48 = vmul.f32 %v287_v4, %v226_v61 }
 0x105   :  { %183 = vrot.lane.b32.xlu1 %v176_v52, %s2902_s23 }
 0x109   :  { %253 = vperm.xlu1 %2794, %v189_v14  }
 0x10d   :  { %2797 = vset.pattern.permute.xlu1 %v4452_v5 }
 0x173   :  { %v179_v0 = vpop.permute.xlu1 %178 }
 0x174   :  { %v182_v3 = vsel %vm181_vm4, 0.0, %v179_v0 }
 0x175   :  { %v215_v6 = vrot.slane %v182_v3, %v3051_v41  ;;  %v279_v7 = vrot.slane %v182_v3, %v3062_v62 }
 0x177   :  { %v184_v10 = vpop.permute.xlu1 %183  ;;  %v216_v12 = vmul.f32 %v215_v6, %v195_v60  ;;  %v283_v13 = vmul.f32 %v279_v7, %v210_v54  ;;  %v218_v14 = vmul.f32 %v215_v6, %v205_v53  ;;  %v219_v15 = vmul.f32 %v215_v6, %v210_v54 }
 0x178   :  { %v187_v16 = vsel %vm186_vm5, %v184_v10, 0.0  ;;  %v217_v18 = vmul.f32 %v215_v6, %v200_v56  ;;  %v282_v29 = vmul.f32 %v279_v7, %v205_v53  ;;  %v280_v42 = vmul.f32 %v279_v7, %v195_v60 }
 0x179   :  { %v267_v20 = vrot.slane %v187_v16, %v3051_v41  ;;  %v299_v21 = vrot.slane %v187_v16, %v3062_v62  ;;  %v244_v22 = vadd.f32 %v240_v9, %v216_v12  ;;  %v295_v27 = vadd.f32 %v291_v19, %v283_v13 }
 0x17a   :  { %v245_v25 = vadd.f32 %v241_v8, %v217_v18  ;;  %v247_v30 = vadd.f32 %v243_v23, %v219_v15  ;;  %v246_v32 = vadd.f32 %v242_v24, %v218_v14  ;;  %v294_v40 = vadd.f32 %v290_v33, %v282_v29 }
 0x17b   :  { %v268_v26 = vmul.f32 %v267_v20, %v250_v17  ;;  %v303_v28 = vmul.f32 %v299_v21, %v262_v57  ;;  %v271_v31 = vmul.f32 %v267_v20, %v262_v57  ;;  %v302_v36 = vmul.f32 %v299_v21, %v258_v58 }
 0x17c   :  { %v270_v38 = vmul.f32 %v267_v20, %v258_v58  ;;  %v300_v45 = vmul.f32 %v299_v21, %v250_v17  ;;  %v281_v47 = vmul.f32 %v279_v7, %v200_v56  ;;  %v292_v49 = vadd.f32 %v288_v44, %v280_v42 }
 0x17d   :  { %v272_v34 = vadd.f32 %v268_v26, %v244_v22  ;;  %v307_v35 = vadd.f32 %v303_v28, %v295_v27  ;;  %v275_v37 = vadd.f32 %v271_v31, %v247_v30  ;;  %v306_v46 = vadd.f32 %v302_v36, %v294_v40 }
 0x17e   :  { %v274_v43 = vadd.f32 %v270_v38, %v246_v32  ;;  %v304_v53 = vadd.f32 %v300_v45, %v292_v49  ;;  %v293_v54 = vadd.f32 %v289_v48, %v281_v47  ;;  %vm2072_vm5 = vcmask 359424  }
 0x17f   :  { %318 = vrot.lane.b32.xlu1 %v307_v35, %s2903_s2 }
 0x183   :  { %316 = vrot.lane.b32.xlu1 %v306_v46, %s2903_s2 }
 0x184   :  { %v254_v50 = vpop.permute.xlu1 %253 }
 0x185   :  { %v269_v51 = vmul.f32 %v267_v20, %v254_v50  ;;  %v301_v52 = vmul.f32 %v299_v21, %v254_v50 }
 0x187   :  { %v273_v55 = vadd.f32 %v269_v51, %v245_v25  ;;  %312 = vrot.lane.b32.xlu1 %v304_v53, %s2903_s2  ;;  %v305_v57 = vadd.f32 %v301_v52, %v293_v54 }
 0x189   :  { %314 = vrot.lane.b32.xlu0 %v305_v57, %s2903_s2 }
 0x1f1   :  { %v3075_v58 = vpop.permute.xlu1 %318 }
 0x1f2   :  { %v3079_v56 = vsel %vm324_vm6, %v275_v37, %v3075_v58  ;;  %v346_v59 = vsel %vm333_vm7, %v3075_v58, 0.0  ;;  %v362_v7 = vmul.f32 %v3075_v58, %v3075_v58 }
 0x1f3   :  { %v347_v60 = vadd.f32 %v346_v59, %v3079_v56  ;;  %v361_v16 = vmul.f32 %v3079_v56, %v3079_v56 }
 0x1f4   :  { %v375_v18 = vsel %vm333_vm7, %v362_v7, 0.0 }
 0x1f5   :  { %v3084_v61 = vpop.permute.xlu1 %316  ;;  %348 = vadd.xlane.f32.xlu0 %v347_v60  ;;  %v376_v21 = vadd.f32 %v375_v18, %v361_v16  ;;  %v331_v60 = vld [vmem:[%s4439_s4 + $0x10] sm:$0xff]  ;;  %v329_v16 = vld [vmem:[%s4439_s4] sm:$0xff] }
 0x1f6   :  { %v3088_v63 = vsel %vm324_vm6, %v274_v43, %v3084_v61  ;;  %v342_v0 = vsel %vm333_vm7, %v3084_v61, 0.0  ;;  %v360_v2 = vmul.f32 %v3084_v61, %v3084_v61 }
 0x1f7   :  { %v343_v3 = vadd.f32 %v342_v0, %v3088_v63  ;;  %v359_v4 = vmul.f32 %v3088_v63, %v3088_v63 }
 0x1f8   :  { %v371_v6 = vsel %vm333_vm7, %v360_v2, 0.0 }
 0x1f9   :  { %344 = vadd.xlane.f32.xlu1 %v343_v3  ;;  %v372_v9 = vadd.f32 %v371_v6, %v359_v4  ;;  %v3117_v19 = vpop.permute.xlu1 %312  ;;  %v332_v6 = vld [vmem:[%s4439_s4 + $0x18] sm:$0xff] }
 0x1fa   :  { %v3121_v22 = vsel %vm324_vm6, %v272_v34, %v3117_v19  ;;  %v334_v23 = vsel %vm333_vm7, %v3117_v19, 0.0  ;;  %v356_v24 = vmul.f32 %v3117_v19, %v3117_v19 }
 0x1fb   :  { %v3100_v8 = vpop.permute.xlu0 %314  ;;  %v335_v25 = vadd.f32 %v334_v23, %v3121_v22  ;;  %v355_v26 = vmul.f32 %v3121_v22, %v3121_v22 }
 0x1fc   :  { %v3104_v10 = vsel %vm324_vm6, %v273_v55, %v3100_v8  ;;  %v338_v12 = vsel %vm333_vm7, %v3100_v8, 0.0  ;;  %v358_v13 = vmul.f32 %v3100_v8, %v3100_v8  ;;  %v363_v27 = vsel %vm333_vm7, %v356_v24, 0.0 }
 0x1fd   :  { %373 = vadd.xlane.f32.xlu1 %v372_v9  ;;  %v339_v14 = vadd.f32 %v338_v12, %v3104_v10  ;;  %v357_v15 = vmul.f32 %v3104_v10, %v3104_v10  ;;  %v364_v28 = vadd.f32 %v363_v27, %v355_v26  ;;  %v330_v12 = vld [vmem:[%s4439_s4 + $0x8] sm:$0xff] }
 0x1fe   :  { %v367_v17 = vsel %vm333_vm7, %v358_v13, 0.0 }
 0x1ff   :  { %340 = vadd.xlane.f32.xlu0 %v339_v14  ;;  %v368_v20 = vadd.f32 %v367_v17, %v357_v15 }
 0x201   :  { %369 = vadd.xlane.f32.xlu1 %v368_v20 }
 0x203   :  { %377 = vadd.xlane.f32.xlu0 %v376_v21 }
 0x207   :  { %336 = vadd.xlane.f32.xlu0 %v335_v25 }
 0x20b   :  { %365 = vadd.xlane.f32.xlu0 %v364_v28 }
 0x27e   :  { %v349_v31 = vpop.xlane.xlu0 %348 }
 0x27f   :  { %v354_v36 = vmul.f32 0.005, %v349_v31 }
 0x281   :  { %v386_v46 = vmul.f32 %v354_v36, %v354_v36 }
 0x282   :  { %v345_v29 = vpop.xlane.xlu1 %344 }
 0x283   :  { %v353_v30 = vmul.f32 0.005, %v345_v29 }
 0x285   :  { %v385_v33 = vmul.f32 %v353_v30, %v353_v30 }
 0x286   :  { %v374_v32 = vpop.xlane.xlu1 %373 }
 0x287   :  { %v381_v34 = vmul.f32 0.005, %v374_v32 }
 0x288   :  { %v341_v35 = vpop.xlane.xlu0 %340 }
 0x289   :  { %v389_v37 = vsub.f32 %v381_v34, %v385_v33  ;;  %v352_v38 = vmul.f32 0.005, %v341_v35 }
 0x28a   :  { %v370_v40 = vpop.xlane.xlu1 %369 }
 0x28b   :  { %v393_v42 = vadd.f32 0.8, %v389_v37  ;;  %v384_v43 = vmul.f32 %v352_v38, %v352_v38  ;;  %v380_v44 = vmul.f32 0.005, %v370_v40 }
 0x28c   :  { %v378_v45 = vpop.xlane.xlu0 %377 }
 0x28d   :  { %2846 = vrsqrt.f32 %v393_v42  ;;  %v388_v47 = vsub.f32 %v380_v44, %v384_v43  ;;  %v382_v48 = vmul.f32 0.005, %v378_v45 }
 0x28f   :  { %v392_v49 = vadd.f32 0.8, %v388_v47  ;;  %v390_v50 = vsub.f32 %v382_v48, %v386_v46 }
 0x290   :  { %v337_v51 = vpop.xlane.xlu0 %336 }
 0x291   :  { %v394_v52 = vadd.f32 0.8, %v390_v50  ;;  %v351_v53 = vmul.f32 0.005, %v337_v51  ;;  %2848 = vrsqrt.f32 %v392_v49 }
 0x293   :  { %2850 = vrsqrt.f32 %v394_v52  ;;  %v383_v55 = vmul.f32 %v351_v53, %v351_v53 }
 0x294   :  { %v366_v54 = vpop.xlane.xlu0 %365 }
 0x295   :  { %v379_v57 = vmul.f32 0.005, %v366_v54 }
 0x297   :  { %v387_v59 = vsub.f32 %v379_v57, %v383_v55 }
 0x299   :  { %v391_v0 = vadd.f32 0.8, %v387_v59 }
 0x29a   :  { %v2847_v2 = vpop.eup %2846 }
 0x29b   :  { %2852 = vrsqrt.f32 %v391_v0  ;;  %v401_v3 = vmul.f32 %v2847_v2, %v331_v60 }
 0x29d   :  { %v405_v4 = vmul.f32 %v401_v3, %v353_v30 }
 0x29e   :  { %v2849_v7 = vpop.eup %2848 }
 0x29f   :  { %415 = vrot.lane.b32.xlu0 %v405_v4, %s2901_s22  ;;  %v400_v15 = vmul.f32 %v2849_v7, %v330_v12 }
 0x2a0   :  { %v2851_v9 = vpop.eup %2850 }
 0x2a1   :  { %v402_v13 = vmul.f32 %v2851_v9, %v332_v6  ;;  %v404_v17 = vmul.f32 %v400_v15, %v352_v38  ;;  %v2610_v9 = vld [vmem:[%s4448_s13 + $0x1] ss:$2 sm:$0x3] }
 0x2a3   :  { %444 = vperm.xlu0 %2796, %v402_v13   ;;  %v406_v14 = vmul.f32 %v402_v13, %v354_v36 }
 0x2a5   :  { %417 = vrot.lane.b32.xlu1 %v406_v14, %s2901_s22 }
 0x2a7   :  { %434 = vperm.xlu0 %2796, %v400_v15   ;;  %v3215_v15 = vrot.slane %v2610_v9, %v3051_v41 }
 0x2a8   :  { %v2853_v18 = vpop.eup %2852 }
 0x2a9   :  { %413 = vrot.lane.b32.xlu1 %v404_v17, %s2901_s22  ;;  %v399_v20 = vmul.f32 %v2853_v18, %v329_v16  ;;  %4481 = vst [vmem:[#allocation8_spill] sm:$0xff] %v3215_v15 }
 0x2ab   :  { %429 = vperm.xlu0 %2796, %v399_v20   ;;  %v403_v21 = vmul.f32 %v399_v20, %v351_v53 }
 0x2ad   :  { %411 = vrot.lane.b32.xlu1 %v403_v21, %s2901_s22 }
 0x2af   :  { %2799 = vset.pattern.permute.xlu0 %v4453_v11 }
 0x2b1   :  { %439 = vperm.xlu1 %2797, %v401_v3  }
 0x2b5   :  { %2798 = vset.pattern.permute.xlu1 %v4453_v11 }
 0x311   :  { %v416_v25 = vpop.permute.xlu0 %415 }
 0x312   :  { %v425_v27 = vsub.f32 %v331_v60, %v416_v25 }
 0x317   :  { %v418_v23 = vpop.permute.xlu1 %417 }
 0x318   :  { %v426_v24 = vsub.f32 %v332_v6, %v418_v23 }
 0x31a   :  { %472 = vperm.xlu1 %2798, %v426_v24  }
 0x31b   :  { %v414_v26 = vpop.permute.xlu1 %413 }
 0x31c   :  { %v424_v29 = vsub.f32 %v330_v12, %v414_v26  ;;  %v3211_v12 = vrot.slane %v2610_v9, %v3062_v62  ;;  %v616_v9 = vld [vmem:[%s4440_s5 + $0x28] sm:$0xff] }
 0x31e   :  { %467 = vperm.xlu1 %2798, %v425_v27   ;;  %v445_v31 = vpop.permute.xlu0 %444  ;;  %4480 = vst [vmem:[#allocation7_spill] sm:$0xff] %v3211_v12 }
 0x31f   :  { %v412_v28 = vpop.permute.xlu1 %411  ;;  %v453_v34 = vmul.f32 %v445_v31, %v3079_v56  ;;  %v454_v35 = vmul.f32 %v445_v31, %v3075_v58 }
 0x320   :  { %v423_v30 = vsub.f32 %v329_v16, %v412_v28 }
 0x322   :  { %457 = vperm.xlu0 %2799, %v423_v30   ;;  %462 = vperm.xlu1 %2798, %v424_v29   ;;  %v435_v33 = vpop.permute.xlu0 %434 }
 0x323   :  { %v449_v50 = vmul.f32 %v435_v33, %v3104_v10  ;;  %v450_v56 = vmul.f32 %v435_v33, %v3100_v8 }
 0x326   :  { %2800 = vset.pattern.permute.xlu0 %v4452_v5  ;;  %2801 = vset.pattern.permute.xlu1 %v4452_v5  ;;  %v430_v44 = vpop.permute.xlu0 %429 }
 0x327   :  { %v447_v10 = vmul.f32 %v430_v44, %v3121_v22 }
 0x32c   :  { %v440_v32 = vpop.permute.xlu1 %439 }
 0x32d   :  { %v451_v40 = vmul.f32 %v440_v32, %v3088_v63  ;;  %v452_v42 = vmul.f32 %v440_v32, %v3084_v61  ;;  %v448_v63 = vmul.f32 %v430_v44, %v3117_v19  ;;  %v48_v44 = vld [vmem:[%s4448_s13] ss:$2 sm:$0x3] }
 0x395   :  { %v473_v36 = vpop.permute.xlu1 %472 }
 0x396   :  { %v481_v37 = vadd.f32 %v473_v36, %v453_v34  ;;  %v482_v38 = vadd.f32 %v473_v36, %v454_v35 }
 0x398   :  { %v490_v43 = vmul.f32 0.2, %v482_v38  ;;  %v489_v46 = vmul.f32 0.2, %v481_v37 }
 0x399   :  { %v468_v45 = vpop.permute.xlu1 %467 }
 0x39a   :  { %v479_v47 = vadd.f32 %v468_v45, %v451_v40  ;;  %v480_v48 = vadd.f32 %v468_v45, %v452_v42  ;;  %v3155_v49 = vmax.f32 %v482_v38, %v490_v43  ;;  %v3162_v55 = vmax.f32 %v481_v37, %v489_v46 }
 0x39b   :  { %v3238_v46 = vrot.slane %v48_v44, %v3062_v62 }
 0x39c   :  { %v488_v58 = vmul.f32 0.2, %v480_v48  ;;  %572 = vrot.lane.b32.xlu1 %v3155_v49, %s2902_s23  ;;  %v487_v52 = vmul.f32 0.2, %v479_v47 }
 0x39d   :  { %v463_v51 = vpop.permute.xlu1 %462  ;;  %v458_v61 = vpop.permute.xlu0 %457  ;;  %4482 = vst [vmem:[#allocation9_spill] sm:$0xff] %v3238_v46 }
 0x39e   :  { %v477_v53 = vadd.f32 %v463_v51, %v449_v50  ;;  %v478_v54 = vadd.f32 %v463_v51, %v450_v56  ;;  %v476_v57 = vadd.f32 %v458_v61, %v448_v63  ;;  %v3164_v59 = vmax.f32 %v480_v48, %v488_v58 }
 0x39f   :  { %v475_v19 = vadd.f32 %v458_v61, %v447_v10  ;;  %v3171_v0 = vmax.f32 %v479_v47, %v487_v52  ;;  %v3242_v47 = vrot.slane %v48_v44, %v3051_v41 }
 0x3a0   :  { %v486_v60 = vmul.f32 0.2, %v478_v54  ;;  %570 = vrot.lane.b32.xlu1 %v3162_v55, %s2902_s23  ;;  %568 = vrot.lane.b32.xlu0 %v3164_v59, %s2902_s23  ;;  %v485_v8 = vmul.f32 0.2, %v477_v53  ;;  %v484_v3 = vmul.f32 0.2, %v476_v57 }
 0x3a1   :  { %v483_v22 = vmul.f32 0.2, %v475_v19  ;;  %4483 = vst [vmem:[#allocation10_spill] sm:$0xff] %v3242_v47 }
 0x3a2   :  { %v3173_v2 = vmax.f32 %v478_v54, %v486_v60  ;;  %v3179_v4 = vmax.f32 %v477_v53, %v485_v8  ;;  %v3181_v6 = vmax.f32 %v476_v57, %v484_v3  ;;  %v611_v3 = vld [vmem:[%s4440_s5] sm:$0xff] }
 0x3a3   :  { %v3187_v7 = vmax.f32 %v475_v19, %v483_v22  ;;  %v612_v22 = vld [vmem:[%s4440_s5 + $0x8] sm:$0xff] }
 0x3a4   :  { %566 = vrot.lane.b32.xlu1 %v3171_v0, %s2902_s23  ;;  %564 = vrot.lane.b32.xlu0 %v3173_v2, %s2902_s23 }
 0x3a8   :  { %562 = vrot.lane.b32.xlu1 %v3179_v4, %s2902_s23  ;;  %560 = vrot.lane.b32.xlu0 %v3181_v6, %s2902_s23 }
 0x3ac   :  { %558 = vrot.lane.b32.xlu1 %v3187_v7, %s2902_s23  ;;  %519 = vrot.lane.b32.xlu0 %v3162_v55, %s2901_s22 }
 0x3b0   :  { %521 = vrot.lane.b32.xlu1 %v3155_v49, %s2901_s22  ;;  %515 = vrot.lane.b32.xlu0 %v3171_v0, %s2901_s22 }
 0x3b4   :  { %517 = vrot.lane.b32.xlu1 %v3164_v59, %s2901_s22  ;;  %511 = vrot.lane.b32.xlu0 %v3179_v4, %s2901_s22 }
 0x3b8   :  { %513 = vrot.lane.b32.xlu1 %v3173_v2, %s2901_s22  ;;  %507 = vrot.lane.b32.xlu0 %v3187_v7, %s2901_s22 }
 0x3bc   :  { %509 = vrot.lane.b32.xlu1 %v3181_v6, %s2901_s22 }
 0x40e   :  { %v573_v13 = vpop.permute.xlu1 %572 }
 0x40f   :  { %v591_v14 = vsel %vm587_vm8, %v573_v13, 0.0 }
 0x410   :  { %v610_v16 = vmul.f32 %v3211_v12, %v591_v14  ;;  %v618_v14 = vld [vmem:[%s4440_s5 + $0x38] sm:$0xff] }
 0x412   :  { %v571_v17 = vpop.permute.xlu1 %570  ;;  %652 = vmatprep.subr.mxu1 %v610_v16  ;;  %v569_v20 = vpop.permute.xlu0 %568 }
 0x413   :  { %v578_v18 = vsel %vm574_vm9, %v571_v17, %v573_v13  ;;  %v590_v21 = vsel %vm587_vm8, %v569_v20, 0.0  ;;  %v617_v13 = vld [vmem:[%s4440_s5 + $0x30] sm:$0xff] }
 0x414   :  { %v609_v23 = vmul.f32 %v3215_v15, %v578_v18  ;;  %v608_v24 = vmul.f32 %v3211_v12, %v590_v21 }
 0x416   :  { %v567_v25 = vpop.permute.xlu1 %566  ;;  %653 = vmatpush1.msra.mxu1 %v609_v23  ;;  %v565_v27 = vpop.permute.xlu0 %564 }
 0x417   :  { %v577_v26 = vsel %vm574_vm9, %v567_v25, %v569_v20  ;;  %654 = vmatprep.subr.mxu1 %v608_v24  ;;  %v589_v29 = vsel %vm587_vm8, %v565_v27, 0.0 }
 0x418   :  { %v607_v28 = vmul.f32 %v3215_v15, %v577_v26  ;;  %v606_v30 = vmul.f32 %v3211_v12, %v589_v29 }
 0x41a   :  { %v563_v31 = vpop.permute.xlu1 %562  ;;  %655 = vmatpush1.msra.mxu1 %v607_v28  ;;  %v561_v33 = vpop.permute.xlu0 %560 }
 0x41b   :  { %v576_v32 = vsel %vm574_vm9, %v563_v31, %v565_v27  ;;  %656 = vmatprep.subr.mxu1 %v606_v30  ;;  %v588_v35 = vsel %vm587_vm8, %v561_v33, 0.0 }
 0x41c   :  { %v605_v34 = vmul.f32 %v3215_v15, %v576_v32  ;;  %v604_v36 = vmul.f32 %v3211_v12, %v588_v35 }
 0x41e   :  { %v559_v37 = vpop.permute.xlu1 %558  ;;  %657 = vmatpush1.msra.mxu1 %v605_v34  ;;  %v520_v40 = vpop.permute.xlu0 %519 }
 0x41f   :  { %v575_v38 = vsel %vm574_vm9, %v559_v37, %v561_v33  ;;  %658 = vmatprep.subr.mxu1 %v604_v36  ;;  %v538_v56 = vsel %vm181_vm4, 0.0, %v520_v40 }
 0x420   :  { %v603_v42 = vmul.f32 %v3215_v15, %v575_v38  ;;  %v556_v61 = vmul.f32 %v3242_v47, %v538_v56 }
 0x422   :  { %v522_v43 = vpop.permute.xlu1 %521  ;;  %659 = vmatpush1.msra.mxu1 %v603_v42  ;;  %v516_v45 = vpop.permute.xlu0 %515 }
 0x423   :  { %660 = vmatprep.subr.mxu1 %v3155_v49  ;;  %v526_v48 = vsel %vm181_vm4, %v520_v40, %v522_v43  ;;  %v537_v63 = vsel %vm181_vm4, 0.0, %v516_v45 }
 0x424   :  { %661 = vmatpush1.msra.mxu1 %v3162_v55  ;;  %v557_v62 = vmul.f32 %v3238_v46, %v526_v48 }
 0x425   :  { %662 = vmatprep.subr.mxu1 %v3164_v59  ;;  %v554_v59 = vmul.f32 %v3242_v47, %v537_v63 }
 0x426   :  { %v518_v50 = vpop.permute.xlu1 %517  ;;  %663 = vmatpush1.msra.mxu1 %v3171_v0  ;;  %v512_v58 = vpop.permute.xlu0 %511 }
 0x427   :  { %664 = vmatprep.subr.mxu1 %v3173_v2  ;;  %v525_v49 = vsel %vm181_vm4, %v516_v45, %v518_v50  ;;  %v536_v53 = vsel %vm181_vm4, 0.0, %v512_v58 }
 0x428   :  { %665 = vmatpush1.msra.mxu1 %v3179_v4  ;;  %v555_v52 = vmul.f32 %v3238_v46, %v525_v49  ;;  %v552_v8 = vmul.f32 %v3242_v47, %v536_v53  ;;  %v613_v4 = vld [vmem:[%s4440_s5 + $0x10] sm:$0xff] }
 0x429   :  { %666 = vmatprep.subr.mxu1 %v3181_v6  ;;  %v614_v6 = vld [vmem:[%s4440_s5 + $0x18] sm:$0xff] }
 0x42a   :  { %v514_v51 = vpop.permute.xlu1 %513  ;;  %667 = vmatpush1.msra.mxu1 %v3187_v7  ;;  %v508_v55 = vpop.permute.xlu0 %507  ;;  %v615_v7 = vld [vmem:[%s4440_s5 + $0x20] sm:$0xff] }
 0x42b   :  { %v524_v54 = vsel %vm181_vm4, %v512_v58, %v514_v51  ;;  %668 = vmatprep.subr.mxu1 %v557_v62  ;;  %v535_v10 = vsel %vm181_vm4, 0.0, %v508_v55 }
 0x42c   :  { %v553_v57 = vmul.f32 %v3238_v46, %v524_v54  ;;  %669 = vmatpush1.msra.mxu1 %v556_v61  ;;  %v550_v2 = vmul.f32 %v3242_v47, %v535_v10 }
 0x42d   :  { %670 = vmatprep.subr.mxu1 %v555_v52 }
 0x42e   :  { %v510_v60 = vpop.permute.xlu1 %509  ;;  %671 = vmatpush1.msra.mxu1 %v554_v59 }
 0x42f   :  { %v523_v19 = vsel %vm181_vm4, %v508_v55, %v510_v60  ;;  %672 = vmatprep.subr.mxu1 %v553_v57 }
 0x430   :  { %v551_v0 = vmul.f32 %v3238_v46, %v523_v19  ;;  %673 = vmatpush1.msra.mxu1 %v552_v8 }
 0x432   :  { %674 = vmatprep.subr.mxu1 %v551_v0 }
 0x433   :  { %675 = vmatpush1.msra.mxu1 %v550_v2 }
 0x434   :  { %2613 = vmatmul.mubr.msk.f32.vlgmr.msra.gmra.mxu1 %vm619_vm10, %v611_v3 }
 0x435   :  { %714 = vmatprep.mubr.f32.mxu1 %v4450_v1 }
 0x438   :  { %2614 = vmatmul.mubr.msk.f32.gmra.mxu1 %vm619_vm10, %v612_v22 }
 0x439   :  { %720 = vmatprep.mubr.f32.mxu1 %v4450_v1 }
 0x43c   :  { %2615 = vmatmul.mubr.msk.f32.gmra.mxu1 %vm619_vm10, %v613_v4 }
 0x43d   :  { %726 = vmatprep.mubr.f32.mxu1 %v4450_v1 }
 0x440   :  { %2616 = vmatmul.mubr.msk.f32.gmra.mxu1 %vm619_vm10, %v614_v6 }
 0x441   :  { %732 = vmatprep.mubr.f32.mxu1 %v4450_v1 }
 0x444   :  { %2617 = vmatmul.mubr.msk.f32.gmra.mxu1 %vm619_vm10, %v615_v7 }
 0x445   :  { %738 = vmatprep.mubr.f32.mxu1 %v4450_v1 }
 0x448   :  { %2618 = vmatmul.mubr.msk.f32.gmra.mxu1 %vm619_vm10, %v616_v9 }
 0x449   :  { %744 = vmatprep.mubr.f32.mxu1 %v4450_v1 }
 0x44c   :  { %2619 = vmatmul.mubr.msk.f32.gmra.mxu1 %vm619_vm10, %v617_v13 }
 0x44d   :  { %750 = vmatprep.mubr.f32.mxu1 %v4450_v1 }
 0x450   :  { %2620 = vmatmul.mubr.msk.f32.gmra.mxu1 %vm619_vm10, %v618_v14  ;;  %vm2273_vm10 = vcmask 261120  }
 0x4f4   :  { %v3304_v16 = vpop.f32.mrf.mxu1 }
 0x4f6   :  { %v3306_v17 = vpop.f32.mrf.mxu1 }
 0x4f7   :  { %v761_v18 = vsel %vm333_vm7, %v3306_v17, 0.0  ;;  %v802_v3 = vmul.f32 %v3306_v17, %v3306_v17 }
 0x4f8   :  { %v3310_v20 = vpop.f32.mrf.mxu1  ;;  %v762_v21 = vadd.f32 %v761_v18, %v3304_v16 }
 0x4f9   :  { %v803_v7 = vmul.f32 %v3310_v20, %v3310_v20 }
 0x4fa   :  { %763 = vadd.xlane.f32.xlu1 %v762_v21  ;;  %v3313_v23 = vpop.f32.mrf.mxu1  ;;  %v817_v21 = vsel %vm333_vm7, %v802_v3, 0.0 }
 0x4fb   :  { %v765_v24 = vsel %vm333_vm7, %v3313_v23, 0.0  ;;  %v804_v55 = vmul.f32 %v3313_v23, %v3313_v23 }
 0x4fc   :  { %v3317_v25 = vpop.f32.mrf.mxu1  ;;  %v766_v26 = vadd.f32 %v765_v24, %v3310_v20 }
 0x4fd   :  { %v805_v32 = vmul.f32 %v3317_v25, %v3317_v25  ;;  %v821_v6 = vsel %vm333_vm7, %v804_v55, 0.0 }
 0x4fe   :  { %767 = vadd.xlane.f32.xlu1 %v766_v26  ;;  %v3320_v27 = vpop.f32.mrf.mxu1  ;;  %v822_v13 = vadd.f32 %v821_v6, %v803_v7  ;;  %v801_v26 = vmul.f32 %v3304_v16, %v3304_v16 }
 0x4ff   :  { %v806_v28 = vmul.f32 %v3320_v27, %v3320_v27  ;;  %v769_v29 = vsel %vm333_vm7, %v3320_v27, 0.0 }
 0x500   :  { %v3326_v30 = vpop.f32.mrf.mxu1  ;;  %v770_v31 = vadd.f32 %v769_v29, %v3317_v25  ;;  %v818_v29 = vadd.f32 %v817_v21, %v801_v26 }
 0x501   :  { %v825_v33 = vsel %vm333_vm7, %v806_v28, 0.0  ;;  %v807_v42 = vmul.f32 %v3326_v30, %v3326_v30 }
 0x502   :  { %771 = vadd.xlane.f32.xlu0 %v770_v31  ;;  %v3332_v34 = vpop.f32.mrf.mxu1  ;;  %v826_v35 = vadd.f32 %v825_v33, %v805_v32 }
 0x503   :  { %v808_v36 = vmul.f32 %v3332_v34, %v3332_v34  ;;  %v773_v37 = vsel %vm333_vm7, %v3332_v34, 0.0 }
 0x504   :  { %827 = vadd.xlane.f32.xlu1 %v826_v35  ;;  %v3338_v38 = vpop.f32.mrf.mxu1  ;;  %v774_v40 = vadd.f32 %v773_v37, %v3326_v30 }
 0x505   :  { %v829_v43 = vsel %vm333_vm7, %v808_v36, 0.0  ;;  %v809_v32 = vmul.f32 %v3338_v38, %v3338_v38 }
 0x506   :  { %775 = vadd.xlane.f32.xlu0 %v774_v40  ;;  %v3344_v44 = vpop.f32.mrf.mxu1  ;;  %v830_v45 = vadd.f32 %v829_v43, %v807_v42 }
 0x507   :  { %v777_v48 = vsel %vm333_vm7, %v3344_v44, 0.0  ;;  %v810_v14 = vmul.f32 %v3344_v44, %v3344_v44 }
 0x508   :  { %831 = vadd.xlane.f32.xlu1 %v830_v45  ;;  %v3348_v50 = vpop.f32.mrf.mxu1  ;;  %v778_v56 = vadd.f32 %v777_v48, %v3338_v38 }
 0x509   :  { %v811_v24 = vmul.f32 %v3348_v50, %v3348_v50  ;;  %v833_v31 = vsel %vm333_vm7, %v810_v14, 0.0 }
 0x50a   :  { %779 = vadd.xlane.f32.xlu0 %v778_v56  ;;  %v3351_v58 = vpop.f32.mrf.mxu1  ;;  %v834_v33 = vadd.f32 %v833_v31, %v809_v32 }
 0x50b   :  { %v781_v49 = vsel %vm333_vm7, %v3351_v58, 0.0  ;;  %v812_v22 = vmul.f32 %v3351_v58, %v3351_v58 }
 0x50c   :  { %v3355_v62 = vpop.f32.mrf.mxu1  ;;  %v782_v63 = vadd.f32 %v781_v49, %v3348_v50 }
 0x50d   :  { %v813_v10 = vmul.f32 %v3355_v62, %v3355_v62  ;;  %v837_v18 = vsel %vm333_vm7, %v812_v22, 0.0 }
 0x50e   :  { %783 = vadd.xlane.f32.xlu0 %v782_v63  ;;  %v3358_v51 = vpop.f32.mrf.mxu1  ;;  %v838_v28 = vadd.f32 %v837_v18, %v811_v24 }
 0x50f   :  { %v814_v61 = vmul.f32 %v3358_v51, %v3358_v51  ;;  %v785_v52 = vsel %vm333_vm7, %v3358_v51, 0.0 }
 0x510   :  { %v3364_v53 = vpop.f32.mrf.mxu1  ;;  %v786_v54 = vadd.f32 %v785_v52, %v3355_v62 }
 0x511   :  { %v841_v57 = vsel %vm333_vm7, %v814_v61, 0.0  ;;  %v815_v2 = vmul.f32 %v3364_v53, %v3364_v53 }
 0x512   :  { %787 = vadd.xlane.f32.xlu0 %v786_v54  ;;  %v3370_v59 = vpop.f32.mrf.mxu1  ;;  %v842_v19 = vadd.f32 %v841_v57, %v813_v10 }
 0x513   :  { %v816_v60 = vmul.f32 %v3370_v59, %v3370_v59  ;;  %v789_v8 = vsel %vm333_vm7, %v3370_v59, 0.0 }
 0x514   :  { %v790_v0 = vadd.f32 %v789_v8, %v3364_v53 }
 0x515   :  { %v845_v4 = vsel %vm333_vm7, %v816_v60, 0.0 }
 0x516   :  { %843 = vadd.xlane.f32.xlu0 %v842_v19  ;;  %791 = vadd.xlane.f32.xlu1 %v790_v0  ;;  %v846_v9 = vadd.f32 %v845_v4, %v815_v2 }
 0x51a   :  { %847 = vadd.xlane.f32.xlu0 %v846_v9  ;;  %823 = vadd.xlane.f32.xlu1 %v822_v13 }
 0x51e   :  { %839 = vadd.xlane.f32.xlu0 %v838_v28  ;;  %819 = vadd.xlane.f32.xlu1 %v818_v29 }
 0x522   :  { %835 = vadd.xlane.f32.xlu0 %v834_v33 }
 0x583   :  { %v764_v35 = vpop.xlane.xlu1 %763 }
 0x584   :  { %v793_v24 = vmul.f32 0.005, %v764_v35 }
 0x587   :  { %v768_v40 = vpop.xlane.xlu1 %767 }
 0x588   :  { %v794_v0 = vmul.f32 0.005, %v768_v40 }
 0x58b   :  { %v772_v36 = vpop.xlane.xlu0 %771 }
 0x58c   :  { %v795_v49 = vmul.f32 0.005, %v772_v36 }
 0x58d   :  { %v828_v43 = vpop.xlane.xlu1 %827 }
 0x58e   :  { %v851_v52 = vmul.f32 0.005, %v828_v43 }
 0x58f   :  { %v776_v37 = vpop.xlane.xlu0 %775 }
 0x590   :  { %v796_v54 = vmul.f32 0.005, %v776_v37 }
 0x591   :  { %v832_v48 = vpop.xlane.xlu1 %831 }
 0x592   :  { %v852_v22 = vmul.f32 0.005, %v832_v48 }
 0x593   :  { %v780_v42 = vpop.xlane.xlu0 %779 }
 0x594   :  { %v797_v4 = vmul.f32 0.005, %v780_v42 }
 0x596   :  { %v857_v29 = vadd.f32 %v797_v4, %v793_v24 }
 0x597   :  { %v784_v45 = vpop.xlane.xlu0 %783 }
 0x598   :  { %v798_v55 = vmul.f32 0.005, %v784_v45 }
 0x59a   :  { %v858_v6 = vadd.f32 %v798_v55, %v794_v0 }
 0x59b   :  { %v788_v56 = vpop.xlane.xlu0 %787 }
 0x59c   :  { %v799_v63 = vmul.f32 0.005, %v788_v56  ;;  %v866_v31 = vmul.f32 0.5, %v858_v6  ;;  %v865_v56 = vmul.f32 0.5, %v857_v29  ;;  %v760_v6 = vld [vmem:[%s4441_s6 + $0x18] sm:$0xff] }
 0x59e   :  { %v859_v61 = vadd.f32 %v799_v63, %v795_v49 }
 0x59f   :  { %v844_v57 = vpop.xlane.xlu0 %843  ;;  %v792_v10 = vpop.xlane.xlu1 %791 }
 0x5a0   :  { %v867_v60 = vmul.f32 0.5, %v859_v61  ;;  %v855_v8 = vmul.f32 0.005, %v844_v57  ;;  %v800_v19 = vmul.f32 0.005, %v792_v10  ;;  %v874_v61 = vmul.f32 %v866_v31, %v866_v31 }
 0x5a1   :  { %v873_v10 = vmul.f32 %v865_v56, %v865_v56 }
 0x5a2   :  { %v863_v2 = vadd.f32 %v855_v8, %v851_v52  ;;  %v860_v3 = vadd.f32 %v800_v19, %v796_v54  ;;  %v875_v13 = vmul.f32 %v867_v60, %v867_v60 }
 0x5a3   :  { %v848_v7 = vpop.xlane.xlu0 %847  ;;  %v824_v9 = vpop.xlane.xlu1 %823 }
 0x5a4   :  { %v871_v14 = vmul.f32 0.5, %v863_v2  ;;  %v868_v18 = vmul.f32 0.5, %v860_v3  ;;  %v856_v21 = vmul.f32 0.005, %v848_v7  ;;  %v850_v32 = vmul.f32 0.005, %v824_v9 }
 0x5a5   :  { %v759_v3 = vld [vmem:[%s4441_s6 + $0x10] sm:$0xff] }
 0x5a6   :  { %v879_v26 = vsub.f32 %v871_v14, %v875_v13  ;;  %v864_v28 = vadd.f32 %v856_v21, %v852_v22  ;;  %v876_v37 = vmul.f32 %v868_v18, %v868_v18  ;;  %v758_v14 = vld [vmem:[%s4441_s6 + $0x8] sm:$0xff] }
 0x5a7   :  { %v840_v33 = vpop.xlane.xlu0 %839  ;;  %v820_v45 = vpop.xlane.xlu1 %819 }
 0x5a8   :  { %v883_v36 = vadd.f32 0.8, %v879_v26  ;;  %v872_v40 = vmul.f32 0.5, %v864_v28  ;;  %v854_v43 = vmul.f32 0.005, %v840_v33  ;;  %v757_v28 = vld [vmem:[%s4441_s6] sm:$0xff] }
 0x5a9   :  { %v849_v49 = vmul.f32 0.005, %v820_v45 }
 0x5aa   :  { %2854 = vrsqrt.f32 %v883_v36  ;;  %v880_v42 = vsub.f32 %v872_v40, %v876_v37  ;;  %v862_v48 = vadd.f32 %v854_v43, %v850_v32 }
 0x5ab   :  { %v836_v63 = vpop.xlane.xlu0 %835 }
 0x5ac   :  { %v884_v52 = vadd.f32 0.8, %v880_v42  ;;  %v870_v35 = vmul.f32 0.5, %v862_v48  ;;  %v853_v54 = vmul.f32 0.005, %v836_v63 }
 0x5ae   :  { %2856 = vrsqrt.f32 %v884_v52  ;;  %v878_v55 = vsub.f32 %v870_v35, %v874_v61  ;;  %v861_v57 = vadd.f32 %v853_v54, %v849_v49 }
 0x5b0   :  { %v882_v8 = vadd.f32 0.8, %v878_v55  ;;  %v869_v19 = vmul.f32 0.5, %v861_v57 }
 0x5b2   :  { %2858 = vrsqrt.f32 %v882_v8  ;;  %v877_v0 = vsub.f32 %v869_v19, %v873_v10 }
 0x5b4   :  { %v881_v2 = vadd.f32 0.8, %v877_v0 }
 0x5b6   :  { %2860 = vrsqrt.f32 %v881_v2 }
 0x5b7   :  { %v2855_v22 = vpop.eup %2854 }
 0x5b8   :  { %v891_v4 = vmul.f32 %v2855_v22, %v759_v3 }
 0x5ba   :  { %v895_v7 = vmul.f32 %v891_v4, %v867_v60 }
 0x5bb   :  { %v2857_v9 = vpop.eup %2856 }
 0x5bc   :  { %905 = vrot.lane.b32.xlu0 %v895_v7, %s2901_s22  ;;  %v892_v13 = vmul.f32 %v2857_v9, %v760_v6 }
 0x5be   :  { %v896_v21 = vmul.f32 %v892_v13, %v868_v18 }
 0x5bf   :  { %v2859_v24 = vpop.eup %2858 }
 0x5c0   :  { %934 = vperm.xlu0 %2800, %v892_v13   ;;  %907 = vrot.lane.b32.xlu1 %v896_v21, %s2901_s22  ;;  %v890_v26 = vmul.f32 %v2859_v24, %v758_v14 }
 0x5c2   :  { %v894_v29 = vmul.f32 %v890_v26, %v866_v31 }
 0x5c3   :  { %v2861_v60 = vpop.eup %2860 }
 0x5c4   :  { %924 = vperm.xlu0 %2800, %v890_v26   ;;  %903 = vrot.lane.b32.xlu1 %v894_v29, %s2901_s22  ;;  %v889_v32 = vmul.f32 %v2861_v60, %v757_v28 }
 0x5c6   :  { %v893_v33 = vmul.f32 %v889_v32, %v865_v56 }
 0x5c8   :  { %919 = vperm.xlu0 %2800, %v889_v32   ;;  %901 = vrot.lane.b32.xlu1 %v893_v33, %s2901_s22 }
 0x5cc   :  { %929 = vperm.xlu1 %2801, %v891_v4   ;;  %2803 = vset.pattern.permute.xlu0 %v4453_v11 }
 0x5d0   :  { %2802 = vset.pattern.permute.xlu1 %v4453_v11 }
 0x62e   :  { %v906_v18 = vpop.permute.xlu0 %905 }
 0x62f   :  { %v915_v36 = vsub.f32 %v759_v3, %v906_v18 }
 0x631   :  { %965 = vperm.xlu1 %2802, %v915_v36  }
 0x632   :  { %v908_v37 = vpop.permute.xlu1 %907 }
 0x633   :  { %v916_v40 = vsub.f32 %v760_v6, %v908_v37 }
 0x635   :  { %970 = vperm.xlu1 %2802, %v916_v40  }
 0x636   :  { %v904_v31 = vpop.permute.xlu1 %903 }
 0x637   :  { %v914_v43 = vsub.f32 %v758_v14, %v904_v31 }
 0x639   :  { %960 = vperm.xlu1 %2802, %v914_v43  }
 0x63a   :  { %v902_v45 = vpop.permute.xlu1 %901 }
 0x63b   :  { %v913_v42 = vsub.f32 %v757_v28, %v902_v45  ;;  %v935_v48 = vpop.permute.xlu0 %934 }
 0x63c   :  { %v944_v54 = vmul.f32 %v935_v48, %v3332_v34  ;;  %v943_v55 = vmul.f32 %v935_v48, %v3326_v30  ;;  %v952_v40 = vmul.f32 %v935_v48, %v3370_v59 }
 0x63d   :  { %955 = vperm.xlu0 %2803, %v913_v42   ;;  %2805 = vset.pattern.permute.xlu1 %v4452_v5 }
 0x63f   :  { %v925_v52 = vpop.permute.xlu0 %924 }
 0x640   :  { %v940_v0 = vmul.f32 %v925_v52, %v3313_v23  ;;  %v947_v59 = vmul.f32 %v925_v52, %v3348_v50 }
 0x641   :  { %2804 = vset.pattern.permute.xlu0 %v4452_v5 }
 0x643   :  { %v920_v3 = vpop.permute.xlu0 %919 }
 0x644   :  { %v937_v13 = vmul.f32 %v920_v3, %v3304_v16  ;;  %v938_v14 = vmul.f32 %v920_v3, %v3306_v17 }
 0x647   :  { %v930_v56 = vpop.permute.xlu1 %929 }
 0x648   :  { %v941_v49 = vmul.f32 %v930_v56, %v3317_v25  ;;  %v939_v25 = vmul.f32 %v925_v52, %v3310_v20  ;;  %v942_v4 = vmul.f32 %v930_v56, %v3320_v27  ;;  %v950_v60 = vmul.f32 %v930_v56, %v3358_v51 }
 0x649   :  { %v949_v16 = vmul.f32 %v930_v56, %v3355_v62  ;;  %v951_v51 = vmul.f32 %v935_v48, %v3364_v53 }
 0x6ac   :  { %v966_v63 = vpop.permute.xlu1 %965 }
 0x6ad   :  { %v977_v61 = vadd.f32 %v966_v63, %v941_v49  ;;  %v978_v7 = vadd.f32 %v966_v63, %v942_v4  ;;  %v986_v17 = vadd.f32 %v966_v63, %v950_v60  ;;  %v985_v37 = vadd.f32 %v966_v63, %v949_v16 }
 0x6ae   :  { %v948_v49 = vmul.f32 %v925_v52, %v3351_v58  ;;  %v945_v58 = vmul.f32 %v920_v3, %v3338_v38 }
 0x6af   :  { %v993_v35 = vmul.f32 0.2, %v977_v61  ;;  %v994_v29 = vmul.f32 0.2, %v978_v7  ;;  %v1002_v43 = vmul.f32 0.2, %v986_v17 }
 0x6b0   :  { %v971_v57 = vpop.permute.xlu1 %970  ;;  %v1001_v42 = vmul.f32 0.2, %v985_v37 }
 0x6b1   :  { %v3423_v10 = vmax.f32 %v977_v61, %v993_v35  ;;  %v980_v8 = vadd.f32 %v971_v57, %v944_v54  ;;  %v979_v19 = vadd.f32 %v971_v57, %v943_v55  ;;  %v3448_v18 = vmax.f32 %v978_v7, %v994_v29 }
 0x6b2   :  { %v988_v31 = vadd.f32 %v971_v57, %v952_v40  ;;  %v987_v56 = vadd.f32 %v971_v57, %v951_v51  ;;  %v3466_v53 = vmax.f32 %v986_v17, %v1002_v43  ;;  %v3468_v61 = vmax.f32 %v985_v37, %v1001_v42 }
 0x6b3   :  { %1085 = vrot.lane.b32.xlu1 %v3423_v10, %s2902_s23  ;;  %v996_v2 = vmul.f32 0.2, %v980_v8  ;;  %v995_v30 = vmul.f32 0.2, %v979_v19  ;;  %v946_v55 = vmul.f32 %v920_v3, %v3344_v44 }
 0x6b4   :  { %v961_v22 = vpop.permute.xlu1 %960  ;;  %v1004_v48 = vmul.f32 0.2, %v988_v31  ;;  %v1003_v35 = vmul.f32 0.2, %v987_v56 }
 0x6b5   :  { %v3430_v34 = vmax.f32 %v980_v8, %v996_v2  ;;  %v976_v6 = vadd.f32 %v961_v22, %v940_v0  ;;  %v975_v9 = vadd.f32 %v961_v22, %v939_v25  ;;  %v3436_v24 = vmax.f32 %v979_v19, %v995_v30 }
 0x6b6   :  { %v984_v63 = vadd.f32 %v961_v22, %v948_v49  ;;  %v983_v54 = vadd.f32 %v961_v22, %v947_v59  ;;  %v1020_v52 = vmax.f32 %v988_v31, %v1004_v48  ;;  %v1019_v19 = vmax.f32 %v987_v56, %v1003_v35 }
 0x6b7   :  { %1091 = vrot.lane.b32.xlu1 %v3430_v34, %s2902_s23  ;;  %v992_v23 = vmul.f32 0.2, %v976_v6  ;;  %v991_v26 = vmul.f32 0.2, %v975_v9 }
 0x6b8   :  { %v956_v21 = vpop.permute.xlu0 %955  ;;  %v1000_v57 = vmul.f32 0.2, %v984_v63  ;;  %v999_v0 = vmul.f32 0.2, %v983_v54 }
 0x6b9   :  { %v973_v20 = vadd.f32 %v956_v21, %v937_v13  ;;  %v974_v27 = vadd.f32 %v956_v21, %v938_v14  ;;  %v3438_v28 = vmax.f32 %v976_v6, %v992_v23  ;;  %v3446_v32 = vmax.f32 %v975_v9, %v991_v26 }
 0x6ba   :  { %v982_v50 = vadd.f32 %v956_v21, %v946_v55  ;;  %v981_v8 = vadd.f32 %v956_v21, %v945_v58  ;;  %v1016_v44 = vmax.f32 %v984_v63, %v1000_v57  ;;  %v1015_v25 = vmax.f32 %v983_v54, %v999_v0  ;;  %v1117_v0 = vld [vmem:[%s4442_s7] sm:$0xff] }
 0x6bb   :  { %1089 = vrot.lane.b32.xlu1 %v3436_v24, %s2902_s23  ;;  %1083 = vrot.lane.b32.xlu0 %v3438_v28, %s2902_s23  ;;  %v989_v33 = vmul.f32 0.2, %v973_v20  ;;  %v990_v36 = vmul.f32 0.2, %v974_v27 }
 0x6bc   :  { %v998_v2 = vmul.f32 0.2, %v982_v50  ;;  %v997_v22 = vmul.f32 0.2, %v981_v8 }
 0x6bd   :  { %v3456_v62 = vmax.f32 %v973_v20, %v989_v33  ;;  %v3458_v45 = vmax.f32 %v974_v27, %v990_v36 }
 0x6be   :  { %v1014_v38 = vmax.f32 %v982_v50, %v998_v2  ;;  %v1013_v3 = vmax.f32 %v981_v8, %v997_v22  ;;  %v1118_v2 = vld [vmem:[%s4442_s7 + $0x8] sm:$0xff]  ;;  %v1121_v22 = vld [vmem:[%s4442_s7 + $0x20] sm:$0xff] }
 0x6bf   :  { %1081 = vrot.lane.b32.xlu1 %v3446_v32, %s2902_s23  ;;  %1087 = vrot.lane.b32.xlu0 %v3448_v18, %s2902_s23 }
 0x6c3   :  { %1077 = vrot.lane.b32.xlu1 %v3456_v62, %s2902_s23  ;;  %1079 = vrot.lane.b32.xlu0 %v3458_v45, %s2902_s23 }
 0x6c7   :  { %1039 = vrot.lane.b32.xlu1 %v3466_v53, %s2901_s22  ;;  %1037 = vrot.lane.b32.xlu0 %v3468_v61, %s2901_s22 }
 0x6cb   :  { %1043 = vrot.lane.b32.xlu1 %v1020_v52, %s2901_s22  ;;  %1041 = vrot.lane.b32.xlu0 %v1019_v19, %s2901_s22 }
 0x6cf   :  { %1035 = vrot.lane.b32.xlu1 %v1016_v44, %s2901_s22  ;;  %1033 = vrot.lane.b32.xlu0 %v1015_v25, %s2901_s22 }
 0x6d3   :  { %1031 = vrot.lane.b32.xlu1 %v1014_v38, %s2901_s22  ;;  %1029 = vrot.lane.b32.xlu0 %v1013_v3, %s2901_s22 }
 0x725   :  { %v1086_v4 = vpop.permute.xlu1 %1085 }
 0x729   :  { %v1092_v30 = vpop.permute.xlu1 %1091 }
 0x72a   :  { %v1108_v6 = vsel %vm587_vm8, %v1092_v30, 0.0 }
 0x72b   :  { %v1116_v7 = vmul.f32 %v1108_v6, %v3211_v12  ;;  %v1126_v6 = vld [vmem:[%s4442_s7 + $0x48] sm:$0xff] }
 0x72d   :  { %1133 = vmatprep.subr.mxu0 %v1116_v7  ;;  %v1090_v9 = vpop.permute.xlu1 %1089  ;;  %v1084_v13 = vpop.permute.xlu0 %1083  ;;  %v1127_v7 = vld [vmem:[%s4442_s7 + $0x50] sm:$0xff] }
 0x72e   :  { %v1096_v23 = vsel %vm574_vm9, %v1090_v9, %v1092_v30  ;;  %v1106_v26 = vsel %vm587_vm8, %v1084_v13, 0.0  ;;  %v1125_v30 = vld [vmem:[%s4442_s7 + $0x40] sm:$0xff]  ;;  %v1128_v9 = vld [vmem:[%s4442_s7 + $0x58] sm:$0xff] }
 0x72f   :  { %v1115_v14 = vmul.f32 %v1096_v23, %v3215_v15  ;;  %v1112_v36 = vmul.f32 %v1106_v26, %v3211_v12  ;;  %v1130_v23 = vld [vmem:[%s4442_s7 + $0x68] sm:$0xff] }
 0x731   :  { %1134 = vmatpush1.msra.mxu0 %v1115_v14  ;;  %v1082_v21 = vpop.permute.xlu1 %1081  ;;  %v1088_v20 = vpop.permute.xlu0 %1087  ;;  %v1131_v14 = vld [vmem:[%s4442_s7 + $0x70] sm:$0xff] }
 0x732   :  { %v1095_v27 = vsel %vm574_vm9, %v1086_v4, %v1088_v20  ;;  %v1107_v29 = vsel %vm587_vm8, %v1088_v20, 0.0  ;;  %v1094_v17 = vsel %vm574_vm9, %v1082_v21, %v1084_v13  ;;  %v1124_v4 = vld [vmem:[%s4442_s7 + $0x38] sm:$0xff]  ;;  %v1129_v13 = vld [vmem:[%s4442_s7 + $0x60] sm:$0xff] }
 0x733   :  { %v1113_v60 = vmul.f32 %v1095_v27, %v3215_v15  ;;  %v1114_v16 = vmul.f32 %v1107_v29, %v3211_v12  ;;  %v1111_v40 = vmul.f32 %v1094_v17, %v3215_v15  ;;  %v1132_v21 = vld [vmem:[%s4442_s7 + $0x78] sm:$0xff] }
 0x735   :  { %v1078_v33 = vpop.permute.xlu1 %1077  ;;  %v1080_v37 = vpop.permute.xlu0 %1079  ;;  %1135 = vmatprep.subr.mxu0 %v1114_v16 }
 0x736   :  { %v1105_v51 = vsel %vm587_vm8, %v1080_v37, 0.0  ;;  %v1093_v31 = vsel %vm574_vm9, %v1078_v33, %v1080_v37  ;;  %1136 = vmatpush1.msra.mxu0 %v1113_v60 }
 0x737   :  { %v1110_v43 = vmul.f32 %v1105_v51, %v3211_v12  ;;  %v1109_v42 = vmul.f32 %v1093_v31, %v3215_v15  ;;  %1137 = vmatprep.subr.mxu0 %v1112_v36 }
 0x738   :  { %1138 = vmatpush1.msra.mxu0 %v1111_v40 }
 0x739   :  { %v1040_v56 = vpop.permute.xlu1 %1039  ;;  %v1038_v49 = vpop.permute.xlu0 %1037  ;;  %1139 = vmatprep.subr.mxu0 %v1110_v43 }
 0x73a   :  { %1140 = vmatpush1.msra.mxu0 %v1109_v42  ;;  %v1059_v55 = vsel %vm181_vm4, 0.0, %v1038_v49 }
 0x73b   :  { %1141 = vmatprep.subr.mxu0 %v1020_v52 }
 0x73c   :  { %1142 = vmatpush1.msra.mxu0 %v1019_v19 }
 0x73d   :  { %v1042_v59 = vpop.permute.xlu0 %1041  ;;  %1143 = vmatprep.subr.mxu0 %v3466_v53  ;;  %v1044_v63 = vpop.permute.xlu1 %1043 }
 0x73e   :  { %1144 = vmatpush1.msra.mxu0 %v3468_v61  ;;  %v1048_v54 = vsel %vm181_vm4, %v1042_v59, %v1044_v63  ;;  %v1060_v53 = vsel %vm181_vm4, 0.0, %v1042_v59  ;;  %v1047_v61 = vsel %vm181_vm4, %v1038_v49, %v1040_v56 }
 0x73f   :  { %1145 = vmatprep.subr.mxu0 %v1016_v44  ;;  %v1119_v44 = vld [vmem:[%s4442_s7 + $0x10] sm:$0xff] }
 0x740   :  { %1146 = vmatpush1.msra.mxu0 %v1015_v25  ;;  %v1120_v25 = vld [vmem:[%s4442_s7 + $0x18] sm:$0xff] }
 0x741   :  { %1147 = vmatprep.subr.mxu0 %v1014_v38  ;;  %v1034_v48 = vpop.permute.xlu0 %1033  ;;  %v1036_v35 = vpop.permute.xlu1 %1035  ;;  %v1122_v38 = vld [vmem:[%s4442_s7 + $0x28] sm:$0xff] }
 0x742   :  { %1148 = vmatpush1.msra.mxu0 %v1013_v3  ;;  %v1058_v50 = vsel %vm181_vm4, 0.0, %v1034_v48  ;;  %v1123_v3 = vld [vmem:[%s4442_s7 + $0x30] sm:$0xff] }
 0x743   :  { %1149 = vmatprep.subr.mxu0 %v3430_v34  ;;  %v1068_v34 = vmul.f32 %v1048_v54, %v3238_v46  ;;  %v1063_v8 = vmul.f32 %v1058_v50, %v3242_v47 }
 0x744   :  { %1150 = vmatpush1.msra.mxu0 %v3436_v24 }
 0x745   :  { %1151 = vmatprep.subr.mxu0 %v3448_v18  ;;  %v1030_v58 = vpop.permute.xlu0 %1029  ;;  %v1032_v24 = vpop.permute.xlu1 %1031  ;;  %v1067_v18 = vmul.f32 %v1060_v53, %v3242_v47 }
 0x746   :  { %1152 = vmatpush1.msra.mxu0 %v3423_v10  ;;  %v1046_v10 = vsel %vm181_vm4, %v1034_v48, %v1036_v35  ;;  %v1045_v52 = vsel %vm181_vm4, %v1030_v58, %v1032_v24 }
 0x747   :  { %1153 = vmatprep.subr.mxu0 %v3438_v28  ;;  %v1066_v28 = vmul.f32 %v1047_v61, %v3238_v46  ;;  %v1064_v57 = vmul.f32 %v1046_v10, %v3238_v46 }
 0x748   :  { %1154 = vmatpush1.msra.mxu0 %v3446_v32  ;;  %v1065_v32 = vmul.f32 %v1059_v55, %v3242_v47 }
 0x749   :  { %1155 = vmatprep.subr.mxu0 %v3458_v45  ;;  %v1057_v45 = vsel %vm181_vm4, 0.0, %v1030_v58 }
 0x74a   :  { %1156 = vmatpush1.msra.mxu0 %v3456_v62  ;;  %v1062_v62 = vmul.f32 %v1045_v52, %v3238_v46  ;;  %v1061_v19 = vmul.f32 %v1057_v45, %v3242_v47 }
 0x74b   :  { %1157 = vmatprep.subr.mxu0 %v1068_v34 }
 0x74c   :  { %1158 = vmatpush1.msra.mxu0 %v1067_v18 }
 0x74d   :  { %1159 = vmatprep.subr.mxu0 %v1066_v28 }
 0x74e   :  { %1160 = vmatpush1.msra.mxu0 %v1065_v32 }
 0x74f   :  { %1161 = vmatprep.subr.mxu0 %v1064_v57 }
 0x750   :  { %1162 = vmatpush1.msra.mxu0 %v1063_v8 }
 0x751   :  { %1163 = vmatprep.subr.mxu0 %v1062_v62 }
 0x752   :  { %1164 = vmatpush1.msra.mxu0 %v1061_v19 }
 0x753   :  { %1198 = vmatmul.mubr.f32.vlgmr.msra.gmra.mxu0 %v1117_v0 }
 0x754   :  { %1203 = vmatprep.mubr.f32.mxu0 %v4450_v1 }
 0x757   :  { %1204 = vmatmul.mubr.f32.gmra.mxu0 %v1118_v2 }
 0x758   :  { %1209 = vmatprep.mubr.f32.mxu0 %v4450_v1 }
 0x75b   :  { %1210 = vmatmul.mubr.f32.gmra.mxu0 %v1119_v44 }
 0x75c   :  { %1215 = vmatprep.mubr.f32.mxu0 %v4450_v1 }
 0x75f   :  { %1216 = vmatmul.mubr.f32.gmra.mxu0 %v1120_v25 }
 0x760   :  { %1221 = vmatprep.mubr.f32.mxu0 %v4450_v1 }
 0x763   :  { %1222 = vmatmul.mubr.f32.gmra.mxu0 %v1121_v22 }
 0x764   :  { %1227 = vmatprep.mubr.f32.mxu0 %v4450_v1 }
 0x767   :  { %1228 = vmatmul.mubr.f32.gmra.mxu0 %v1122_v38 }
 0x768   :  { %1233 = vmatprep.mubr.f32.mxu0 %v4450_v1 }
 0x76b   :  { %1234 = vmatmul.mubr.f32.gmra.mxu0 %v1123_v3 }
 0x76c   :  { %1239 = vmatprep.mubr.f32.mxu0 %v4450_v1 }
 0x76f   :  { %1240 = vmatmul.mubr.f32.gmra.mxu0 %v1124_v4 }
 0x770   :  { %1245 = vmatprep.mubr.f32.mxu0 %v4450_v1 }
 0x773   :  { %1246 = vmatmul.mubr.f32.gmra.mxu0 %v1125_v30 }
 0x774   :  { %1251 = vmatprep.mubr.f32.mxu0 %v4450_v1 }
 0x777   :  { %1252 = vmatmul.mubr.f32.gmra.mxu0 %v1126_v6 }
 0x778   :  { %1257 = vmatprep.mubr.f32.mxu0 %v4450_v1 }
 0x77b   :  { %1258 = vmatmul.mubr.f32.gmra.mxu0 %v1127_v7 }
 0x77c   :  { %1263 = vmatprep.mubr.f32.mxu0 %v4450_v1 }
 0x77f   :  { %1264 = vmatmul.mubr.f32.gmra.mxu0 %v1128_v9 }
 0x780   :  { %1269 = vmatprep.mubr.f32.mxu0 %v4450_v1 }
 0x783   :  { %1270 = vmatmul.mubr.f32.gmra.mxu0 %v1129_v13 }
 0x784   :  { %1275 = vmatprep.mubr.f32.mxu0 %v4450_v1 }
 0x787   :  { %1276 = vmatmul.mubr.f32.gmra.mxu0 %v1130_v23 }
 0x788   :  { %1281 = vmatprep.mubr.f32.mxu0 %v4450_v1 }
 0x78b   :  { %1282 = vmatmul.mubr.f32.gmra.mxu0 %v1131_v14 }
 0x78c   :  { %1287 = vmatprep.mubr.f32.mxu0 %v4450_v1 }
 0x78f   :  { %1288 = vmatmul.mubr.f32.gmra.mxu0 %v1132_v21 }
 0x813   :  { %v3587_v20 = vpop.f32.mrf.mxu0 }
 0x814   :  { %4484 = vst [vmem:[#allocation11_spill] sm:$0xff] %v3587_v20  ;;  %v1378_v33 = vmul.f32 %v3587_v20, %v3587_v20 }
 0x815   :  { %v3589_v26 = vpop.f32.mrf.mxu0 }
 0x816   :  { %4485 = vst [vmem:[#allocation12_spill] sm:$0xff] %v3589_v26  ;;  %v1298_v27 = vsel %vm333_vm7, %v3589_v26, 0.0  ;;  %v1379_v29 = vmul.f32 %v3589_v26, %v3589_v26 }
 0x817   :  { %v3595_v60 = vpop.f32.mrf.mxu0  ;;  %v1299_v16 = vadd.f32 %v1298_v27, %v3587_v20 }
 0x818   :  { %v1410_v17 = vsel %vm333_vm7, %v1379_v29, 0.0  ;;  %v1380_v56 = vmul.f32 %v3595_v60, %v3595_v60 }
 0x819   :  { %1300 = vadd.xlane.f32.xlu1 %v1299_v16  ;;  %v3601_v36 = vpop.f32.mrf.mxu0  ;;  %v1411_v31 = vadd.f32 %v1410_v17, %v1378_v33 }
 0x81a   :  { %v1381_v37 = vmul.f32 %v3601_v36, %v3601_v36  ;;  %v1302_v40 = vsel %vm333_vm7, %v3601_v36, 0.0 }
 0x81b   :  { %v3607_v51 = vpop.f32.mrf.mxu0  ;;  %v1303_v43 = vadd.f32 %v1302_v40, %v3595_v60 }
 0x81c   :  { %4486 = vst [vmem:[#allocation13_spill] sm:$0xff] %v3607_v51  ;;  %v1414_v42 = vsel %vm333_vm7, %v1381_v37, 0.0  ;;  %v1382_v55 = vmul.f32 %v3607_v51, %v3607_v51 }
 0x81d   :  { %1412 = vadd.xlane.f32.xlu1 %v1411_v31  ;;  %1304 = vadd.xlane.f32.xlu0 %v1303_v43  ;;  %v3613_v49 = vpop.f32.mrf.mxu0  ;;  %v1415_v35 = vadd.f32 %v1414_v42, %v1380_v56 }
 0x81e   :  { %4487 = vst [vmem:[#allocation14_spill] sm:$0xff] %v3613_v49  ;;  %v1383_v59 = vmul.f32 %v3613_v49, %v3613_v49  ;;  %v1306_v63 = vsel %vm333_vm7, %v3613_v49, 0.0 }
 0x81f   :  { %v3619_v48 = vpop.f32.mrf.mxu0  ;;  %v1307_v54 = vadd.f32 %v1306_v63, %v3607_v51 }
 0x820   :  { %v1418_v53 = vsel %vm333_vm7, %v1383_v59, 0.0  ;;  %v1384_v52 = vmul.f32 %v3619_v48, %v3619_v48 }
 0x821   :  { %1416 = vadd.xlane.f32.xlu1 %v1415_v35  ;;  %1308 = vadd.xlane.f32.xlu0 %v1307_v54  ;;  %v3623_v61 = vpop.f32.mrf.mxu0  ;;  %v1419_v58 = vadd.f32 %v1418_v53, %v1382_v55 }
 0x822   :  { %v1385_v24 = vmul.f32 %v3623_v61, %v3623_v61  ;;  %v1310_v18 = vsel %vm333_vm7, %v3623_v61, 0.0 }
 0x823   :  { %v3627_v34 = vpop.f32.mrf.mxu0  ;;  %v1311_v50 = vadd.f32 %v1310_v18, %v3619_v48 }
 0x824   :  { %4488 = vst [vmem:[#allocation15_spill] sm:$0xff] %v3627_v34  ;;  %v1422_v32 = vsel %vm333_vm7, %v1385_v24, 0.0  ;;  %v1386_v7 = vmul.f32 %v3627_v34, %v3627_v34 }
 0x825   :  { %1420 = vadd.xlane.f32.xlu0 %v1419_v58  ;;  %v3633_v10 = vpop.f32.mrf.mxu0  ;;  %v1423_v62 = vadd.f32 %v1422_v32, %v1384_v52 }
 0x826   :  { %4489 = vst [vmem:[#allocation16_spill] sm:$0xff] %v3633_v10  ;;  %v1314_v0 = vsel %vm333_vm7, %v3633_v10, 0.0  ;;  %v1387_v2 = vmul.f32 %v3633_v10, %v3633_v10 }
 0x827   :  { %v3635_v28 = vpop.f32.mrf.mxu0  ;;  %v1315_v3 = vadd.f32 %v1314_v0, %v3627_v34 }
 0x828   :  { %v1426_v6 = vsel %vm333_vm7, %v1387_v2, 0.0  ;;  %v1388_v16 = vmul.f32 %v3635_v28, %v3635_v28 }
 0x829   :  { %1312 = vadd.xlane.f32.xlu0 %v1311_v50  ;;  %v3641_v57 = vpop.f32.mrf.mxu0  ;;  %v1427_v27 = vadd.f32 %v1426_v6, %v1386_v7 }
 0x82a   :  { %v1318_v45 = vsel %vm333_vm7, %v3641_v57, 0.0  ;;  %v1389_v4 = vmul.f32 %v3641_v57, %v3641_v57 }
 0x82b   :  { %v3645_v8 = vpop.f32.mrf.mxu0  ;;  %v1319_v19 = vadd.f32 %v1318_v45, %v3635_v28 }
 0x82c   :  { %4490 = vst [vmem:[#allocation17_spill] sm:$0xff] %v3645_v8  ;;  %v1390_v22 = vmul.f32 %v3645_v8, %v3645_v8  ;;  %v1430_v29 = vsel %vm333_vm7, %v1389_v4, 0.0 }
 0x82d   :  { %1424 = vadd.xlane.f32.xlu0 %v1423_v62  ;;  %1320 = vadd.xlane.f32.xlu1 %v1319_v19  ;;  %v3652_v44 = vpop.f32.mrf.mxu0  ;;  %v1431_v43 = vadd.f32 %v1430_v29, %v1388_v16 }
 0x82e   :  { %4491 = vst [vmem:[#allocation18_spill] sm:$0xff] %v3652_v44  ;;  %v1391_v25 = vmul.f32 %v3652_v44, %v3652_v44  ;;  %v1322_v42 = vsel %vm333_vm7, %v3652_v44, 0.0 }
 0x82f   :  { %v3658_v38 = vpop.f32.mrf.mxu0  ;;  %v1323_v54 = vadd.f32 %v1322_v42, %v3645_v8 }
 0x830   :  { %v1434_v30 = vsel %vm333_vm7, %v1391_v25, 0.0  ;;  %v1392_v40 = vmul.f32 %v3658_v38, %v3658_v38 }
 0x831   :  { %1316 = vadd.xlane.f32.xlu0 %v1315_v3  ;;  %v3667_v9 = vpop.f32.mrf.mxu0  ;;  %v1435_v13 = vadd.f32 %v1434_v30, %v1390_v22 }
 0x832   :  { %v1326_v23 = vsel %vm333_vm7, %v3667_v9, 0.0  ;;  %v1393_v14 = vmul.f32 %v3667_v9, %v3667_v9 }
 0x833   :  { %1436 = vadd.xlane.f32.xlu1 %v1435_v13  ;;  %v3673_v21 = vpop.f32.mrf.mxu0  ;;  %v1327_v33 = vadd.f32 %v1326_v23, %v3658_v38 }
 0x834   :  { %4492 = vst [vmem:[#allocation19_spill] sm:$0xff] %v3673_v21  ;;  %v1438_v37 = vsel %vm333_vm7, %v1393_v14, 0.0 }
 0x835   :  { %1428 = vadd.xlane.f32.xlu0 %v1427_v27  ;;  %v3678_v17 = vpop.f32.mrf.mxu0  ;;  %v1439_v59 = vadd.f32 %v1438_v37, %v1392_v40 }
 0x836   :  { %4493 = vst [vmem:[#allocation20_spill] sm:$0xff] %v3678_v17  ;;  %v1330_v63 = vsel %vm333_vm7, %v3678_v17, 0.0 }
 0x837   :  { %1328 = vadd.xlane.f32.xlu1 %v1327_v33  ;;  %v3684_v31 = vpop.f32.mrf.mxu0  ;;  %v1331_v55 = vadd.f32 %v1330_v63, %v3673_v21 }
 0x838   :  { %v1396_v2 = vmul.f32 %v3684_v31, %v3684_v31 }
 0x839   :  { %1432 = vadd.xlane.f32.xlu0 %v1431_v43  ;;  %v3688_v56 = vpop.f32.mrf.mxu0 }
 0x83a   :  { %v1334_v58 = vsel %vm333_vm7, %v3688_v56, 0.0  ;;  %v1397_v24 = vmul.f32 %v3688_v56, %v3688_v56 }
 0x83b   :  { %1440 = vadd.xlane.f32.xlu1 %v1439_v59  ;;  %v3692_v35 = vpop.f32.mrf.mxu0  ;;  %v1335_v45 = vadd.f32 %v1334_v58, %v3684_v31 }
 0x83c   :  { %v1446_v0 = vsel %vm333_vm7, %v1397_v24, 0.0  ;;  %v1398_v13 = vmul.f32 %v3692_v35, %v3692_v35 }
 0x83d   :  { %1324 = vadd.xlane.f32.xlu0 %v1323_v54  ;;  %v3695_v53 = vpop.f32.mrf.mxu0  ;;  %v1447_v30 = vadd.f32 %v1446_v0, %v1396_v2 }
 0x83e   :  { %v1338_v18 = vsel %vm333_vm7, %v3695_v53, 0.0  ;;  %v1399_v62 = vmul.f32 %v3695_v53, %v3695_v53 }
 0x83f   :  { %1332 = vadd.xlane.f32.xlu1 %v1331_v55  ;;  %v3704_v50 = vpop.f32.mrf.mxu0  ;;  %v1339_v32 = vadd.f32 %v1338_v18, %v3692_v35 }
 0x840   :  { %v1400_v25 = vmul.f32 %v3704_v50, %v3704_v50  ;;  %v1450_v7 = vsel %vm333_vm7, %v1399_v62, 0.0 }
 0x841   :  { %1340 = vadd.xlane.f32.xlu0 %v1339_v32  ;;  %v3707_v52 = vpop.f32.mrf.mxu0  ;;  %v1451_v27 = vadd.f32 %v1450_v7, %v1398_v13 }
 0x842   :  { %v1401_v19 = vmul.f32 %v3707_v52, %v3707_v52  ;;  %v1342_v29 = vsel %vm333_vm7, %v3707_v52, 0.0 }
 0x843   :  { %1336 = vadd.xlane.f32.xlu1 %v1335_v45  ;;  %v3719_v22 = vpop.f32.mrf.mxu0  ;;  %v1343_v43 = vadd.f32 %v1342_v29, %v3704_v50  ;;  %v1394_v29 = vmul.f32 %v3673_v21, %v3673_v21 }
 0x844   :  { %v1454_v3 = vsel %vm333_vm7, %v1401_v19, 0.0  ;;  %v1395_v19 = vmul.f32 %v3678_v17, %v3678_v17 }
 0x845   :  { %v3722_v4 = vpop.f32.mrf.mxu0  ;;  %v1455_v6 = vadd.f32 %v1454_v3, %v1400_v25 }
 0x846   :  { %v1346_v0 = vsel %vm333_vm7, %v3722_v4, 0.0  ;;  %v1403_v7 = vmul.f32 %v3722_v4, %v3722_v4  ;;  %v1442_v13 = vsel %vm333_vm7, %v1395_v19, 0.0 }
 0x847   :  { %1448 = vadd.xlane.f32.xlu1 %v1447_v30  ;;  %1456 = vadd.xlane.f32.xlu0 %v1455_v6  ;;  %v3727_v23 = vpop.f32.mrf.mxu0  ;;  %v1347_v6 = vadd.f32 %v1346_v0, %v3719_v22 }
 0x849   :  { %v3729_v14 = vpop.f32.mrf.mxu0 }
 0x84a   :  { %v1350_v16 = vsel %vm333_vm7, %v3729_v14, 0.0  ;;  %v1405_v2 = vmul.f32 %v3729_v14, %v3729_v14 }
 0x84b   :  { %1452 = vadd.xlane.f32.xlu1 %v1451_v27  ;;  %v3735_v33 = vpop.f32.mrf.mxu0  ;;  %v1351_v37 = vadd.f32 %v1350_v16, %v3727_v23  ;;  %v1404_v16 = vmul.f32 %v3727_v23, %v3727_v23 }
 0x84c   :  { %4494 = vst [vmem:[#allocation21_spill] sm:$0xff] %v3735_v33  ;;  %v1406_v58 = vmul.f32 %v3735_v33, %v3735_v33  ;;  %v1462_v27 = vsel %vm333_vm7, %v1405_v2, 0.0 }
 0x84d   :  { %1352 = vadd.xlane.f32.xlu0 %v1351_v37  ;;  %v3738_v40 = vpop.f32.mrf.mxu0  ;;  %v1443_v37 = vadd.f32 %v1442_v13, %v1394_v29 }
 0x84e   :  { %4495 = vst [vmem:[#allocation22_spill] sm:$0xff] %v3738_v40  ;;  %v1354_v42 = vsel %vm333_vm7, %v3738_v40, 0.0  ;;  %v1407_v59 = vmul.f32 %v3738_v40, %v3738_v40 }
 0x84f   :  { %1344 = vadd.xlane.f32.xlu1 %v1343_v43  ;;  %v3745_v63 = vpop.f32.mrf.mxu0  ;;  %v1355_v54 = vadd.f32 %v1354_v42, %v3735_v33  ;;  %v1463_v43 = vadd.f32 %v1462_v27, %v1404_v16  ;;  %v1458_v42 = vsel %vm333_vm7, %v1403_v7, 0.0 }
 0x850   :  { %v1466_v55 = vsel %vm333_vm7, %v1407_v59, 0.0  ;;  %v1408_v3 = vmul.f32 %v3745_v63, %v3745_v63  ;;  %v1402_v59 = vmul.f32 %v3719_v22, %v3719_v22 }
 0x851   :  { %1356 = vadd.xlane.f32.xlu0 %v1355_v54  ;;  %v3751_v24 = vpop.f32.mrf.mxu0  ;;  %v1467_v45 = vadd.f32 %v1466_v55, %v1406_v58 }
 0x852   :  { %v1358_v18 = vsel %vm333_vm7, %v3751_v24, 0.0  ;;  %v1409_v32 = vmul.f32 %v3751_v24, %v3751_v24  ;;  %v1459_v54 = vadd.f32 %v1458_v42, %v1402_v59 }
 0x853   :  { %v1359_v62 = vadd.f32 %v1358_v18, %v3745_v63 }
 0x854   :  { %v1470_v25 = vsel %vm333_vm7, %v1409_v32, 0.0 }
 0x855   :  { %1468 = vadd.xlane.f32.xlu0 %v1467_v45  ;;  %1360 = vadd.xlane.f32.xlu1 %v1359_v62  ;;  %v1471_v30 = vadd.f32 %v1470_v25, %v1408_v3 }
 0x859   :  { %1472 = vadd.xlane.f32.xlu0 %v1471_v30  ;;  %1348 = vadd.xlane.f32.xlu1 %v1347_v6 }
 0x85d   :  { %1444 = vadd.xlane.f32.xlu0 %v1443_v37  ;;  %1464 = vadd.xlane.f32.xlu1 %v1463_v43 }
 0x861   :  { %1460 = vadd.xlane.f32.xlu0 %v1459_v54 }
 0x8a2   :  { %v1301_v58 = vpop.xlane.xlu1 %1300 }
 0x8a3   :  { %v1362_v44 = vmul.f32 0.005, %v1301_v58 }
 0x8a6   :  { %v1305_v55 = vpop.xlane.xlu0 %1304  ;;  %v3779_v32 = vpop.xlane.xlu1 %1412 }
 0x8a7   :  { %v1363_v10 = vmul.f32 0.005, %v1305_v55 }
 0x8aa   :  { %v1309_v18 = vpop.xlane.xlu0 %1308  ;;  %v3781_v19 = vpop.xlane.xlu1 %1416 }
 0x8ab   :  { %v1364_v5 = vmul.f32 0.005, %v1309_v18 }
 0x8ae   :  { %v1421_v45 = vpop.xlane.xlu0 %1420 }
 0x8af   :  { %v1476_v47 = vmul.f32 0.005, %v1421_v45 }
 0x8b2   :  { %v1313_v62 = vpop.xlane.xlu0 %1312 }
 0x8b3   :  { %v1365_v49 = vmul.f32 0.005, %v1313_v62 }
 0x8b6   :  { %v1425_v0 = vpop.xlane.xlu0 %1424  ;;  %v1321_v2 = vpop.xlane.xlu1 %1320 }
 0x8b7   :  { %v1367_v20 = vmul.f32 0.005, %v1321_v2 }
 0x8ba   :  { %v1317_v25 = vpop.xlane.xlu0 %1316 }
 0x8bc   :  { %v1437_v3 = vpop.xlane.xlu1 %1436 }
 0x8bd   :  { %v1480_v41 = vmul.f32 0.005, %v1437_v3 }
 0x8be   :  { %v3783_v30 = vpop.xlane.xlu0 %1428 }
 0x8bf   :  { %v1496_v26 = vadd.f32 %v1480_v41, %v1476_v47 }
 0x8c0   :  { %v1329_v6 = vpop.xlane.xlu1 %1328 }
 0x8c1   :  { %v1369_v15 = vmul.f32 0.005, %v1329_v6 }
 0x8c2   :  { %v1433_v7 = vpop.xlane.xlu0 %1432 }
 0x8c3   :  { %v1493_v21 = vadd.f32 %v1369_v15, %v1365_v49  ;;  %v1479_v15 = vmul.f32 0.005, %v1433_v7 }
 0x8c4   :  { %v1441_v13 = vpop.xlane.xlu1 %1440 }
 0x8c5   :  { %v1481_v34 = vmul.f32 0.005, %v1441_v13 }
 0x8c6   :  { %v1325_v27 = vpop.xlane.xlu0 %1324 }
 0x8c7   :  { %v1368_v54 = vmul.f32 0.005, %v1325_v27  ;;  %v1366_v27 = vmul.f32 0.005, %v1317_v25 }
 0x8c8   :  { %v1333_v29 = vpop.xlane.xlu1 %1332 }
 0x8c9   :  { %v1492_v12 = vadd.f32 %v1368_v54, %v1364_v5  ;;  %v1490_v41 = vadd.f32 %v1366_v27, %v1362_v44  ;;  %v1370_v47 = vmul.f32 0.005, %v1333_v29 }
 0x8ca   :  { %v1341_v37 = vpop.xlane.xlu0 %1340 }
 0x8cb   :  { %v1372_v11 = vmul.f32 0.005, %v1341_v37  ;;  %v1477_v37 = vmul.f32 0.005, %v1425_v0  ;;  %v1498_v44 = vadd.f32 %v1490_v41, %v1370_v47 }
 0x8cc   :  { %v1337_v16 = vpop.xlane.xlu1 %1336 }
 0x8cd   :  { %v1500_v33 = vadd.f32 %v1492_v12, %v1372_v11  ;;  %v1371_v3 = vmul.f32 0.005, %v1337_v16  ;;  %v1491_v12 = vadd.f32 %v1367_v20, %v1363_v10  ;;  %v1475_v20 = vmul.f32 0.005, %v3781_v19 }
 0x8ce   :  { %v1478_v10 = vmul.f32 0.005, %v3783_v30 }
 0x8cf   :  { %v1499_v49 = vadd.f32 %v1491_v12, %v1371_v3  ;;  %v1495_v13 = vadd.f32 %v1479_v15, %v1475_v20 }
 0x8d0   :  { %v1449_v43 = vpop.xlane.xlu1 %1448  ;;  %v1457_v42 = vpop.xlane.xlu0 %1456 }
 0x8d1   :  { %v1485_v17 = vmul.f32 0.005, %v1457_v42 }
 0x8d4   :  { %v1453_v59 = vpop.xlane.xlu1 %1452 }
 0x8d5   :  { %v1484_v46 = vmul.f32 0.005, %v1453_v59 }
 0x8d6   :  { %v1353_v1 = vpop.xlane.xlu0 %1352 }
 0x8d7   :  { %v1504_v6 = vadd.f32 %v1496_v26, %v1484_v46  ;;  %v1375_v58 = vmul.f32 0.005, %v1353_v1 }
 0x8d8   :  { %v1345_v39 = vpop.xlane.xlu1 %1344 }
 0x8d9   :  { %v1373_v40 = vmul.f32 0.005, %v1345_v39  ;;  %v1507_v1 = vadd.f32 %v1499_v49, %v1375_v58 }
 0x8da   :  { %v1357_v51 = vpop.xlane.xlu0 %1356 }
 0x8db   :  { %v1376_v8 = vmul.f32 0.005, %v1357_v51  ;;  %v1501_v59 = vadd.f32 %v1493_v21, %v1373_v40  ;;  %v1497_v51 = vadd.f32 %v1481_v34, %v1477_v37  ;;  %v1483_v34 = vmul.f32 0.005, %v1449_v43 }
 0x8dd   :  { %v1508_v18 = vadd.f32 %v1500_v33, %v1376_v8  ;;  %v1505_v8 = vadd.f32 %v1497_v51, %v1485_v17  ;;  %v1474_v17 = vmul.f32 0.005, %v3779_v32 }
 0x8de   :  { %v1469_v5 = vpop.xlane.xlu0 %1468  ;;  %v1361_v45 = vpop.xlane.xlu1 %1360 }
 0x8df   :  { %v3785_v54 = vmul.f32 0.25, %v1508_v18  ;;  %v1488_v11 = vmul.f32 0.005, %v1469_v5  ;;  %v1377_v39 = vmul.f32 0.005, %v1361_v45  ;;  %v1515_v5 = vmul.f32 0.25, %v1507_v1 }
 0x8e0   :  { %v1494_v43 = vadd.f32 %v1478_v10, %v1474_v17  ;;  %v1295_v1 = vld [vmem:[%s4443_s8 + $0x8] sm:$0xff] }
 0x8e1   :  { %v1512_v55 = vadd.f32 %v1504_v6, %v1488_v11  ;;  %v1509_v62 = vadd.f32 %v1501_v59, %v1377_v39  ;;  %v1524_v46 = vmul.f32 %v3785_v54, %v3785_v54  ;;  %v1503_v6 = vadd.f32 %v1495_v13, %v1483_v34 }
 0x8e2   :  { %v1473_v26 = vpop.xlane.xlu0 %1472  ;;  %v1349_v33 = vpop.xlane.xlu1 %1348  ;;  %v1523_v51 = vmul.f32 %v1515_v5, %v1515_v5  ;;  %v4496_v13 = vmov 1  }
 0x8e3   :  { %v1520_v21 = vmul.f32 0.25, %v1512_v55  ;;  %v1517_v40 = vmul.f32 0.25, %v1509_v62  ;;  %v1489_v0 = vmul.f32 0.005, %v1473_v26  ;;  %v1374_v2 = vmul.f32 0.005, %v1349_v33 }
 0x8e5   :  { %v1528_v25 = vsub.f32 %v1520_v21, %v1524_v46  ;;  %v1513_v7 = vadd.f32 %v1505_v8, %v1489_v0  ;;  %v1525_v29 = vmul.f32 %v1517_v40, %v1517_v40  ;;  %v1506_v37 = vadd.f32 %v1498_v44, %v1374_v2  ;;  %v1296_v46 = vld [vmem:[%s4443_s8 + $0x10] sm:$0xff]  ;;  %v1297_v21 = vld [vmem:[%s4443_s8 + $0x18] sm:$0xff] }
 0x8e6   :  { %v1445_v16 = vpop.xlane.xlu0 %1444  ;;  %v1465_v42 = vpop.xlane.xlu1 %1464 }
 0x8e7   :  { %v1532_v27 = vadd.f32 0.8, %v1528_v25  ;;  %v1521_v18 = vmul.f32 0.25, %v1513_v7  ;;  %v1482_v3 = vmul.f32 0.005, %v1445_v16  ;;  %v1514_v39 = vmul.f32 0.25, %v1506_v37 }
 0x8e8   :  { %v1487_v19 = vmul.f32 0.005, %v1465_v42  ;;  %v1294_v25 = vld [vmem:[%s4443_s8] sm:$0xff] }
 0x8e9   :  { %2862 = vrsqrt.f32 %v1532_v27  ;;  %v1529_v45 = vsub.f32 %v1521_v18, %v1525_v29  ;;  %v1502_v12 = vadd.f32 %v1494_v43, %v1482_v3  ;;  %v1522_v55 = vmul.f32 %v1514_v39, %v1514_v39 }
 0x8ea   :  { %v1511_v30 = vadd.f32 %v1503_v6, %v1487_v19  ;;  %v1461_v59 = vpop.xlane.xlu0 %1460 }
 0x8eb   :  { %v1533_v11 = vadd.f32 0.8, %v1529_v45  ;;  %v1486_v32 = vmul.f32 0.005, %v1461_v59 }
 0x8ec   :  { %v1519_v58 = vmul.f32 0.25, %v1511_v30 }
 0x8ed   :  { %2864 = vrsqrt.f32 %v1533_v11  ;;  %v1510_v41 = vadd.f32 %v1502_v12, %v1486_v32 }
 0x8ee   :  { %v1527_v47 = vsub.f32 %v1519_v58, %v1523_v51 }
 0x8ef   :  { %v1518_v62 = vmul.f32 0.25, %v1510_v41 }
 0x8f0   :  { %v1531_v15 = vadd.f32 0.8, %v1527_v47 }
 0x8f1   :  { %v1526_v49 = vsub.f32 %v1518_v62, %v1522_v55 }
 0x8f2   :  { %2866 = vrsqrt.f32 %v1531_v15 }
 0x8f3   :  { %v1530_v8 = vadd.f32 0.8, %v1526_v49 }
 0x8f5   :  { %2868 = vrsqrt.f32 %v1530_v8  ;;  %v4498_v8 = vld [vmem:[#allocation20_spill] sm:$0xff] }
 0x8f6   :  { %v2863_v26 = vpop.eup %2862 }
 0x8f7   :  { %v1540_v33 = vmul.f32 %v2863_v26, %v1296_v46 }
 0x8f9   :  { %v1544_v0 = vmul.f32 %v1540_v33, %v3785_v54 }
 0x8fa   :  { %v2865_v2 = vpop.eup %2864 }
 0x8fb   :  { %1554 = vrot.lane.b32.xlu0 %v1544_v0, %s2901_s22  ;;  %v1541_v20 = vmul.f32 %v2865_v2, %v1297_v21 }
 0x8fd   :  { %v1545_v34 = vmul.f32 %v1541_v20, %v1517_v40 }
 0x8ff   :  { %v2867_v10 = vpop.eup %2866  ;;  %1583 = vperm.xlu0 %2804, %v1541_v20   ;;  %1556 = vrot.lane.b32.xlu1 %v1545_v34, %s2901_s22  ;;  %v4501_v20 = vld [vmem:[#allocation15_spill] sm:$0xff]  ;;  %v4502_v34 = vld [vmem:[#allocation12_spill] sm:$0xff] }
 0x900   :  { %v1539_v44 = vmul.f32 %v2867_v10, %v1295_v1 }
 0x902   :  { %v2869_v7 = vpop.eup %2868  ;;  %v1543_v54 = vmul.f32 %v1539_v44, %v1515_v5  ;;  %v4497_v5 = vmov 0  }
 0x903   :  { %1573 = vperm.xlu0 %2804, %v1539_v44   ;;  %v1538_v17 = vmul.f32 %v2869_v7, %v1294_v25 }
 0x904   :  { %1552 = vrot.lane.b32.xlu1 %v1543_v54, %s2901_s22  ;;  %v4505_v54 = vld [vmem:[#allocation17_spill] sm:$0xff] }
 0x905   :  { %v1542_v40 = vmul.f32 %v1538_v17, %v1514_v39 }
 0x907   :  { %1568 = vperm.xlu0 %2804, %v1538_v17  }
 0x908   :  { %1550 = vrot.lane.b32.xlu1 %v1542_v40, %s2901_s22 }
 0x90b   :  { %2807 = vset.pattern.permute.xlu0 %v4496_v13 }
 0x90c   :  { %1578 = vperm.xlu1 %2805, %v1540_v33  }
 0x910   :  { %2806 = vset.pattern.permute.xlu1 %v4496_v13 }
 0x96d   :  { %v1555_v29 = vpop.permute.xlu0 %1554 }
 0x96e   :  { %v1564_v16 = vsub.f32 %v1296_v46, %v1555_v29  ;;  %v4499_v46 = vld [vmem:[#allocation19_spill] sm:$0xff]  ;;  %v4506_v29 = vld [vmem:[#allocation22_spill] sm:$0xff] }
 0x970   :  { %1630 = vperm.xlu1 %2806, %v1564_v16  }
 0x971   :  { %v1557_v42 = vpop.permute.xlu1 %1556 }
 0x972   :  { %v1565_v27 = vsub.f32 %v1297_v21, %v1557_v42  ;;  %v4500_v21 = vld [vmem:[#allocation16_spill] sm:$0xff]  ;;  %v4507_v42 = vld [vmem:[#allocation21_spill] sm:$0xff] }
 0x974   :  { %1635 = vperm.xlu1 %2806, %v1565_v27  }
 0x976   :  { %v1553_v18 = vpop.permute.xlu1 %1552 }
 0x977   :  { %v1563_v37 = vsub.f32 %v1295_v1, %v1553_v18 }
 0x979   :  { %1625 = vperm.xlu1 %2806, %v1563_v37  }
 0x97a   :  { %v1551_v3 = vpop.permute.xlu1 %1550  ;;  %v1584_v19 = vpop.permute.xlu0 %1583 }
 0x97b   :  { %v1562_v6 = vsub.f32 %v1294_v25, %v1551_v3  ;;  %v1609_v59 = vmul.f32 %v1584_v19, %v3707_v52  ;;  %v1608_v11 = vmul.f32 %v1584_v19, %v3704_v50  ;;  %v1601_v12 = vmul.f32 %v1584_v19, %v3667_v9  ;;  %v4504_v25 = vld [vmem:[#allocation18_spill] sm:$0xff] }
 0x97c   :  { %v1600_v32 = vmul.f32 %v1584_v19, %v3658_v38  ;;  %v3820_v51 = vmul.f32 %v1584_v19, %v3623_v61  ;;  %v3824_v41 = vmul.f32 %v1584_v19, %v3619_v48  ;;  %v3827_v47 = vmul.f32 %v1584_v19, %v3745_v63  ;;  %v4508_v3 = vld [vmem:[#allocation14_spill] sm:$0xff] }
 0x97d   :  { %1620 = vperm.xlu0 %2807, %v1562_v6   ;;  %2808 = vset.pattern.permute.xlu1 %v4497_v5  ;;  %v3830_v52 = vmul.f32 %v1584_v19, %v3751_v24  ;;  %v4509_v5 = vld [vmem:[#allocation13_spill] sm:$0xff] }
 0x97e   :  { %v1574_v45 = vpop.permute.xlu0 %1573 }
 0x97f   :  { %v1605_v9 = vmul.f32 %v1574_v45, %v3688_v56  ;;  %v1604_v38 = vmul.f32 %v1574_v45, %v3684_v31  ;;  %v1613_v61 = vmul.f32 %v1574_v45, %v3729_v14  ;;  %v1597_v63 = vmul.f32 %v1574_v45, %v3641_v57 }
 0x980   :  { %v1596_v24 = vmul.f32 %v1574_v45, %v3635_v28  ;;  %v3845_v56 = vmul.f32 %v1574_v45, %v3601_v36  ;;  %v3848_v31 = vmul.f32 %v1574_v45, %v3595_v60  ;;  %v4503_v60 = vld [vmem:[#allocation11_spill] sm:$0xff] }
 0x982   :  { %v1569_v50 = vpop.permute.xlu0 %1568 }
 0x983   :  { %v1611_v14 = vmul.f32 %v1569_v50, %v3722_v4  ;;  %v1610_v49 = vmul.f32 %v1569_v50, %v3719_v22  ;;  %v1602_v57 = vmul.f32 %v1569_v50, %v4499_v46  ;;  %v1595_v0 = vmul.f32 %v1569_v50, %v4500_v21 }
 0x984   :  { %v1594_v36 = vmul.f32 %v1569_v50, %v4501_v20  ;;  %v3857_v1 = vmul.f32 %v1569_v50, %v4502_v34  ;;  %v3860_v10 = vmul.f32 %v1569_v50, %v4503_v60 }
 0x987   :  { %v1579_v43 = vpop.permute.xlu1 %1578 }
 0x988   :  { %v1607_v39 = vmul.f32 %v1579_v43, %v3695_v53  ;;  %v1606_v58 = vmul.f32 %v1579_v43, %v3692_v35  ;;  %v1612_v35 = vmul.f32 %v1574_v45, %v3727_v23  ;;  %v1603_v23 = vmul.f32 %v1569_v50, %v4498_v8 }
 0x989   :  { %v1599_v7 = vmul.f32 %v1579_v43, %v4504_v25  ;;  %v1598_v17 = vmul.f32 %v1579_v43, %v4505_v54  ;;  %v1615_v16 = vmul.f32 %v1579_v43, %v4506_v29  ;;  %v1614_v27 = vmul.f32 %v1579_v43, %v4507_v42 }
 0x98a   :  { %v1591_v6 = vmul.f32 %v1579_v43, %v4508_v3  ;;  %v3875_v19 = vmul.f32 %v1579_v43, %v4509_v5 }
 0x9eb   :  { %v3812_v30 = vpop.permute.xlu1 %1630 }
 0x9ec   :  { %v1659_v53 = vadd.f32 %v3812_v30, %v1607_v39  ;;  %v1658_v48 = vadd.f32 %v3812_v30, %v1606_v58  ;;  %v3871_v37 = vadd.f32 %v3812_v30, %v1599_v7  ;;  %v1643_v7 = vadd.f32 %v3812_v30, %v1591_v6 }
 0x9ee   :  { %v1691_v33 = vmul.f32 0.2, %v1659_v53  ;;  %v1690_v2 = vmul.f32 0.2, %v1658_v48 }
 0x9ef   :  { %v3836_v55 = vpop.permute.xlu1 %1635 }
 0x9f0   :  { %v1661_v62 = vadd.f32 %v3836_v55, %v1609_v59  ;;  %v1660_v15 = vadd.f32 %v3836_v55, %v1608_v11  ;;  %v1723_v18 = vmax.f32 %v1659_v53, %v1691_v33  ;;  %v1722_v45 = vmax.f32 %v1658_v48, %v1690_v2 }
 0x9f1   :  { %v1653_v39 = vadd.f32 %v3836_v55, %v1601_v12  ;;  %v1652_v50 = vadd.f32 %v3836_v55, %v1600_v32  ;;  %v1683_v32 = vmul.f32 0.2, %v3871_v37  ;;  %v1666_v33 = vadd.f32 %v3812_v30, %v1614_v27 }
 0x9f2   :  { %v1693_v26 = vmul.f32 0.2, %v1661_v62  ;;  %v1692_v28 = vmul.f32 0.2, %v1660_v15  ;;  %v1668_v42 = vadd.f32 %v3836_v55, %v3827_v47 }
 0x9f3   :  { %v1715_v27 = vmax.f32 %v3871_v37, %v1683_v32 }
 0x9f4   :  { %v3862_v4 = vpop.permute.xlu1 %1625  ;;  %v1725_v22 = vmax.f32 %v1661_v62, %v1693_v26  ;;  %v1724_v44 = vmax.f32 %v1660_v15, %v1692_v28  ;;  %v1685_v28 = vmul.f32 0.2, %v1653_v39 }
 0x9f5   :  { %v1657_v40 = vadd.f32 %v3862_v4, %v1605_v9  ;;  %v1656_v13 = vadd.f32 %v3862_v4, %v1604_v38  ;;  %v1665_v53 = vadd.f32 %v3862_v4, %v1613_v61  ;;  %v1650_v9 = vadd.f32 %v3812_v30, %v1598_v17 }
 0x9f6   :  { %1836 = vmatprep.subr.mxu1 %v1725_v22  ;;  %v1667_v38 = vadd.f32 %v3812_v30, %v1615_v16  ;;  %v1664_v46 = vadd.f32 %v3862_v4, %v1612_v35  ;;  %v1684_v35 = vmul.f32 0.2, %v1652_v50  ;;  %v1717_v54 = vmax.f32 %v1653_v39, %v1685_v28  ;;  %v1831_v28 = vld [vmem:[%s4444_s9 + $0x8] sm:$0xff] }
 0x9f7   :  { %1837 = vmatpush1.msra.mxu1 %v1724_v44  ;;  %v1689_v59 = vmul.f32 0.2, %v1657_v40  ;;  %v1688_v11 = vmul.f32 0.2, %v1656_v13  ;;  %v1697_v20 = vmul.f32 0.2, %v1665_v53  ;;  %v1644_v16 = vadd.f32 %v3836_v55, %v3824_v41  ;;  %2621 = vmatprep.mubr.msk.f32.mxu1 %vm1832_vm11, %v1831_v28 }
 0x9f8   :  { %v3878_v58 = vpop.permute.xlu0 %1620  ;;  %1838 = vmatprep.subr.mxu1 %v1723_v18  ;;  %v1696_v22 = vmul.f32 0.2, %v1664_v46  ;;  %v1699_v25 = vmul.f32 0.2, %v1667_v38  ;;  %v1698_v18 = vmul.f32 0.2, %v1666_v33  ;;  %v1642_v41 = vadd.f32 %v3812_v30, %v3875_v19 }
 0x9f9   :  { %1839 = vmatpush1.msra.mxu1 %v1722_v45  ;;  %v1721_v43 = vmax.f32 %v1657_v40, %v1689_v59  ;;  %v1720_v62 = vmax.f32 %v1656_v13, %v1688_v11  ;;  %v1663_v48 = vadd.f32 %v3878_v58, %v1611_v14  ;;  %v1662_v15 = vadd.f32 %v3878_v58, %v1610_v49 }
 0x9fa   :  { %v1655_v12 = vadd.f32 %v3878_v58, %v1603_v23  ;;  %v1654_v8 = vadd.f32 %v3878_v58, %v1602_v57  ;;  %v1649_v14 = vadd.f32 %v3862_v4, %v1597_v63  ;;  %v1648_v49 = vadd.f32 %v3862_v4, %v1596_v24 }
 0x9fb   :  { %1840 = vmatprep.subr.mxu1 %v1721_v43  ;;  %v1695_v61 = vmul.f32 0.2, %v1663_v48  ;;  %v1694_v26 = vmul.f32 0.2, %v1662_v15  ;;  %v1647_v44 = vadd.f32 %v3878_v58, %v1595_v0  ;;  %v1682_v63 = vmul.f32 0.2, %v1650_v9 }
 0x9fc   :  { %1841 = vmatpush1.msra.mxu1 %v1720_v62  ;;  %v1687_v21 = vmul.f32 0.2, %v1655_v12  ;;  %v1686_v2 = vmul.f32 0.2, %v1654_v8  ;;  %v1646_v24 = vadd.f32 %v3878_v58, %v1594_v36  ;;  %v1681_v17 = vmul.f32 0.2, %v1649_v14 }
 0x9fd   :  { %v3893_v23 = vmax.f32 %v1663_v48, %v1695_v61  ;;  %v3895_v57 = vmax.f32 %v1662_v15, %v1694_v26  ;;  %v1680_v40 = vmul.f32 0.2, %v1648_v49  ;;  %v1645_v13 = vadd.f32 %v3836_v55, %v3820_v51 }
 0x9fe   :  { %v1719_v34 = vmax.f32 %v1655_v12, %v1687_v21  ;;  %v1718_v60 = vmax.f32 %v1654_v8, %v1686_v2  ;;  %v1716_v0 = vmax.f32 %v1652_v50, %v1684_v35  ;;  %v3906_v29 = vmax.f32 %v1665_v53, %v1697_v20 }
 0x9ff   :  { %1744 = vrot.lane.b32.xlu1 %v3893_v23, %s2901_s22  ;;  %1742 = vrot.lane.b32.xlu0 %v3895_v57, %s2901_s22  ;;  %v3912_v36 = vmax.f32 %v1664_v46, %v1696_v22  ;;  %v1679_v3 = vmul.f32 0.2, %v1647_v44  ;;  %v1714_v51 = vmax.f32 %v1650_v9, %v1682_v63  ;;  %v3917_v6 = vmax.f32 %v1667_v38, %v1699_v25 }
 0xa00   :  { %1842 = vmatprep.subr.mxu1 %v1719_v34  ;;  %v1678_v5 = vmul.f32 0.2, %v1646_v24  ;;  %v1713_v47 = vmax.f32 %v1649_v14, %v1681_v17  ;;  %v1712_v45 = vmax.f32 %v1648_v49, %v1680_v40  ;;  %v1677_v37 = vmul.f32 0.2, %v1645_v13  ;;  %v4511_v40 = vld [vmem:[#allocation10_spill] sm:$0xff] }
 0xa01   :  { %1843 = vmatpush1.msra.mxu1 %v1718_v60  ;;  %v1641_v59 = vadd.f32 %v3862_v4, %v3845_v56  ;;  %v1676_v11 = vmul.f32 0.2, %v1644_v16  ;;  %v1700_v39 = vmul.f32 0.2, %v1668_v42  ;;  %v1640_v50 = vadd.f32 %v3862_v4, %v3848_v31 }
 0xa02   :  { %1844 = vmatprep.subr.mxu1 %v1717_v54  ;;  %v1669_v53 = vadd.f32 %v3836_v55, %v3830_v52  ;;  %v3929_v30 = vmax.f32 %v1666_v33, %v1698_v18  ;;  %v1711_v19 = vmax.f32 %v1647_v44, %v1679_v3  ;;  %v1675_v9 = vmul.f32 0.2, %v1643_v7 }
 0xa03   :  { %1845 = vmatpush1.msra.mxu1 %v1716_v0  ;;  %1748 = vrot.lane.b32.xlu1 %v3906_v29, %s2901_s22  ;;  %v1639_v38 = vadd.f32 %v3878_v58, %v3857_v1  ;;  %v1710_v56 = vmax.f32 %v1646_v24, %v1678_v5  ;;  %v1674_v43 = vmul.f32 0.2, %v1642_v41  ;;  %v1638_v31 = vadd.f32 %v3878_v58, %v3860_v10 }
 0xa04   :  { %1746 = vrot.lane.b32.xlu0 %v3912_v36, %s2901_s22  ;;  %1846 = vmatprep.subr.mxu1 %v1715_v27  ;;  %v1709_v52 = vmax.f32 %v1645_v13, %v1677_v37  ;;  %v1673_v55 = vmul.f32 0.2, %v1641_v59  ;;  %v1708_v4 = vmax.f32 %v1644_v16, %v1676_v11  ;;  %v3939_v62 = vmax.f32 %v1668_v42, %v1700_v39 }
 0xa05   :  { %1847 = vmatpush1.msra.mxu1 %v1714_v51  ;;  %v1672_v1 = vmul.f32 0.2, %v1640_v50  ;;  %v1701_v48 = vmul.f32 0.2, %v1669_v53  ;;  %v1707_v15 = vmax.f32 %v1643_v7, %v1675_v9  ;;  %v1671_v12 = vmul.f32 0.2, %v1639_v38 }
 0xa06   :  { %1848 = vmatprep.subr.mxu1 %v1713_v47  ;;  %v1706_v10 = vmax.f32 %v1642_v41, %v1674_v43  ;;  %v1670_v58 = vmul.f32 0.2, %v1638_v31  ;;  %v1705_v8 = vmax.f32 %v1641_v59, %v1673_v55  ;;  %v4510_v7 = vld [vmem:[#allocation9_spill] sm:$0xff] }
 0xa07   :  { %1849 = vmatpush1.msra.mxu1 %v1712_v45  ;;  %1752 = vrot.lane.b32.xlu1 %v3917_v6, %s2901_s22  ;;  %v1704_v46 = vmax.f32 %v1640_v50, %v1672_v1  ;;  %v3944_v32 = vmax.f32 %v1669_v53, %v1701_v48  ;;  %v1703_v61 = vmax.f32 %v1639_v38, %v1671_v12  ;;  %v4512_v50 = vld [vmem:[#allocation7_spill] sm:$0xff]  ;;  %v4513_v38 = vld [vmem:[#allocation8_spill] sm:$0xff] }
 0xa08   :  { %1750 = vrot.lane.b32.xlu0 %v3929_v30, %s2901_s22  ;;  %1850 = vmatprep.subr.mxu1 %v1711_v19  ;;  %v1702_v26 = vmax.f32 %v1638_v31, %v1670_v58 }
 0xa09   :  { %1851 = vmatpush1.msra.mxu1 %v1710_v56 }
 0xa0a   :  { %1852 = vmatprep.subr.mxu1 %v1709_v52 }
 0xa0b   :  { %1853 = vmatpush1.msra.mxu1 %v1708_v4  ;;  %1754 = vrot.lane.b32.xlu1 %v3939_v62, %s2901_s22 }
 0xa0c   :  { %1800 = vrot.lane.b32.xlu0 %v1707_v15, %s2902_s23  ;;  %1854 = vmatprep.subr.mxu1 %v1707_v15 }
 0xa0d   :  { %1855 = vmatpush1.msra.mxu1 %v1706_v10 }
 0xa0e   :  { %1856 = vmatprep.subr.mxu1 %v1705_v8 }
 0xa0f   :  { %1857 = vmatpush1.msra.mxu1 %v1704_v46  ;;  %1756 = vrot.lane.b32.xlu1 %v3944_v32, %s2901_s22 }
 0xa10   :  { %1804 = vrot.lane.b32.xlu0 %v1709_v52, %s2902_s23  ;;  %1858 = vmatprep.subr.mxu1 %v1703_v61 }
 0xa11   :  { %1859 = vmatpush1.msra.mxu1 %v1702_v26 }
 0xa13   :  { %1798 = vrot.lane.b32.xlu1 %v1706_v10, %s2902_s23 }
 0xa14   :  { %1796 = vrot.lane.b32.xlu0 %v1705_v8, %s2902_s23 }
 0xa17   :  { %1802 = vrot.lane.b32.xlu1 %v1708_v4, %s2902_s23 }
 0xa18   :  { %1792 = vrot.lane.b32.xlu0 %v1703_v61, %s2902_s23 }
 0xa1b   :  { %1794 = vrot.lane.b32.xlu1 %v1704_v46, %s2902_s23  ;;  %v1830_v46 = vld [vmem:[%s4444_s9] sm:$0xff]  ;;  %s2905_s9 = smov 28  }
 0xa1f   :  { %1790 = vrot.lane.b32.xlu1 %v1702_v26, %s2902_s23 }
 0xa71   :  { %v1743_v33 = vpop.permute.xlu0 %1742  ;;  %v1745_v21 = vpop.permute.xlu1 %1744 }
 0xa72   :  { %v1758_v27 = vsel %vm181_vm4, %v1743_v33, %v1745_v21  ;;  %v1770_v51 = vsel %vm181_vm4, 0.0, %v1743_v33 }
 0xa73   :  { %v1775_v45 = vmul.f32 %v1758_v27, %v4510_v7  ;;  %v1774_v59 = vmul.f32 %v1770_v51, %v4511_v40 }
 0xa75   :  { %v1749_v2 = vpop.permute.xlu1 %1748 }
 0xa76   :  { %v1747_v14 = vpop.permute.xlu0 %1746 }
 0xa77   :  { %v1759_v17 = vsel %vm181_vm4, %v1747_v14, %v1749_v2  ;;  %v1771_v0 = vsel %vm181_vm4, 0.0, %v1747_v14 }
 0xa78   :  { %v1777_v5 = vmul.f32 %v1759_v17, %v4510_v7  ;;  %v1776_v41 = vmul.f32 %v1771_v0, %v4511_v40 }
 0xa79   :  { %v1753_v49 = vpop.permute.xlu1 %1752 }
 0xa7a   :  { %v1751_v35 = vpop.permute.xlu0 %1750 }
 0xa7b   :  { %v1760_v44 = vsel %vm181_vm4, %v1751_v35, %v1753_v49  ;;  %v1772_v24 = vsel %vm181_vm4, 0.0, %v1751_v35 }
 0xa7c   :  { %v1779_v16 = vmul.f32 %v1760_v44, %v4510_v7  ;;  %v1778_v18 = vmul.f32 %v1772_v24, %v4511_v40 }
 0xa7d   :  { %v1755_v20 = vpop.permute.xlu1 %1754 }
 0xa7e   :  { %v1801_v34 = vpop.permute.xlu0 %1800  ;;  %v1773_v60 = vsel %vm181_vm4, 0.0, %v1755_v20 }
 0xa7f   :  { %v1780_v13 = vmul.f32 %v1773_v60, %v4511_v40  ;;  %v1820_v11 = vsel %vm587_vm8, %v1801_v34, 0.0 }
 0xa80   :  { %v1827_v31 = vmul.f32 %v1820_v11, %v4512_v50 }
 0xa81   :  { %v1757_v22 = vpop.permute.xlu1 %1756 }
 0xa82   :  { %v1805_v63 = vpop.permute.xlu0 %1804  ;;  %v1761_v25 = vsel %vm181_vm4, %v1755_v20, %v1757_v22  ;;  %vm2008_vm4 = vcmask 1046528  }
 0xa83   :  { %v1781_v54 = vmul.f32 %v1761_v25, %v4510_v7  ;;  %v1821_v47 = vsel %vm587_vm8, %v1805_v63, 0.0 }
 0xa84   :  { %v1829_v53 = vmul.f32 %v1821_v47, %v4512_v50 }
 0xa85   :  { %1860 = vmatprep.subr.mxu1 %v1781_v54  ;;  %v1799_v42 = vpop.permute.xlu1 %1798 }
 0xa86   :  { %v1797_v3 = vpop.permute.xlu0 %1796  ;;  %1861 = vmatpush1.msra.mxu1 %v1780_v13  ;;  %v1808_v19 = vsel %vm574_vm9, %v1799_v42, %v1801_v34 }
 0xa87   :  { %1862 = vmatprep.subr.mxu1 %v1779_v16  ;;  %v1819_v43 = vsel %vm587_vm8, %v1797_v3, 0.0  ;;  %v1826_v55 = vmul.f32 %v1808_v19, %v4513_v38 }
 0xa88   :  { %1863 = vmatpush1.msra.mxu1 %v1778_v18  ;;  %v1825_v48 = vmul.f32 %v1819_v43, %v4512_v50  ;;  %v4514_v43 = vld [vmem:[#allocation5_spill] sm:$0xff] }
 0xa89   :  { %1864 = vmatprep.subr.mxu1 %v1777_v5  ;;  %v1803_v37 = vpop.permute.xlu1 %1802 }
 0xa8a   :  { %v1809_v39 = vsel %vm574_vm9, %v1803_v37, %v1805_v63  ;;  %1865 = vmatpush1.msra.mxu1 %v1776_v41  ;;  %v1793_v9 = vpop.permute.xlu0 %1792 }
 0xa8b   :  { %v1828_v56 = vmul.f32 %v1809_v39, %v4513_v38  ;;  %1866 = vmatprep.subr.mxu1 %v1775_v45  ;;  %v1818_v4 = vsel %vm587_vm8, %v1793_v9, 0.0  ;;  %vm2076_vm8 = vcmask 949248  }
 0xa8c   :  { %1867 = vmatpush1.msra.mxu1 %v1774_v59  ;;  %v1823_v12 = vmul.f32 %v1818_v4, %v4512_v50  ;;  %v2904_v50 = vmov 1966171168  }
 0xa8d   :  { %1884 = vmatprep.subr.mxu1 %v1829_v53  ;;  %v1795_v52 = vpop.permute.xlu1 %1794  ;;  %v1974_v53 = vunpack.c.l.s4 %v2904_v50  ;;  %v2195_v50 = vld [vmem:[%s4446_s11 + $0xb0] sm:$0xff] }
 0xa8e   :  { %v1807_v1 = vsel %vm574_vm9, %v1795_v52, %v1797_v3  ;;  %1885 = vmatpush2.msra.mxu1 %v1828_v56 }
 0xa8f   :  { %v1824_v15 = vmul.f32 %v1807_v1, %v4513_v38  ;;  %1886 = vmatprep.subr.mxu1 %v1827_v31  ;;  %v1975_v19 = vunpack.c.0.s8 %v1974_v53  ;;  %v2179_v53 = vld [vmem:[%s4446_s11 + $0x30] sm:$0xff] }
 0xa90   :  { %1887 = vmatpush2.msra.mxu1 %v1826_v55  ;;  %v4515_v55 = vld [vmem:[#allocation6_spill] sm:$0xff] }
 0xa91   :  { %1888 = vmatprep.subr.mxu1 %v1825_v48  ;;  %v1791_v10 = vpop.permute.xlu1 %1790  ;;  %v1978_v31 = vsub.s32 %v1975_v19, %v4514_v43  ;;  %v2194_v19 = vld [vmem:[%s4446_s11 + $0xa8] sm:$0xff]  ;;  %v2177_v43 = vld [vmem:[%s4446_s11 + $0x20] sm:$0xff] }
 0xa92   :  { %v1806_v58 = vsel %vm574_vm9, %v1791_v10, %v1793_v9  ;;  %1889 = vmatpush2.msra.mxu1 %v1824_v15  ;;  %v1907_v9 = vld [vmem:[%s4445_s10] sm:$0x1]  ;;  %s2911_s10 = smov 60   ;;  %vm2080_vm9 = vcmask 490496  }
 0xa93   :  { %v1822_v8 = vmul.f32 %v1806_v58, %v4513_v38  ;;  %1890 = vmatprep.subr.mxu1 %v1823_v12 }
 0xa95   :  { %1891 = vmatpush2.msra.mxu1 %v1822_v8 }
 0xa96   :  { %1892 = vmatprep.subr.mxu1 %v3944_v32 }
 0xa97   :  { %1893 = vmatpush2.msra.mxu1 %v3939_v62 }
 0xa98   :  { %1894 = vmatprep.subr.mxu1 %v3917_v6 }
 0xa99   :  { %1895 = vmatpush2.msra.mxu1 %v3929_v30 }
 0xa9a   :  { %1896 = vmatprep.subr.mxu1 %v3906_v29 }
 0xa9b   :  { %1897 = vmatpush2.msra.mxu1 %v3912_v36 }
 0xa9c   :  { %1898 = vmatprep.subr.mxu1 %v3893_v23 }
 0xa9d   :  { %1899 = vmatpush2.msra.mxu1 %v3895_v57 }
 0xa9e   :  { %1901 = vmatmul.mubr.f32.vlgmr.msra.gmra.mxu1 %v1830_v46 }
 0xb5e   :  { %v4001_v32 = vpop.f32.mrf.mxu1 }
 0xb5f   :  { %v1913_v36 = vmul.f32 %v4001_v32, %v4001_v32 }
 0xb60   :  { %v4003_v62 = vpop.f32.mrf.mxu1 }
 0xb61   :  { %v1908_v6 = vsel %vm333_vm7, %v4003_v62, 0.0  ;;  %v1914_v29 = vmul.f32 %v4003_v62, %v4003_v62 }
 0xb62   :  { %v1909_v30 = vadd.f32 %v1908_v6, %v4001_v32 }
 0xb63   :  { %v1915_v23 = vsel %vm333_vm7, %v1914_v29, 0.0 }
 0xb64   :  { %1910 = vadd.xlane.f32.xlu0 %v1909_v30  ;;  %v1916_v57 = vadd.f32 %v1915_v23, %v1913_v36 }
 0xb66   :  { %1917 = vadd.xlane.f32.xlu1 %v1916_v57 }
 0xbed   :  { %v1911_v61 = vpop.xlane.xlu0 %1910 }
 0xbee   :  { %v1912_v26 = vmul.f32 0.005, %v1911_v61 }
 0xbef   :  { %v1918_v28 = vpop.xlane.xlu1 %1917 }
 0xbf0   :  { %v1919_v33 = vmul.f32 0.005, %v1918_v28  ;;  %v1921_v21 = vrot.slane %v1912_v26, 1  ;;  %v1928_v49 = vrot.slane %v1912_v26, 2  ;;  %v1934_v60 = vrot.slane %v1912_v26, 3 }
 0xbf1   :  { %v1940_v25 = vrot.slane %v1912_v26, 4  ;;  %v1946_v17 = vrot.slane %v1912_v26, 5  ;;  %v1952_v16 = vrot.slane %v1912_v26, 6  ;;  %v1958_v3 = vrot.slane %v1912_v26, 7 }
 0xbf2   :  { %v1925_v2 = vrot.slane %v1919_v33, 1  ;;  %v1923_v14 = vadd.f32 %v1921_v21, %v1912_v26  ;;  %v1931_v34 = vrot.slane %v1919_v33, 2  ;;  %v1937_v63 = vrot.slane %v1919_v33, 3 }
 0xbf3   :  { %v1943_v54 = vrot.slane %v1919_v33, 4  ;;  %v1949_v0 = vrot.slane %v1919_v33, 5  ;;  %v1955_v18 = vrot.slane %v1919_v33, 6  ;;  %v1961_v41 = vrot.slane %v1919_v33, 7 }
 0xbf4   :  { %v1927_v35 = vadd.f32 %v1925_v2, %v1919_v33  ;;  %v1930_v20 = vadd.f32 %v1928_v49, %v1923_v14  ;;  %v2236_v2 = vld [vmem:[%s4446_s11 + $0x1f8] sm:$0xff] }
 0xbf5   :  { %v2220_v14 = vld [vmem:[%s4446_s11 + $0x178] sm:$0xff]  ;;  %2666 = vmatprep.subr.mxu0 %v2236_v2 }
 0xbf6   :  { %v1933_v22 = vadd.f32 %v1931_v34, %v1927_v35  ;;  %v1936_v44 = vadd.f32 %v1934_v60, %v1930_v20  ;;  %v2204_v49 = vld [vmem:[%s4446_s11 + $0xf8] sm:$0xff]  ;;  %v2235_v20 = vld [vmem:[%s4446_s11 + $0x1f0] sm:$0xff]  ;;  %2667 = vmatpush3.msra.mxu0 %v2220_v14 }
 0xbf7   :  { %2631 = vmatprep.subr.mxu1 %v2204_v49  ;;  %v2188_v35 = vld [vmem:[%s4446_s11 + $0x78] sm:$0xff]  ;;  %v2203_v34 = vld [vmem:[%s4446_s11 + $0xf0] sm:$0xff]  ;;  %2668 = vmatprep.subr.mxu0 %v2235_v20 }
 0xbf8   :  { %v1939_v24 = vadd.f32 %v1937_v63, %v1933_v22  ;;  %v1942_v7 = vadd.f32 %v1940_v25, %v1936_v44  ;;  %2632 = vmatpush3.msra.mxu1 %v2188_v35  ;;  %v2219_v60 = vld [vmem:[%s4446_s11 + $0x170] sm:$0xff]  ;;  %v2202_v44 = vld [vmem:[%s4446_s11 + $0xe8] sm:$0xff] }
 0xbf9   :  { %v2187_v22 = vld [vmem:[%s4446_s11 + $0x70] sm:$0xff]  ;;  %2633 = vmatprep.subr.mxu1 %v2203_v34  ;;  %v2186_v63 = vld [vmem:[%s4446_s11 + $0x68] sm:$0xff]  ;;  %2669 = vmatpush3.msra.mxu0 %v2219_v60 }
 0xbfa   :  { %v1945_v40 = vadd.f32 %v1943_v54, %v1939_v24  ;;  %v1948_v13 = vadd.f32 %v1946_v17, %v1942_v7  ;;  %v2234_v25 = vld [vmem:[%s4446_s11 + $0x1e8] sm:$0xff]  ;;  %2634 = vmatpush3.msra.mxu1 %v2187_v22  ;;  %v2201_v24 = vld [vmem:[%s4446_s11 + $0xe0] sm:$0xff]  ;;  %v2211_v49 = vld [vmem:[%s4446_s11 + $0x130] sm:$0xff] }
 0xbfb   :  { %v2218_v7 = vld [vmem:[%s4446_s11 + $0x168] sm:$0xff]  ;;  %2635 = vmatprep.subr.mxu1 %v2202_v44  ;;  %2670 = vmatprep.subr.mxu0 %v2234_v25  ;;  %v2185_v54 = vld [vmem:[%s4446_s11 + $0x60] sm:$0xff] }
 0xbfc   :  { %v1951_v42 = vadd.f32 %v1949_v0, %v1945_v40  ;;  %v1954_v27 = vadd.f32 %v1952_v16, %v1948_v13  ;;  %v2233_v17 = vld [vmem:[%s4446_s11 + $0x1e0] sm:$0xff]  ;;  %2636 = vmatpush3.msra.mxu1 %v2186_v63  ;;  %2671 = vmatpush3.msra.mxu0 %v2218_v7  ;;  %v2200_v40 = vld [vmem:[%s4446_s11 + $0xd8] sm:$0xff]  ;;  %v2226_v60 = vld [vmem:[%s4446_s11 + $0x1a8] sm:$0xff] }
 0xbfd   :  { %v2217_v13 = vld [vmem:[%s4446_s11 + $0x160] sm:$0xff]  ;;  %2637 = vmatprep.subr.mxu1 %v2201_v24  ;;  %v2184_v0 = vld [vmem:[%s4446_s11 + $0x58] sm:$0xff]  ;;  %2672 = vmatprep.subr.mxu0 %v2233_v17  ;;  %v2210_v22 = vld [vmem:[%s4446_s11 + $0x128] sm:$0xff] }
 0xbfe   :  { %v1957_v51 = vadd.f32 %v1955_v18, %v1951_v42  ;;  %v1960_v5 = vadd.f32 %v1958_v3, %v1954_v27  ;;  %v2232_v16 = vld [vmem:[%s4446_s11 + $0x1d8] sm:$0xff]  ;;  %2638 = vmatpush3.msra.mxu1 %v2185_v54  ;;  %v2199_v42 = vld [vmem:[%s4446_s11 + $0xd0] sm:$0xff]  ;;  %2673 = vmatpush3.msra.mxu0 %v2217_v13  ;;  %v2225_v44 = vld [vmem:[%s4446_s11 + $0x1a0] sm:$0xff] }
 0xbff   :  { %v2216_v27 = vld [vmem:[%s4446_s11 + $0x158] sm:$0xff]  ;;  %2639 = vmatprep.subr.mxu1 %v2200_v40  ;;  %v2183_v18 = vld [vmem:[%s4446_s11 + $0x50] sm:$0xff]  ;;  %2674 = vmatprep.subr.mxu0 %v2232_v16  ;;  %v2209_v7 = vld [vmem:[%s4446_s11 + $0x120] sm:$0xff] }
 0xc00   :  { %v1963_v47 = vadd.f32 %v1961_v41, %v1957_v51  ;;  %v1964_v45 = vmul.f32 0.125, %v1960_v5  ;;  %v2231_v3 = vld [vmem:[%s4446_s11 + $0x1d0] sm:$0xff]  ;;  %2640 = vmatpush3.msra.mxu1 %v2184_v0  ;;  %v2198_v51 = vld [vmem:[%s4446_s11 + $0xc8] sm:$0xff]  ;;  %2675 = vmatpush3.msra.mxu0 %v2216_v27  ;;  %v2224_v54 = vld [vmem:[%s4446_s11 + $0x198] sm:$0xff] }
 0xc01   :  { %v2215_v5 = vld [vmem:[%s4446_s11 + $0x150] sm:$0xff]  ;;  %2641 = vmatprep.subr.mxu1 %v2199_v42  ;;  %v2182_v41 = vld [vmem:[%s4446_s11 + $0x48] sm:$0xff]  ;;  %2676 = vmatprep.subr.mxu0 %v2231_v3  ;;  %v2208_v40 = vld [vmem:[%s4446_s11 + $0x118] sm:$0xff] }
 0xc02   :  { %v1965_v37 = vmul.f32 0.125, %v1963_v47  ;;  %v1966_v59 = vmul.f32 %v1964_v45, %v1964_v45  ;;  %v2230_v47 = vld [vmem:[%s4446_s11 + $0x1c8] sm:$0xff]  ;;  %2642 = vmatpush3.msra.mxu1 %v2183_v18  ;;  %2677 = vmatpush3.msra.mxu0 %v2215_v5  ;;  %v2223_v13 = vld [vmem:[%s4446_s11 + $0x190] sm:$0xff]  ;;  %v2221_v3 = vld [vmem:[%s4446_s11 + $0x180] sm:$0xff] }
 0xc03   :  { %2643 = vmatprep.subr.mxu1 %v2198_v51  ;;  %2678 = vmatprep.subr.mxu0 %v2230_v47  ;;  %v2207_v42 = vld [vmem:[%s4446_s11 + $0x110] sm:$0xff]  ;;  %v2222_v27 = vld [vmem:[%s4446_s11 + $0x188] sm:$0xff]  ;;  %v2205_v47 = vld [vmem:[%s4446_s11 + $0x100] sm:$0xff] }
 0xc04   :  { %v1967_v11 = vsub.f32 %v1965_v37, %v1966_v59  ;;  %v2214_v37 = vld [vmem:[%s4446_s11 + $0x148] sm:$0xff]  ;;  %v2181_v59 = vld [vmem:[%s4446_s11 + $0x40] sm:$0xff]  ;;  %2644 = vmatpush3.msra.mxu1 %v2182_v41 }
 0xc05   :  { %2679 = vmatpush3.msra.mxu0 %v2214_v37  ;;  %v2206_v18 = vld [vmem:[%s4446_s11 + $0x108] sm:$0xff]  ;;  %v4516_v37 = vmov 0.0  }
 0xc06   :  { %v1968_v39 = vadd.f32 0.8, %v1967_v11  ;;  %v2196_v11 = vld [vmem:[%s4446_s11 + $0xb8] sm:$0xff] }
 0xc08   :  { %2870 = vrsqrt.f32 %v1968_v39  ;;  %v2180_v39 = vld [vmem:[%s4446_s11 + $0x38] sm:$0xff] }
 0xc15   :  { %v2871_v38 = vpop.eup %2870 }
 0xc16   :  { %v1970_v56 = vmul.f32 %v2871_v38, %v1907_v9  ;;  %v2193_v38 = vld [vmem:[%s4446_s11 + $0xa0] sm:$0xff] }
 0xc18   :  { %v1971_v52 = vmul.f32 %v1970_v56, %v1964_v45  ;;  %v1995_v4 = vrot.slane %v1970_v56, %v4515_v55  ;;  %v2197_v45 = vld [vmem:[%s4446_s11 + $0xc0] sm:$0xff] }
 0xc19   :  { %2645 = vmatprep.subr.mxu1 %v2197_v45 }
 0xc1a   :  { %v1979_v1 = vrot.slane %v1971_v52, %v1978_v31  ;;  %v1998_v48 = vsel %vm1997_vm12, %v1970_v56, %v1995_v4  ;;  %2646 = vmatpush3.msra.mxu1 %v2181_v59 }
 0xc1b   :  { %v1999_v15 = vsel %vm63_vm0, %v1998_v48, %v1995_v4  ;;  %2647 = vmatprep.subr.mxu1 %v2196_v11  ;;  %v2176_v48 = vld [vmem:[%s4446_s11 + $0x18] sm:$0xff] }
 0xc1c   :  { %v1986_v12 = vrot.slane %v1979_v1, %v1978_v31  ;;  %v2001_v10 = vsel %vm2000_vm13, %v1999_v15, %v1995_v4  ;;  %2648 = vmatpush3.msra.mxu1 %v2180_v39  ;;  %v2192_v31 = vld [vmem:[%s4446_s11 + $0x98] sm:$0xff]  ;;  %v2229_v15 = vld [vmem:[%s4446_s11 + $0x1c0] sm:$0xff] }
 0xc1d   :  { %v2003_v58 = vsel %vm2002_vm14, %v2001_v10, %v1995_v4  ;;  %2649 = vmatprep.subr.mxu1 %v2195_v50  ;;  %2680 = vmatprep.subr.mxu0 %v2229_v15 }
 0xc1e   :  { %1987 = vrot.lane.b32.xlu0 %v1986_v12, %s2901_s22  ;;  %v2005_v8 = vsel %vm2004_vm15, %v2003_v58, %v1995_v4  ;;  %2650 = vmatpush3.msra.mxu1 %v2179_v53  ;;  %v2191_v12 = vld [vmem:[%s4446_s11 + $0x90] sm:$0xff] }
 0xc1f   :  { %v2007_v46 = vsel %vm2006_vm2, %v2005_v8, %v1995_v4  ;;  %2651 = vmatprep.subr.mxu1 %v2194_v19  ;;  %v2190_v8 = vld [vmem:[%s4446_s11 + $0x88] sm:$0xff] }
 0xc20   :  { %v2009_v6 = vsel %vm2008_vm4, %v2007_v46, %v1995_v4  ;;  %v2174_v46 = vld [vmem:[%s4446_s11 + $0x8] sm:$0xff] }
 0xc21   :  { %2025 = vperm.xlu1 %2808, %v2009_v6   ;;  %v2228_v6 = vld [vmem:[%s4446_s11 + $0x1b8] sm:$0xff] }
 0xc90   :  { %v1988_v29 = vpop.permute.xlu0 %1987 }
 0xc91   :  { %v1990_v36 = vsub.f32 %v1907_v9, %v1988_v29  ;;  %v2178_v9 = vld [vmem:[%s4446_s11 + $0x28] sm:$0xff] }
 0xc92   :  { %2652 = vmatpush3.msra.mxu1 %v2178_v9 }
 0xc93   :  { %v2014_v30 = vrot.slane %v1990_v36, %v4515_v55  ;;  %2653 = vmatprep.subr.mxu1 %v2193_v38 }
 0xc94   :  { %2654 = vmatpush3.msra.mxu1 %v2177_v43 }
 0xc95   :  { %v2016_v23 = vsel %vm1997_vm12, %v1990_v36, %v2014_v30  ;;  %2655 = vmatprep.subr.mxu1 %v2192_v31 }
 0xc96   :  { %v2017_v57 = vsel %vm63_vm0, %v2016_v23, %v2014_v30  ;;  %2656 = vmatpush3.msra.mxu1 %v2176_v48  ;;  %v2212_v23 = vld [vmem:[%s4446_s11 + $0x138] sm:$0xff]  ;;  %vm2087_vm0 = vcmask 228352  }
 0xc97   :  { %v2018_v61 = vsel %vm2000_vm13, %v2017_v57, %v2014_v30  ;;  %2657 = vmatprep.subr.mxu1 %v2191_v12 }
 0xc98   :  { %v2019_v26 = vsel %vm2002_vm14, %v2018_v61, %v2014_v30 }
 0xc99   :  { %v2020_v28 = vsel %vm2004_vm15, %v2019_v26, %v2014_v30  ;;  %v2173_v26 = vld [vmem:[%s4446_s11] sm:$0xff] }
 0xc9a   :  { %v2021_v33 = vsel %vm2006_vm2, %v2020_v28, %v2014_v30  ;;  %v2268_v28 = vld [vmem:[%s4446_s11 + $0x2f8] sm:$0xff] }
 0xc9b   :  { %v2022_v21 = vsel %vm2008_vm4, %v2021_v33, %v2014_v30  ;;  %v2189_v30 = vld [vmem:[%s4446_s11 + $0x80] sm:$0xff]  ;;  %v2227_v33 = vld [vmem:[%s4446_s11 + $0x1b0] sm:$0xff] }
 0xc9c   :  { %2032 = vperm.xlu0 %2807, %v2022_v21   ;;  %v2026_v56 = vpop.permute.xlu1 %2025 }
 0xc9d   :  { %v2028_v52 = vmul.f32 %v2026_v56, %v4001_v32  ;;  %v2029_v4 = vmul.f32 %v2026_v56, %v4003_v62  ;;  %v2213_v32 = vld [vmem:[%s4446_s11 + $0x140] sm:$0xff]  ;;  %v2175_v62 = vld [vmem:[%s4446_s11 + $0x10] sm:$0xff] }
 0xc9e   :  { %2681 = vmatpush3.msra.mxu0 %v2213_v32  ;;  %2658 = vmatpush3.msra.mxu1 %v2175_v62 }
 0xc9f   :  { %2682 = vmatprep.subr.mxu0 %v2228_v6  ;;  %2659 = vmatprep.subr.mxu1 %v2190_v8  ;;  %v2252_v6 = vld [vmem:[%s4446_s11 + $0x278] sm:$0xff] }
 0xca0   :  { %2683 = vmatpush3.msra.mxu0 %v2212_v23  ;;  %2660 = vmatpush3.msra.mxu1 %v2174_v46  ;;  %v2251_v23 = vld [vmem:[%s4446_s11 + $0x270] sm:$0xff] }
 0xca1   :  { %2661 = vmatprep.subr.mxu1 %v2189_v30  ;;  %2684 = vmatprep.subr.mxu0 %v2227_v33  ;;  %v2267_v30 = vld [vmem:[%s4446_s11 + $0x2f0] sm:$0xff] }
 0xca2   :  { %2662 = vmatpush3.msra.mxu1 %v2173_v26  ;;  %2685 = vmatpush3.msra.mxu0 %v2211_v49  ;;  %v2265_v49 = vld [vmem:[%s4446_s11 + $0x2e0] sm:$0xff] }
 0xca3   :  { %2701 = vmatprep.subr.mxu1 %v2268_v28  ;;  %2686 = vmatprep.subr.mxu0 %v2226_v60 }
 0xca4   :  { %2687 = vmatpush3.msra.mxu0 %v2210_v22 }
 0xca5   :  { %2688 = vmatprep.subr.mxu0 %v2225_v44 }
 0xca6   :  { %2689 = vmatpush3.msra.mxu0 %v2209_v7  ;;  %v2247_v7 = vld [vmem:[%s4446_s11 + $0x250] sm:$0xff] }
 0xca7   :  { %2690 = vmatprep.subr.mxu0 %v2224_v54 }
 0xca8   :  { %2691 = vmatpush3.msra.mxu0 %v2208_v40 }
 0xca9   :  { %2692 = vmatprep.subr.mxu0 %v2223_v13 }
 0xcaa   :  { %2693 = vmatpush3.msra.mxu0 %v2207_v42 }
 0xcab   :  { %2694 = vmatprep.subr.mxu0 %v2222_v27 }
 0xcac   :  { %2695 = vmatpush3.msra.mxu0 %v2206_v18 }
 0xcad   :  { %2696 = vmatprep.subr.mxu0 %v2221_v3  ;;  %v2261_v3 = vld [vmem:[%s4446_s11 + $0x2c0] sm:$0xff] }
 0xcae   :  { %2697 = vmatpush3.msra.mxu0 %v2205_v47 }
 0xcaf   :  { %2758 = vmatprep.subr.mxu0 %v4516_v37 }
 0xd17   :  { %v2033_v1 = vpop.permute.xlu0 %2032 }
 0xd18   :  { %v2035_v10 = vadd.f32 %v2033_v1, %v2028_v52  ;;  %v2036_v58 = vadd.f32 %v2033_v1, %v2029_v4 }
 0xd1a   :  { %v2037_v29 = vmul.f32 0.2, %v2035_v10  ;;  %v2038_v36 = vmul.f32 0.2, %v2036_v58 }
 0xd1c   :  { %v4181_v57 = vmax.f32 %v2035_v10, %v2037_v29  ;;  %v4183_v61 = vmax.f32 %v2036_v58, %v2038_v36 }
 0xd1e   :  { %v2809_v21 = vpack.i.bf16 %v4183_v61, %v4181_v57  ;;  %v2046_v2 = vrot.slane %v4181_v57, 2  ;;  %v2093_v14 = vrot.slane %v4183_v61, 2  ;;  %v2050_v20 = vrot.slane %v4181_v57, 3 }
 0xd1f   :  { %v2101_v34 = vrot.slane %v4183_v61, 3  ;;  %v2042_v63 = vrot.slane %v4181_v57, 1  ;;  %v2054_v25 = vrot.slane %v4181_v57, 4  ;;  %v2109_v24 = vrot.slane %v4183_v61, 4 }
 0xd20   :  { %2810 = vrot.lane.b32.xlu0 %v2809_v21, %s2905_s9  ;;  %v2814_v35 = vpack.i.bf16 %v2093_v14, %v2046_v2  ;;  %v2058_v16 = vrot.slane %v4181_v57, 5  ;;  %v2062_v5 = vrot.slane %v4181_v57, 6  ;;  %v2066_v41 = vrot.slane %v4181_v57, 7  ;;  %s2909_s9 = smov 88  }
 0xd21   :  { %v2824_v17 = vpack.i.bf16 %v2050_v20, %v2101_v34  ;;  %v2819_v0 = vpack.i.bf16 %v2109_v24, %v2054_v25  ;;  %v2132_v45 = vrot.slane %v4183_v61, 7  ;;  %v2116_v11 = vrot.slane %v4183_v61, 5  ;;  %v2264_v34 = vld [vmem:[%s4446_s11 + $0x2d8] sm:$0xff]  ;;  %v2263_v24 = vld [vmem:[%s4446_s11 + $0x2d0] sm:$0xff] }
 0xd22   :  { %2815 = vrot.lane.b32.xlu1 %v2814_v35, %s2903_s2  ;;  %v2829_v51 = vpack.i.bf16 %v2054_v25, %v2058_v16  ;;  %v2834_v59 = vpack.i.bf16 %v2062_v5, %v2066_v41  ;;  %v2839_v39 = vpack.i.bf16 %v2062_v5, %v2058_v16  ;;  %v2124_v50 = vrot.slane %v4183_v61, 6  ;;  %v2249_v35 = vld [vmem:[%s4446_s11 + $0x260] sm:$0xff]  ;;  %v2246_v16 = vld [vmem:[%s4446_s11 + $0x248] sm:$0xff] }
 0xd23   :  { %v2090_v4 = vrot.slane %v4183_v61, 1  ;;  %v2266_v61 = vld [vmem:[%s4446_s11 + $0x2e8] sm:$0xff] }
 0xd24   :  { %2047 = vrot.lane.b32.xlu0 %v2046_v2, %s2906_s21  ;;  %v2250_v2 = vld [vmem:[%s4446_s11 + $0x268] sm:$0xff] }
 0xd26   :  { %2043 = vrot.lane.b32.xlu1 %v2042_v63, %s2903_s2 }
 0xd28   :  { %2825 = vrot.lane.b32.xlu0 %v2824_v17, %s2906_s21 }
 0xd2a   :  { %2820 = vrot.lane.b32.xlu1 %v2819_v0, %s2907_s16  ;;  %v2262_v0 = vld [vmem:[%s4446_s11 + $0x2c8] sm:$0xff] }
 0xd2c   :  { %2051 = vrot.lane.b32.xlu0 %v2050_v20, %s2907_s16  ;;  %s2912_s16 = smov [#allocation2]  }
 0xd2d   :  { %s2602_s17 = sshll.u32 %s2912_s16, 4  ;;  %s2603_s17 = int_to_ptr.vmem [resolvable:$true] %s2602_s17 }
 0xd2e   :  { %2830 = vrot.lane.b32.xlu1 %v2829_v51, %s2908_s0  ;;  %s2874_s18 = scalar_lea.vmem %s2603_s17, 32  ;;  %p2879_p1 = scmp.lt.s32.totalorder %s2603_s17, %s2603_s17 }
 0xd2f   :  { %p2875_p0 = scmp.ne.s32.totalorder %s2603_s17, %s2874_s18  ;;  %p2880_p2 = scmp.lt.s32.totalorder %s2874_s18, %s2874_s18 }
 0xd30   :  { %2135 = vrot.lane.b32.xlu0 %v2132_v45, %s2909_s9  ;;  %v2260_v45 = vld [vmem:[%s4446_s11 + $0x2b8] sm:$0xff] }
 0xd31   :  { %p2881_p3 = por %p2880_p2, %p2879_p1 }
 0xd32   :  { %2835 = vrot.lane.b32.xlu1 %v2834_v59, %s2909_s9 }
 0xd33   :  { %p2882_p4 = pnand %p2881_p3, %p2875_p0 }
 0xd34   :  { %2119 = vrot.lane.b32.xlu0 %v2116_v11, %s2908_s0 }
 0xd36   :  { %2840 = vrot.lane.b32.xlu1 %v2839_v39, %s2910_s3 }
 0xd38   :  { %2067 = vrot.lane.b32.xlu0 %v2066_v41, %s2911_s10  ;;  %v2245_v41 = vld [vmem:[%s4446_s11 + $0x240] sm:$0xff] }
 0xd3a   :  { %2127 = vrot.lane.b32.xlu1 %v2124_v50, %s2910_s3  ;;  %v2244_v50 = vld [vmem:[%s4446_s11 + $0x238] sm:$0xff] }
 0xd92   :  { %v2811_v53 = vpop.permute.xlu0 %2810 }
 0xd93   :  { %v2813_v19 = vunpack.i.h.bf16 %v2811_v53  ;;  %v2812_v9 = vunpack.i.l.bf16 %v2811_v53 }
 0xd94   :  { %v2816_v38 = vpop.permute.xlu1 %2815 }
 0xd95   :  { %v2088_v56 = vsel %vm2087_vm0, %v2812_v9, %v2813_v19  ;;  %v2818_v43 = vunpack.i.h.bf16 %v2816_v38  ;;  %v2817_v31 = vunpack.i.l.bf16 %v2816_v38 }
 0xd96   :  { %v4251_v52 = vpop.permute.xlu0 %2047  ;;  %v2139_v1 = vsel %vm324_vm6, %v2088_v56, %v2042_v63  ;;  %v2248_v63 = vld [vmem:[%s4446_s11 + $0x258] sm:$0xff]  ;;  %v2259_v56 = vld [vmem:[%s4446_s11 + $0x2b0] sm:$0xff] }
 0xd97   :  { %v2098_v48 = vsel %vm324_vm6, %v2817_v31, %v2818_v43  ;;  %v2152_v10 = vrot.slane %v2139_v1, 7  ;;  %v2243_v1 = vld [vmem:[%s4446_s11 + $0x230] sm:$0xff] }
 0xd98   :  { %v2044_v15 = vpop.permute.xlu1 %2043  ;;  %v2140_v12 = vsel %vm333_vm7, %v2090_v4, %v2098_v48 }
 0xd99   :  { %v2070_v58 = vsel %vm324_vm6, %v4181_v57, %v2044_v15  ;;  %v2071_v32 = vsel %vm333_vm7, %v2044_v15, %v4251_v52  ;;  %v2153_v62 = vrot.slane %v2140_v12, 7  ;;  %vm2074_vm6 = vcmask 130048   ;;  %v2258_v15 = vld [vmem:[%s4446_s11 + $0x2a8] sm:$0xff]  ;;  %v2271_v12 = vld [vmem:[%s4446_s11 + $0x310] sm:$0xff] }
 0xd9a   :  { %v2826_v8 = vpop.permute.xlu0 %2825  ;;  %v2166_v36 = vsel %vm1997_vm12, %v2070_v58, %v2152_v10  ;;  %v2242_v58 = vld [vmem:[%s4446_s11 + $0x228] sm:$0xff] }
 0xd9b   :  { %v2167_v46 = vsel %vm1997_vm12, %v2071_v32, %v2153_v62  ;;  %v2828_v26 = vunpack.i.h.bf16 %v2826_v8  ;;  %v2827_v28 = vunpack.i.l.bf16 %v2826_v8  ;;  %v2257_v62 = vld [vmem:[%s4446_s11 + $0x2a0] sm:$0xff] }
 0xd9c   :  { %2341 = vmatprep.mubr.f32.mxu1 %v2167_v46  ;;  %v2821_v29 = vpop.permute.xlu1 %2820  ;;  %v2270_v46 = vld [vmem:[%s4446_s11 + $0x308] sm:$0xff] }
 0xd9d   :  { %2342 = vmatmul.mubr.f32.vlgmr.msra.gmra.mxu1 %v2166_v36  ;;  %v2823_v33 = vunpack.i.h.bf16 %v2821_v29  ;;  %v2822_v21 = vunpack.i.l.bf16 %v2821_v29  ;;  %v2106_v60 = vsel %vm333_vm7, %v2828_v26, %v2827_v28  ;;  %vm2078_vm7 = vcmask 719872   ;;  %v2256_v29 = vld [vmem:[%s4446_s11 + $0x298] sm:$0xff]  ;;  %v2255_v26 = vld [vmem:[%s4446_s11 + $0x290] sm:$0xff] }
 0xd9e   :  { %2702 = vmatpush3.msra.mxu1 %v2252_v6  ;;  %v2052_v57 = vpop.permute.xlu0 %2051  ;;  %v2141_v54 = vsel %vm2072_vm5, %v2818_v43, %v2106_v60  ;;  %v2272_v43 = vld [vmem:[%s4446_s11 + $0x318] sm:$0xff]  ;;  %v2241_v6 = vld [vmem:[%s4446_s11 + $0x220] sm:$0xff] }
 0xd9f   :  { %2703 = vmatprep.subr.mxu1 %v2267_v30  ;;  %v2114_v22 = vsel %vm2072_vm5, %v2822_v21, %v2823_v33  ;;  %v2154_v51 = vrot.slane %v2141_v54, 7  ;;  %v2073_v47 = vsel %vm2072_vm5, %v4251_v52, %v2052_v57  ;;  %v2269_v30 = vld [vmem:[%s4446_s11 + $0x300] sm:$0xff]  ;;  %v2239_v21 = vld [vmem:[%s4446_s11 + $0x210] sm:$0xff] }
 0xda0   :  { %2704 = vmatpush3.msra.mxu1 %v2251_v23  ;;  %v4278_v14 = vpop.permute.xlu1 %2830  ;;  %v2142_v13 = vsel %vm2074_vm6, %v2827_v28, %v2114_v22 }
 0xda1   :  { %2705 = vmatprep.subr.mxu1 %v2266_v61  ;;  %v2832_v44 = vunpack.i.l.bf16 %v4278_v14  ;;  %v2833_v17 = vunpack.i.h.bf16 %v4278_v14  ;;  %v2168_v31 = vsel %vm1997_vm12, %v2073_v47, %v2154_v51  ;;  %v2238_v14 = vld [vmem:[%s4446_s11 + $0x208] sm:$0xff] }
 0xda2   :  { %2706 = vmatpush3.msra.mxu1 %v2250_v2  ;;  %v4286_v20 = vpop.permute.xlu0 %2135  ;;  %v2254_v2 = vld [vmem:[%s4446_s11 + $0x288] sm:$0xff] }
 0xda3   :  { %2707 = vmatprep.subr.mxu1 %v2265_v49  ;;  %v2143_v42 = vsel %vm2076_vm8, %v2142_v13, %v2832_v44  ;;  %v2075_v59 = vsel %vm2074_vm6, %v2052_v57, %v2833_v17  ;;  %v2158_v23 = vrot.slane %v4286_v20, 7  ;;  %v2240_v57 = vld [vmem:[%s4446_s11 + $0x218] sm:$0xff] }
 0xda4   :  { %2708 = vmatpush3.msra.mxu1 %v2249_v35  ;;  %v4297_v25 = vpop.permute.xlu1 %2835  ;;  %v2155_v11 = vrot.slane %v2143_v42, 7  ;;  %v2237_v35 = vld [vmem:[%s4446_s11 + $0x200] sm:$0xff] }
 0xda5   :  { %2709 = vmatprep.subr.mxu1 %v2264_v34  ;;  %v2837_v27 = vunpack.i.l.bf16 %v4297_v25  ;;  %v2838_v52 = vunpack.i.h.bf16 %v4297_v25 }
 0xda6   :  { %2710 = vmatpush3.msra.mxu1 %v2248_v63  ;;  %v4307_v40 = vpop.permute.xlu0 %2119 }
 0xda7   :  { %2711 = vmatprep.subr.mxu1 %v2263_v24  ;;  %v2137_v9 = vsel %vm2078_vm7, %v2837_v27, %v4286_v20  ;;  %v2121_v61 = vsel %vm2074_vm6, %v2832_v44, %v4307_v40 }
 0xda8   :  { %2712 = vmatpush3.msra.mxu1 %v2247_v7  ;;  %v4320_v18 = vpop.permute.xlu1 %2840 }
 0xda9   :  { %v2842_v5 = vunpack.i.l.bf16 %v4320_v18  ;;  %2713 = vmatprep.subr.mxu1 %v2262_v0  ;;  %v2843_v8 = vunpack.i.h.bf16 %v4320_v18 }
 0xdaa   :  { %2714 = vmatpush3.msra.mxu1 %v2246_v16  ;;  %v2068_v53 = vpop.permute.xlu0 %2067 }
 0xdab   :  { %2715 = vmatprep.subr.mxu1 %v2261_v3  ;;  %v2077_v39 = vsel %vm2076_vm8, %v2075_v59, %v2842_v5  ;;  %v2081_v10 = vsel %vm2080_vm9, %v2838_v52, %v2068_v53  ;;  %v2172_v28 = vsel %vm1997_vm12, %v2068_v53, %v2158_v23  ;;  %v2079_v20 = vsel %vm2078_vm7, %v2842_v5, %v2838_v52 }
 0xdac   :  { %2716 = vmatpush3.msra.mxu1 %v2245_v41  ;;  %v2128_v19 = vpop.permute.xlu1 %2127  ;;  %v2169_v38 = vsel %vm1997_vm12, %v2077_v39, %v2155_v11 }
 0xdad   :  { %v2145_v4 = vsel %vm2080_vm9, %v2128_v19, %v2137_v9  ;;  %2717 = vmatprep.subr.mxu1 %v2260_v45  ;;  %2411 = vmatprep.mubr.f32.mxu0 %v2169_v38  ;;  %v2129_v36 = vsel %vm2076_vm8, %v2843_v8, %v2128_v19 }
 0xdae   :  { %v2157_v48 = vrot.slane %v2145_v4, 7  ;;  %2718 = vmatpush3.msra.mxu1 %v2244_v50  ;;  %2412 = vmatmul.mubr.f32.vlgmr.msra.gmra.mxu0 %v2168_v31  ;;  %v2144_v33 = vsel %vm2078_vm7, %v2121_v61, %v2129_v36  ;;  %v2557_v4 = vld [vmem:[%s4447_s12] sm:$0x1] }
 0xdaf   :  { %2719 = vmatprep.subr.mxu1 %v2259_v56  ;;  %2759 = vmatpush3.msra.mxu0 %v2272_v43  ;;  %v2156_v49 = vrot.slane %v2144_v33, 7 }
 0xdb0   :  { %2720 = vmatpush3.msra.mxu1 %v2243_v1  ;;  %2760 = vmatprep.subr.mxu0 %v4516_v37  ;;  %v2171_v32 = vsel %vm1997_vm12, %v2081_v10, %v2157_v48 }
 0xdb1   :  { %2721 = vmatprep.subr.mxu1 %v2258_v15  ;;  %2761 = vmatpush3.msra.mxu0 %v2271_v12  ;;  %v2170_v34 = vsel %vm1997_vm12, %v2079_v20, %v2156_v49  ;;  %v2558_v15 = vld [vmem:[%s4447_s12 + $0x1] sm:$0x1] }
 0xdb2   :  { %2722 = vmatpush3.msra.mxu1 %v2242_v58  ;;  %2481 = vmatprep.mubr.f32.mxu1 %v2171_v32 }
 0xdb3   :  { %2762 = vmatprep.subr.mxu0 %v4516_v37  ;;  %2723 = vmatprep.subr.mxu1 %v2257_v62 }
 0xdb4   :  { %2763 = vmatpush3.msra.mxu0 %v2270_v46  ;;  %2724 = vmatpush3.msra.mxu1 %v2241_v6 }
 0xdb5   :  { %2764 = vmatprep.subr.mxu0 %v4516_v37  ;;  %2725 = vmatprep.subr.mxu1 %v2256_v29 }
 0xdb6   :  { %2765 = vmatpush3.msra.mxu0 %v2269_v30  ;;  %2766 = vmatprep.mubr.msk.f32.mxu0 %vm2897_vm1, %v4516_v37  ;;  %v2253_v37 = vld [vmem:[%s4446_s11 + $0x280] sm:$0xff] }
 0xdb7   :  { %2726 = vmatpush3.msra.mxu1 %v2240_v57  ;;  %2767 = vmatmul.mubr.msk.f32.vlgmr.msra.gmra.mxu0 %vm2273_vm10, %v2172_v28 }
 0xdb8   :  { %2727 = vmatprep.subr.mxu1 %v2255_v26 }
 0xdb9   :  { %2728 = vmatpush3.msra.mxu1 %v2239_v21 }
 0xdba   :  { %2729 = vmatprep.subr.mxu1 %v2254_v2 }
 0xdbb   :  { %2730 = vmatpush3.msra.mxu1 %v2238_v14 }
 0xdbc   :  { %2731 = vmatprep.subr.mxu1 %v2253_v37 }
 0xdbd   :  { %2732 = vmatpush3.msra.mxu1 %v2237_v35 }
 0xdbe   :  { %2482 = vmatmul.mubr.f32.vlgmr.msra.gmra.mxu1 %v2170_v34 }
 0xe5d   :  { %v2663_v63 = vpop.f32.mrf.mxu1 }
 0xe5f   :  { %v2664_v24 = vpop.f32.mrf.mxu1 }
 0xe60   :  { %v2665_v17 = vadd.f32 %v2664_v24, %v2663_v63 }
 0xe6e   :  { %v2698_v60 = vpop.f32.mrf.mxu0 }
 0xe70   :  { %v2699_v22 = vpop.f32.mrf.mxu0 }
 0xe71   :  { %v2700_v7 = vadd.f32 %v2699_v22, %v2698_v60 }
 0xe73   :  { %v2414_v13 = vadd.f32 %v2700_v7, %v2665_v17 }
 0xe77   :  { %v2553_v44 = vpop.f32.mrf.mxu0 }
 0xe79   :  { %v2768_v25 = vpop.f32.mrf.mxu0 }
 0xe7e   :  { %v2733_v54 = vpop.f32.mrf.mxu1 }
 0xe80   :  { %v2734_v40 = vpop.f32.mrf.mxu1 }
 0xe81   :  { %v2735_v0 = vadd.f32 %v2734_v40, %v2733_v54 }
 0xe83   :  { %v2484_v16 = vadd.f32 %v2735_v0, %v2414_v13 }
 0xe85   :  { %v2554_v42 = vadd.f32 %v2553_v44, %v2484_v16 }
 0xe87   :  { %v2559_v27 = vsel %vm139_vm3, %v2554_v42, 0.0  ;;  %v2567_v18 = vmul.f32 %v2554_v42, %v2554_v42 }
 0xe88   :  { %v2560_v3 = vrot.slane %v2559_v27, 4 }
 0xe89   :  { %v2568_v51 = vsel %vm139_vm3, %v2567_v18, 0.0 }
 0xe8a   :  { %v2561_v5 = vadd.f32 %v2560_v3, %v2559_v27  ;;  %v2569_v41 = vrot.slane %v2568_v51, 4 }
 0xe8c   :  { %v2562_v47 = vrot.slane %v2561_v5, 2  ;;  %v2570_v45 = vadd.f32 %v2569_v41, %v2568_v51 }
 0xe8e   :  { %v2563_v59 = vadd.f32 %v2562_v47, %v2561_v5  ;;  %v2571_v11 = vrot.slane %v2570_v45, 2 }
 0xe90   :  { %v2564_v39 = vrot.slane %v2563_v59, 1  ;;  %v2572_v50 = vadd.f32 %v2571_v11, %v2570_v45 }
 0xe92   :  { %v2565_v53 = vadd.f32 %v2564_v39, %v2563_v59  ;;  %v2573_v19 = vrot.slane %v2572_v50, 1 }
 0xe94   :  { %v2574_v9 = vadd.f32 %v2573_v19, %v2572_v50  ;;  %v2566_v38 = vmul.f32 0.5, %v2565_v53 }
 0xe96   :  { %v2575_v56 = vmul.f32 0.5, %v2574_v9  ;;  %v2576_v43 = vmul.f32 %v2566_v38, %v2566_v38 }
 0xe98   :  { %v2577_v31 = vsub.f32 %v2575_v56, %v2576_v43 }
 0xe9a   :  { %v2578_v52 = vadd.f32 0.8, %v2577_v31 }
 0xe9c   :  { %2872 = vrsqrt.f32 %v2578_v52 }
 0xea9   :  { %v2873_v1 = vpop.eup %2872 }
 0xeaa   :  { %v2580_v48 = vmul.f32 %v2873_v1, %v2557_v4 }
 0xeac   :  { %v2584_v12 = vrot.slane %v2580_v48, %v4515_v55  ;;  %v2586_v10 = vmul.f32 %v2580_v48, %v2566_v38 }
 0xeae   :  { %v2587_v58 = vsub.f32 %v2558_v15, %v2586_v10  ;;  %v2585_v32 = vmul.f32 %v2584_v12, %v2554_v42 }
 0xeb0   :  { %v2591_v62 = vrot.slane %v2587_v58, %v4515_v55 }
 0xeb2   :  { %v2592_v8 = vadd.f32 %v2591_v62, %v2585_v32 }
 0xeb4   :  { %v2593_v46 = vmul.f32 0.2, %v2592_v8 }
 0xeb6   :  { %v2594_v6 = vmax.f32 %v2592_v8, %v2593_v46 }
 0xeb8   :  { %2595 = vst.msk [vmem:[#allocation2] sm:$0x3] %vm139_vm3, %v2594_v6 }
 0xeb9   :  { %2885 = shalt.err (!%p2882_p4)
}
 0xeba   :  { %2605 = dma.vmem_to_hbm [thread:$0]  %s2603_s17, 32, %s4449_s14, [#allocation3]  }
 0xebb   :  { %2894 = dma.done.wait [#allocation3], 32  }
 0xebc   :  { %2895 = vsyncadd [#allocation3], 4294967264 }
 0xebd   :  { %2609 = vsyncpa [#allocation3], 1 }

</bundles_post_ra>
